<compile_context>
chip_gen: v6e
topology: v6e:2x2x1
jax: 0.10.0
libtpu: 0.0.40
codegen_flags: <defaults>
</compile_context>

<pallas_src>
import functools

import numpy as np
import jax
import jax.numpy as jnp
from jax.experimental import pallas as pl
from jax.experimental.pallas import tpu as pltpu


_VMEM_LIMIT = 32 * 1024 * 1024   # actual usage ~2 MiB; leaves headroom on v7x


# ----------------------------------------------------------------------------
# Host-side packing helpers (run once at init)
# ----------------------------------------------------------------------------
def _bilinear_matrix(out_size, in_size):
    """PyTorch bilinear, align_corners=False, as a dense (out, in) matrix."""
    R = np.zeros((out_size, in_size), np.float32)
    scale = in_size / out_size
    for o in range(out_size):
        s = max((o + 0.5) * scale - 0.5, 0.0)
        i0 = min(int(np.floor(s)), in_size - 1)
        i1 = min(i0 + 1, in_size - 1)
        l1 = min(max(s - i0, 0.0), 1.0)
        R[o, i0] += 1.0 - l1
        R[o, i1] += l1
    return R


def _convT_layer_pack(w_np, scale_np, shift_np, H, W):
    """Pack ConvTranspose2d(k=4, s=2, p=1, bias=False) [+ folded BN] for the
    in-kernel formulation  Out(2H, 2W*Cout) = sum_k  L_k @ (X(H, W*Cin) @ M_k).

    Output element out[2i+a, 2j+b, co] receives x[i+di, j+dj, ci] through tap
    (kh, kw) = (a - 2*di + 1, b - 2*dj + 1) when the tap is inside [0,4).
    Only (di, a) in {(-1,0), (0,0), (0,1), (1,1)} yield valid kh.
    Activation rows are stored padded up to 8 sublanes; L_k only reads the
    valid rows, so padding garbage never propagates.
    """
    Cin, Cout = w_np.shape[0], w_np.shape[1]
    OW = 2 * W
    owc = OW * Cout
    in_rows = max(H, 8)
    out_rows = max(2 * H, 8)
    terms = [(-1, 0), (0, 0), (0, 1), (1, 1)]
    m_blocks, l_blocks = [], []
    for (di, a) in terms:
        kh = a - 2 * di + 1
        M = np.zeros((W * Cin, owc), np.float32)
        for j in range(W):
            for b in (0, 1):
                ow = 2 * j + b
                for dj in (-1, 0, 1):
                    w_in = j + dj
                    kw = b - 2 * dj + 1
                    if 0 <= w_in < W and 0 <= kw <= 3:
                        M[w_in * Cin:(w_in + 1) * Cin,
                          ow * Cout:(ow + 1) * Cout] += w_np[:, :, kh, kw]
        L = np.zeros((out_rows, in_rows), np.float32)
        for i in range(H):
            ih = i + di
            if 0 <= ih < H:
                L[2 * i + a, ih] = 1.0
        m_blocks.append(M)
        l_blocks.append(L)
    Mcat = np.concatenate(m_blocks, axis=1)          # (W*Cin, 4*owc)
    Lcat = np.concatenate(l_blocks, axis=1)          # (out_rows, 4*in_rows)
    if scale_np is not None:                         # fold BN scale (f32)
        Mcat = Mcat * np.tile(np.tile(scale_np, OW), 4)[None, :]
    bias = (np.tile(shift_np, OW)[None, :].astype(np.float32)
            if shift_np is not None else None)       # BN shift as bias row
    return Mcat, Lcat, bias


def _linear_pack(lin_w, lin_b, fs, C0):
    """Permute Linear columns so the output is already in (h, w, c) order."""
    Wt = lin_w.T                                     # (nz, C0*fs*fs)
    perm = np.empty(C0 * fs * fs, np.int64)
    for c in range(C0):
        for h in range(fs):
            for ww in range(fs):
                perm[(h * fs + ww) * C0 + c] = c * fs * fs + h * fs + ww
    return Wt[:, perm], lin_b[perm][None, :]


def _hidden_resize_pack(in_hw, out_hw, C, in_rows_stored, out_rows_stored):
    """r2 skip resize:  r2 = Rh @ (c2 @ K),  K = kron(Rw^T, I_C).
    (The Kronecker form wastes a few MACs but keeps everything a plain 2-D
    matmul; negligible at these sizes.)"""
    Rh = _bilinear_matrix(out_hw, in_hw)
    Rhp = np.zeros((out_rows_stored, in_rows_stored), np.float32)
    Rhp[:out_hw, :in_hw] = Rh                        # zero cols ignore row padding
    Rw = _bilinear_matrix(out_hw, in_hw)
    K = np.kron(Rw.T, np.eye(C, dtype=np.float32))   # (in_hw*C, out_hw*C)
    return Rhp, K


def _final_resize_pack(in_hw, C, out_hw=64):
    """Final resize producing NCHW planes:  plane_c = (Rh @ c5) @ K[:, c]."""
    Rh = _bilinear_matrix(out_hw, in_hw)             # (64, in_hw)
    Rw = _bilinear_matrix(out_hw, in_hw)             # (64, in_hw)
    K = np.zeros((in_hw * C, C * out_hw), np.float32)
    for c in range(C):
        for ow in range(out_hw):
            for iw in range(in_hw):
                K[iw * C + c, c * out_hw + ow] = Rw[ow, iw]
    return Rh, K


def init_generator_params(key, num_noises, num_colors, depths, image_size):
    """Synthesize parameters in the PyTorch layouts (inference-mode BN folded
    to scale/shift)."""
    if image_size % 16 != 0:
        raise Exception("Size of the image must be divisible by 16")
    fs = image_size // 16
    d = depths
    keys = jax.random.split(key, 20)

    def w(k, shape, s=0.05):
        return s * jax.random.normal(k, shape, dtype=jnp.float32)

    p = {}
    lin_out = d * 8 * fs * fs
    p["lin_w"] = w(keys[0], (lin_out, num_noises))    # torch Linear (out, in)
    p["lin_b"] = w(keys[1], (lin_out,))
    conv_dims = [(d * 8, d * 4), (d * 4, d * 2), (d * 2, d),
                 (d * 2 + d, d), (d, num_colors)]
    for i, (cin, cout) in enumerate(conv_dims, start=1):
        p[f"w{i}"] = w(keys[1 + i], (cin, cout, 4, 4))  # torch ConvT (Cin,Cout,kH,kW)
    bn_channels = [d * 4, d * 2, d, d]
    for i, c in enumerate(bn_channels, start=1):
        k1, k2, k3, k4 = jax.random.split(keys[10 + i], 4)
        gamma = 1.0 + 0.1 * jax.random.normal(k1, (c,))
        beta = 0.1 * jax.random.normal(k2, (c,))
        mean = 0.1 * jax.random.normal(k3, (c,))
        var = 0.5 + jax.random.uniform(k4, (c,))
        scale = gamma / jnp.sqrt(var + 1e-5)
        shift = beta - mean * scale
        p[f"bn{i}_scale"] = scale.astype(jnp.float32)
        p[f"bn{i}_shift"] = shift.astype(jnp.float32)
    return p, fs


_PACKED_ORDER = ("lin_w", "lin_b",
                 "m1", "l1", "b1", "m2", "l2", "b2", "m3", "l3", "b3",
                 "m4a", "m4b", "l4", "b4", "m5", "l5",
                 "rh2", "k2", "rh5", "k5")


def pack_generator_params(raw, fs, depths, num_colors):
    """One-time host-side packing: tap matrices, BN fold, bilinear matrices,
    bf16 casts.  Runs outside the jitted forward."""
    d = depths
    np_raw = {k: np.asarray(v, np.float32) for k, v in raw.items()}
    C0 = d * 8
    p = {}
    lw, lb = _linear_pack(np_raw["lin_w"], np_raw["lin_b"], fs, C0)
    p["lin_w"] = jnp.asarray(lw, jnp.bfloat16)
    p["lin_b"] = jnp.asarray(lb, jnp.float32)

    layer_hw = [fs, 2 * fs, 4 * fs, 8 * fs, 16 * fs]   # per-layer input H==W
    for i in range(1, 6):
        HW = layer_hw[i - 1]
        w_np = np_raw[f"w{i}"]
        scale = np_raw.get(f"bn{i}_scale")
        shift = np_raw.get(f"bn{i}_shift")
        M, L, bias = _convT_layer_pack(w_np, scale, shift, HW, HW)
        if i == 4:
            # conv4 input is cat(conv3_out[d ch], resized_conv2_out[2d ch]):
            # split M rows so the concat never has to be materialized.
            ci = np.arange(HW * w_np.shape[0]) % w_np.shape[0]
            p["m4a"] = jnp.asarray(M[ci < d], jnp.bfloat16)
            p["m4b"] = jnp.asarray(M[ci >= d], jnp.bfloat16)
        else:
            p[f"m{i}"] = jnp.asarray(M, jnp.bfloat16)
        p[f"l{i}"] = jnp.asarray(L, jnp.float32)
        if bias is not None:
            p[f"b{i}"] = jnp.asarray(bias, jnp.float32)

    rh2, k2 = _hidden_resize_pack(4 * fs, 8 * fs, 2 * d,
                                  max(4 * fs, 8), max(8 * fs, 8))
    p["rh2"] = jnp.asarray(rh2, jnp.bfloat16)
    p["k2"] = jnp.asarray(k2, jnp.bfloat16)
    rh5, k5 = _final_resize_pack(32 * fs, num_colors, 64)
    p["rh5"] = jnp.asarray(rh5, jnp.float32)
    p["k5"] = jnp.asarray(k5, jnp.float32)
    return p


# ----------------------------------------------------------------------------
# The single fused kernel
# ----------------------------------------------------------------------------
def _generator_kernel(x_ref, lw_ref, lb_ref,
                      m1_ref, l1_ref, b1_ref,
                      m2_ref, l2_ref, b2_ref,
                      m3_ref, l3_ref, b3_ref,
                      m4a_ref, m4b_ref, l4_ref, b4_ref,
                      m5_ref, l5_ref,
                      rh2_ref, k2_ref, rh5_ref, k5_ref,
                      o_ref, *, fs, depths, num_colors):
    f32 = jnp.float32
    bf16 = jnp.bfloat16
    d = depths

    def conv_t(parts, m_refs, l_ref, b_ref, H, W, cout, act, out_dtype=bf16):
        """ConvTranspose2d(4,2,1)+BN+act on the (rows, W*C) 2-D layout."""
        owc = 2 * W * cout
        in_rows = max(H, 8)
        out = None
        for k in range(4):                               # (di, a) terms
            t = None
            for x2, m_ref in zip(parts, m_refs):         # channel-split inputs
                tk = jnp.dot(x2, m_ref[:, k * owc:(k + 1) * owc],
                             preferred_element_type=f32)
                t = tk if t is None else t + tk
            lk = l_ref[:, k * in_rows:(k + 1) * in_rows]
            contrib = jnp.dot(lk, t, preferred_element_type=f32)
            out = contrib if out is None else out + contrib
        if b_ref is not None:
            out = out + b_ref[...]
        if act == "relu":
            out = jnp.maximum(out, 0.0)
        elif act == "tanh":
            out = jnp.tanh(out)
        return out.astype(out_dtype)

    # Linear (bias fused), already permuted to the (h, w, c) feature order.
    C0 = d * 8
    row_w = fs * C0
    xin = x_ref[0].astype(bf16)                                  # (1, nz)
    lin = jnp.dot(xin, lw_ref[...], preferred_element_type=f32) + lb_ref[...]
    if fs == 1:
        x1 = jnp.broadcast_to(lin, (8, row_w)).astype(bf16)      # padded rows
    else:
        rows = [lin[:, h * row_w:(h + 1) * row_w] for h in range(fs)]
        x1 = jnp.concatenate(rows, axis=0)
        if fs < 8:
            x1 = jnp.concatenate(
                [x1, jnp.zeros((8 - fs, row_w), f32)], axis=0)
        x1 = x1.astype(bf16)

    c1 = conv_t([x1], [m1_ref], l1_ref, b1_ref, fs, fs, d * 4, "relu")
    c2 = conv_t([c1], [m2_ref], l2_ref, b2_ref, 2 * fs, 2 * fs, d * 2, "relu")
    c3 = conv_t([c2], [m3_ref], l3_ref, b3_ref, 4 * fs, 4 * fs, d, "relu")

    # Bilinear skip resize of c2 up to c3's spatial size (bf16 MXU, f32 acc).
    t2 = jnp.dot(c2, k2_ref[...], preferred_element_type=f32).astype(bf16)
    r2 = jnp.dot(rh2_ref[...], t2, preferred_element_type=f32).astype(bf16)

    # conv4 consumes cat(c3, r2): two partial matmuls, concat never built.
    c4 = conv_t([c3, r2], [m4a_ref, m4b_ref], l4_ref, b4_ref,
                8 * fs, 8 * fs, d, "relu")
    c5 = conv_t([c4], [m5_ref], l5_ref, None, 16 * fs, 16 * fs, num_colors,
                "tanh", out_dtype=f32)

    # Final bilinear to 64x64, emitted directly as NCHW planes (f32).
    t5 = jnp.dot(rh5_ref[...], c5, preferred_element_type=f32)   # (64, 32fs*nc)
    for c in range(num_colors):
        plane = jnp.dot(t5, k5_ref[:, c * 64:(c + 1) * 64],
                        preferred_element_type=f32)              # (64, 64)
        o_ref[0, c, :, :] = plane


def generator_forward(noise, packed, *, fs, depths, num_colors):
    B, nz = noise.shape
    x = noise.reshape(B, 1, nz)
    weights = [packed[k] for k in _PACKED_ORDER]

    in_specs = [pl.BlockSpec((1, 1, nz), lambda b: (b, 0, 0))]
    in_specs += [pl.BlockSpec(w.shape, lambda b: (0, 0)) for w in weights]
    out_spec = pl.BlockSpec((1, num_colors, 64, 64), lambda b: (b, 0, 0, 0))

    # Rough advisory cost estimate (per-weight matmuls, ~generic row count).
    weight_macs = sum(int(np.prod(w.shape)) for k, w in zip(_PACKED_ORDER, weights)
                      if w.shape[0] > 1)
    flops = int(2 * 32 * weight_macs) * B
    bytes_accessed = int(x.size * 4
                         + sum(int(w.size) * w.dtype.itemsize for w in weights)
                         + B * num_colors * 64 * 64 * 4)
    transcendentals = int(B * (32 * fs) * (32 * fs) * num_colors)

    kern = functools.partial(_generator_kernel, fs=fs, depths=depths,
                             num_colors=num_colors)
    return pl.pallas_call(
        kern,
        out_shape=jax.ShapeDtypeStruct((B, num_colors, 64, 64), jnp.float32),
        grid=(B,),
        in_specs=in_specs,
        out_specs=out_spec,
        compiler_params=pltpu.CompilerParams(
            dimension_semantics=("parallel",),       # batch across cores (v7x)
            vmem_limit_bytes=_VMEM_LIMIT),
        cost_estimate=pl.CostEstimate(flops=flops,
                                      transcendentals=transcendentals,
                                      bytes_accessed=bytes_accessed),
    )(x, *weights)


# ----------------------------------------------------------------------------
# Independent numpy reference (scatter-form transposed conv) for validation
# ----------------------------------------------------------------------------
def reference_forward(noise, raw, fs, depths, num_colors):
    d = depths
    B = noise.shape[0]
    x = np.asarray(noise, np.float32)
    lw = np.asarray(raw["lin_w"], np.float32)
    lb = np.asarray(raw["lin_b"], np.float32)
    lin = x @ lw.T + lb
    h = lin.reshape(B, d * 8, fs, fs).transpose(0, 2, 3, 1)       # NHWC

    def conv_t(xin, w, scale, shift, act):
        w = np.asarray(w, np.float32)
        Bq, H, W, _ = xin.shape
        Cout = w.shape[1]
        full = np.zeros((Bq, 2 * H + 2, 2 * W + 2, Cout), np.float32)
        for kh in range(4):
            for kw in range(4):
                full[:, kh:kh + 2 * H:2, kw:kw + 2 * W:2, :] += np.einsum(
                    "bhwi,io->bhwo", xin, w[:, :, kh, kw])
        y = full[:, 1:1 + 2 * H, 1:1 + 2 * W, :]                  # padding=1 crop
        if scale is not None:
            y = y * np.asarray(scale, np.float32) + np.asarray(shift, np.float32)
        return np.maximum(y, 0.0) if act == "relu" else np.tanh(y)

    def resize(xin, oh, ow):
        _, H, W, _ = xin.shape
        Rh = _bilinear_matrix(oh, H)
        Rw = _bilinear_matrix(ow, W)
        return np.einsum("oh,bhwc,pw->bopc", Rh, xin, Rw)

    c1 = conv_t(h, raw["w1"], raw["bn1_scale"], raw["bn1_shift"], "relu")
    c2 = conv_t(c1, raw["w2"], raw["bn2_scale"], raw["bn2_shift"], "relu")
    c3 = conv_t(c2, raw["w3"], raw["bn3_scale"], raw["bn3_shift"], "relu")
    r2 = resize(c2, c3.shape[1], c3.shape[2])
    cat = np.concatenate([c3, r2], axis=-1)
    c4 = conv_t(cat, raw["w4"], raw["bn4_scale"], raw["bn4_shift"], "relu")
    c5 = conv_t(c4, raw["w5"], None, None, "tanh")
    out = resize(c5, 64, 64)
    return out.transpose(0, 3, 1, 2)                              # NCHW


# ----------------------------------------------------------------------------
if __name__ == "__main__":
    BATCH = 2
    NUM_NOISES = 16
    NUM_COLORS = 3
    DEPTHS = 16
    IMAGE_SIZE = 16       # divisible by 16 -> final_size = 1

    key = jax.random.PRNGKey(0)
    k_params, k_noise = jax.random.split(key)
    raw, fs = init_generator_params(k_params, NUM_NOISES, NUM_COLORS,
                                    DEPTHS, IMAGE_SIZE)
    packed = pack_generator_params(raw, fs, DEPTHS, NUM_COLORS)
    noise = jax.random.normal(k_noise, (BATCH, NUM_NOISES), dtype=jnp.float32)

    fwd = jax.jit(functools.partial(generator_forward, fs=fs, depths=DEPTHS,
                                    num_colors=NUM_COLORS))
    out = jax.block_until_ready(fwd(noise, packed))

    assert out.shape == (BATCH, NUM_COLORS, 64, 64), out.shape
    assert bool(jnp.all(jnp.isfinite(out)))
    assert float(jnp.max(jnp.abs(out))) <= 1.0 + 1e-3   # tanh + bilinear mix

    ref = reference_forward(np.asarray(noise), raw, fs, DEPTHS, NUM_COLORS)
    max_err = float(np.max(np.abs(np.asarray(out, np.float32) - ref)))
    assert max_err < 0.1, f"max abs error vs reference = {max_err}"
    print("KERNEL_OK")
</pallas_src>

<mosaic_0001>
module attributes {stable_mosaic.version = 11 : i64} {
  func.func @_generator_kernel(%arg0: i32, %arg1: memref<1x1x16xf32, #tpu.memory_space<vmem>>, %arg2: memref<16x128xbf16, #tpu.memory_space<vmem>>, %arg3: memref<1x128xf32, #tpu.memory_space<vmem>>, %arg4: memref<128x512xbf16, #tpu.memory_space<vmem>>, %arg5: memref<8x32xf32, #tpu.memory_space<vmem>>, %arg6: memref<1x128xf32, #tpu.memory_space<vmem>>, %arg7: memref<128x512xbf16, #tpu.memory_space<vmem>>, %arg8: memref<8x32xf32, #tpu.memory_space<vmem>>, %arg9: memref<1x128xf32, #tpu.memory_space<vmem>>, %arg10: memref<128x512xbf16, #tpu.memory_space<vmem>>, %arg11: memref<8x32xf32, #tpu.memory_space<vmem>>, %arg12: memref<1x128xf32, #tpu.memory_space<vmem>>, %arg13: memref<128x1024xbf16, #tpu.memory_space<vmem>>, %arg14: memref<256x1024xbf16, #tpu.memory_space<vmem>>, %arg15: memref<16x32xf32, #tpu.memory_space<vmem>>, %arg16: memref<1x256xf32, #tpu.memory_space<vmem>>, %arg17: memref<256x384xbf16, #tpu.memory_space<vmem>>, %arg18: memref<32x64xf32, #tpu.memory_space<vmem>>, %arg19: memref<8x8xbf16, #tpu.memory_space<vmem>>, %arg20: memref<128x256xbf16, #tpu.memory_space<vmem>>, %arg21: memref<64x32xf32, #tpu.memory_space<vmem>>, %arg22: memref<96x192xf32, #tpu.memory_space<vmem>>, %arg23: memref<1x3x64x64xf32, #tpu.memory_space<vmem>>) attributes {dimension_semantics = [#tpu.dimension_semantics<parallel>], iteration_bounds = array<i64: 2>, scalar_prefetch = 0 : i64, scratch_operands = 0 : i64, tpu.core_type = #tpu.core_type<tc>, window_params = [{transform_indices = @transform_0, window_bounds = array<i64: 1, 1, 16>}, {pipeline_mode = #tpu.pipeline_mode<synchronous>, transform_indices = @transform_1, window_bounds = array<i64: 16, 128>}, {pipeline_mode = #tpu.pipeline_mode<synchronous>, transform_indices = @transform_2, window_bounds = array<i64: 1, 128>}, {pipeline_mode = #tpu.pipeline_mode<synchronous>, transform_indices = @transform_3, window_bounds = array<i64: 128, 512>}, {pipeline_mode = #tpu.pipeline_mode<synchronous>, transform_indices = @transform_4, window_bounds = array<i64: 8, 32>}, {pipeline_mode = #tpu.pipeline_mode<synchronous>, transform_indices = @transform_5, window_bounds = array<i64: 1, 128>}, {pipeline_mode = #tpu.pipeline_mode<synchronous>, transform_indices = @transform_6, window_bounds = array<i64: 128, 512>}, {pipeline_mode = #tpu.pipeline_mode<synchronous>, transform_indices = @transform_7, window_bounds = array<i64: 8, 32>}, {pipeline_mode = #tpu.pipeline_mode<synchronous>, transform_indices = @transform_8, window_bounds = array<i64: 1, 128>}, {pipeline_mode = #tpu.pipeline_mode<synchronous>, transform_indices = @transform_9, window_bounds = array<i64: 128, 512>}, {pipeline_mode = #tpu.pipeline_mode<synchronous>, transform_indices = @transform_10, window_bounds = array<i64: 8, 32>}, {pipeline_mode = #tpu.pipeline_mode<synchronous>, transform_indices = @transform_11, window_bounds = array<i64: 1, 128>}, {pipeline_mode = #tpu.pipeline_mode<synchronous>, transform_indices = @transform_12, window_bounds = array<i64: 128, 1024>}, {pipeline_mode = #tpu.pipeline_mode<synchronous>, transform_indices = @transform_13, window_bounds = array<i64: 256, 1024>}, {pipeline_mode = #tpu.pipeline_mode<synchronous>, transform_indices = @transform_14, window_bounds = array<i64: 16, 32>}, {pipeline_mode = #tpu.pipeline_mode<synchronous>, transform_indices = @transform_15, window_bounds = array<i64: 1, 256>}, {pipeline_mode = #tpu.pipeline_mode<synchronous>, transform_indices = @transform_16, window_bounds = array<i64: 256, 384>}, {pipeline_mode = #tpu.pipeline_mode<synchronous>, transform_indices = @transform_17, window_bounds = array<i64: 32, 64>}, {pipeline_mode = #tpu.pipeline_mode<synchronous>, transform_indices = @transform_18, window_bounds = array<i64: 8, 8>}, {pipeline_mode = #tpu.pipeline_mode<synchronous>, transform_indices = @transform_19, window_bounds = array<i64: 128, 256>}, {pipeline_mode = #tpu.pipeline_mode<synchronous>, transform_indices = @transform_20, window_bounds = array<i64: 64, 32>}, {pipeline_mode = #tpu.pipeline_mode<synchronous>, transform_indices = @transform_21, window_bounds = array<i64: 96, 192>}, {transform_indices = @transform_22, window_bounds = array<i64: 1, 3, 64, 64>}]} {
    %c0 = arith.constant 0 : index
    %c0_0 = arith.constant 0 : index
    %c0_1 = arith.constant 0 : index
    %0 = vector.load %arg1[%c0, %c0_0, %c0_1] : memref<1x1x16xf32, #tpu.memory_space<vmem>>, vector<1x1x16xf32>
    %1 = vector.shape_cast %0 : vector<1x1x16xf32> to vector<1x16xf32>
    %2 = arith.truncf %1 : vector<1x16xf32> to vector<1x16xbf16>
    %c0_2 = arith.constant 0 : index
    %c0_3 = arith.constant 0 : index
    %3 = vector.load %arg2[%c0_2, %c0_3] : memref<16x128xbf16, #tpu.memory_space<vmem>>, vector<16x128xbf16>
    %cst = arith.constant dense<0.000000e+00> : vector<1x128xf32>
    %4 = tpu.matmul %2, %3, %cst {dimension_numbers = #tpu.dot_dimension_numbers<[1], [0], [0], [1], [0, 0, 1, 1], [], []>} : vector<1x16xbf16>, vector<16x128xbf16>, vector<1x128xf32> -> vector<1x128xf32>
    %c0_4 = arith.constant 0 : index
    %c0_5 = arith.constant 0 : index
    %5 = vector.load %arg3[%c0_4, %c0_5] : memref<1x128xf32, #tpu.memory_space<vmem>>, vector<1x128xf32>
    %6 = arith.addf %4, %5 : vector<1x128xf32>
    %7 = vector.shape_cast %6 : vector<1x128xf32> to vector<1x128xf32>
    %8 = vector.broadcast %7 : vector<1x128xf32> to vector<8x128xf32>
    %9 = arith.truncf %8 : vector<8x128xf32> to vector<8x128xbf16>
    %c0_6 = arith.constant 0 : index
    %c0_7 = arith.constant 0 : index
    %10 = vector.load %arg4[%c0_6, %c0_7] : memref<128x512xbf16, #tpu.memory_space<vmem>>, vector<128x128xbf16>
    %cst_8 = arith.constant dense<0.000000e+00> : vector<8x128xf32>
    %11 = tpu.matmul %9, %10, %cst_8 {dimension_numbers = #tpu.dot_dimension_numbers<[1], [0], [0], [1], [0, 0, 1, 1], [], []>} : vector<8x128xbf16>, vector<128x128xbf16>, vector<8x128xf32> -> vector<8x128xf32>
    %c0_9 = arith.constant 0 : index
    %c0_10 = arith.constant 0 : index
    %12 = vector.load %arg5[%c0_9, %c0_10] : memref<8x32xf32, #tpu.memory_space<vmem>>, vector<8x8xf32>
    %cst_11 = arith.constant dense<0.000000e+00> : vector<8x128xf32>
    %13 = tpu.matmul %12, %11, %cst_11 {dimension_numbers = #tpu.dot_dimension_numbers<[1], [0], [0], [1], [0, 0, 1, 1], [], []>} : vector<8x8xf32>, vector<8x128xf32>, vector<8x128xf32> -> vector<8x128xf32>
    %c0_12 = arith.constant 0 : index
    %c128 = arith.constant 128 : index
    %14 = vector.load %arg4[%c0_12, %c128] : memref<128x512xbf16, #tpu.memory_space<vmem>>, vector<128x128xbf16>
    %cst_13 = arith.constant dense<0.000000e+00> : vector<8x128xf32>
    %15 = tpu.matmul %9, %14, %cst_13 {dimension_numbers = #tpu.dot_dimension_numbers<[1], [0], [0], [1], [0, 0, 1, 1], [], []>} : vector<8x128xbf16>, vector<128x128xbf16>, vector<8x128xf32> -> vector<8x128xf32>
    %c0_14 = arith.constant 0 : index
    %c8 = arith.constant 8 : index
    %16 = vector.load %arg5[%c0_14, %c8] : memref<8x32xf32, #tpu.memory_space<vmem>>, vector<8x8xf32>
    %cst_15 = arith.constant dense<0.000000e+00> : vector<8x128xf32>
    %17 = tpu.matmul %16, %15, %cst_15 {dimension_numbers = #tpu.dot_dimension_numbers<[1], [0], [0], [1], [0, 0, 1, 1], [], []>} : vector<8x8xf32>, vector<8x128xf32>, vector<8x128xf32> -> vector<8x128xf32>
    %18 = arith.addf %13, %17 : vector<8x128xf32>
    %c0_16 = arith.constant 0 : index
    %c256 = arith.constant 256 : index
    %19 = vector.load %arg4[%c0_16, %c256] : memref<128x512xbf16, #tpu.memory_space<vmem>>, vector<128x128xbf16>
    %cst_17 = arith.constant dense<0.000000e+00> : vector<8x128xf32>
    %20 = tpu.matmul %9, %19, %cst_17 {dimension_numbers = #tpu.dot_dimension_numbers<[1], [0], [0], [1], [0, 0, 1, 1], [], []>} : vector<8x128xbf16>, vector<128x128xbf16>, vector<8x128xf32> -> vector<8x128xf32>
    %c0_18 = arith.constant 0 : index
    %c16 = arith.constant 16 : index
    %21 = vector.load %arg5[%c0_18, %c16] : memref<8x32xf32, #tpu.memory_space<vmem>>, vector<8x8xf32>
    %cst_19 = arith.constant dense<0.000000e+00> : vector<8x128xf32>
    %22 = tpu.matmul %21, %20, %cst_19 {dimension_numbers = #tpu.dot_dimension_numbers<[1], [0], [0], [1], [0, 0, 1, 1], [], []>} : vector<8x8xf32>, vector<8x128xf32>, vector<8x128xf32> -> vector<8x128xf32>
    %23 = arith.addf %18, %22 : vector<8x128xf32>
    %c0_20 = arith.constant 0 : index
    %c384 = arith.constant 384 : index
    %24 = vector.load %arg4[%c0_20, %c384] : memref<128x512xbf16, #tpu.memory_space<vmem>>, vector<128x128xbf16>
    %cst_21 = arith.constant dense<0.000000e+00> : vector<8x128xf32>
    %25 = tpu.matmul %9, %24, %cst_21 {dimension_numbers = #tpu.dot_dimension_numbers<[1], [0], [0], [1], [0, 0, 1, 1], [], []>} : vector<8x128xbf16>, vector<128x128xbf16>, vector<8x128xf32> -> vector<8x128xf32>
    %c0_22 = arith.constant 0 : index
    %c24 = arith.constant 24 : index
    %26 = vector.load %arg5[%c0_22, %c24] : memref<8x32xf32, #tpu.memory_space<vmem>>, vector<8x8xf32>
    %cst_23 = arith.constant dense<0.000000e+00> : vector<8x128xf32>
    %27 = tpu.matmul %26, %25, %cst_23 {dimension_numbers = #tpu.dot_dimension_numbers<[1], [0], [0], [1], [0, 0, 1, 1], [], []>} : vector<8x8xf32>, vector<8x128xf32>, vector<8x128xf32> -> vector<8x128xf32>
    %28 = arith.addf %23, %27 : vector<8x128xf32>
    %c0_24 = arith.constant 0 : index
    %c0_25 = arith.constant 0 : index
    %29 = vector.load %arg6[%c0_24, %c0_25] : memref<1x128xf32, #tpu.memory_space<vmem>>, vector<1x128xf32>
    %30 = vector.broadcast %29 : vector<1x128xf32> to vector<8x128xf32>
    %31 = arith.addf %28, %30 : vector<8x128xf32>
    %cst_26 = arith.constant 0.000000e+00 : f32
    %32 = vector.broadcast %cst_26 : f32 to vector<8x128xf32>
    %33 = arith.maximumf %31, %32 : vector<8x128xf32>
    %34 = arith.truncf %33 : vector<8x128xf32> to vector<8x128xbf16>
    %c0_27 = arith.constant 0 : index
    %c0_28 = arith.constant 0 : index
    %35 = vector.load %arg7[%c0_27, %c0_28] : memref<128x512xbf16, #tpu.memory_space<vmem>>, vector<128x128xbf16>
    %cst_29 = arith.constant dense<0.000000e+00> : vector<8x128xf32>
    %36 = tpu.matmul %34, %35, %cst_29 {dimension_numbers = #tpu.dot_dimension_numbers<[1], [0], [0], [1], [0, 0, 1, 1], [], []>} : vector<8x128xbf16>, vector<128x128xbf16>, vector<8x128xf32> -> vector<8x128xf32>
    %c0_30 = arith.constant 0 : index
    %c0_31 = arith.constant 0 : index
    %37 = vector.load %arg8[%c0_30, %c0_31] : memref<8x32xf32, #tpu.memory_space<vmem>>, vector<8x8xf32>
    %cst_32 = arith.constant dense<0.000000e+00> : vector<8x128xf32>
    %38 = tpu.matmul %37, %36, %cst_32 {dimension_numbers = #tpu.dot_dimension_numbers<[1], [0], [0], [1], [0, 0, 1, 1], [], []>} : vector<8x8xf32>, vector<8x128xf32>, vector<8x128xf32> -> vector<8x128xf32>
    %c0_33 = arith.constant 0 : index
    %c128_34 = arith.constant 128 : index
    %39 = vector.load %arg7[%c0_33, %c128_34] : memref<128x512xbf16, #tpu.memory_space<vmem>>, vector<128x128xbf16>
    %cst_35 = arith.constant dense<0.000000e+00> : vector<8x128xf32>
    %40 = tpu.matmul %34, %39, %cst_35 {dimension_numbers = #tpu.dot_dimension_numbers<[1], [0], [0], [1], [0, 0, 1, 1], [], []>} : vector<8x128xbf16>, vector<128x128xbf16>, vector<8x128xf32> -> vector<8x128xf32>
    %c0_36 = arith.constant 0 : index
    %c8_37 = arith.constant 8 : index
    %41 = vector.load %arg8[%c0_36, %c8_37] : memref<8x32xf32, #tpu.memory_space<vmem>>, vector<8x8xf32>
    %cst_38 = arith.constant dense<0.000000e+00> : vector<8x128xf32>
    %42 = tpu.matmul %41, %40, %cst_38 {dimension_numbers = #tpu.dot_dimension_numbers<[1], [0], [0], [1], [0, 0, 1, 1], [], []>} : vector<8x8xf32>, vector<8x128xf32>, vector<8x128xf32> -> vector<8x128xf32>
    %43 = arith.addf %38, %42 : vector<8x128xf32>
    %c0_39 = arith.constant 0 : index
    %c256_40 = arith.constant 256 : index
    %44 = vector.load %arg7[%c0_39, %c256_40] : memref<128x512xbf16, #tpu.memory_space<vmem>>, vector<128x128xbf16>
    %cst_41 = arith.constant dense<0.000000e+00> : vector<8x128xf32>
    %45 = tpu.matmul %34, %44, %cst_41 {dimension_numbers = #tpu.dot_dimension_numbers<[1], [0], [0], [1], [0, 0, 1, 1], [], []>} : vector<8x128xbf16>, vector<128x128xbf16>, vector<8x128xf32> -> vector<8x128xf32>
    %c0_42 = arith.constant 0 : index
    %c16_43 = arith.constant 16 : index
    %46 = vector.load %arg8[%c0_42, %c16_43] : memref<8x32xf32, #tpu.memory_space<vmem>>, vector<8x8xf32>
    %cst_44 = arith.constant dense<0.000000e+00> : vector<8x128xf32>
    %47 = tpu.matmul %46, %45, %cst_44 {dimension_numbers = #tpu.dot_dimension_numbers<[1], [0], [0], [1], [0, 0, 1, 1], [], []>} : vector<8x8xf32>, vector<8x128xf32>, vector<8x128xf32> -> vector<8x128xf32>
    %48 = arith.addf %43, %47 : vector<8x128xf32>
    %c0_45 = arith.constant 0 : index
    %c384_46 = arith.constant 384 : index
    %49 = vector.load %arg7[%c0_45, %c384_46] : memref<128x512xbf16, #tpu.memory_space<vmem>>, vector<128x128xbf16>
    %cst_47 = arith.constant dense<0.000000e+00> : vector<8x128xf32>
    %50 = tpu.matmul %34, %49, %cst_47 {dimension_numbers = #tpu.dot_dimension_numbers<[1], [0], [0], [1], [0, 0, 1, 1], [], []>} : vector<8x128xbf16>, vector<128x128xbf16>, vector<8x128xf32> -> vector<8x128xf32>
    %c0_48 = arith.constant 0 : index
    %c24_49 = arith.constant 24 : index
    %51 = vector.load %arg8[%c0_48, %c24_49] : memref<8x32xf32, #tpu.memory_space<vmem>>, vector<8x8xf32>
    %cst_50 = arith.constant dense<0.000000e+00> : vector<8x128xf32>
    %52 = tpu.matmul %51, %50, %cst_50 {dimension_numbers = #tpu.dot_dimension_numbers<[1], [0], [0], [1], [0, 0, 1, 1], [], []>} : vector<8x8xf32>, vector<8x128xf32>, vector<8x128xf32> -> vector<8x128xf32>
    %53 = arith.addf %48, %52 : vector<8x128xf32>
    %c0_51 = arith.constant 0 : index
    %c0_52 = arith.constant 0 : index
    %54 = vector.load %arg9[%c0_51, %c0_52] : memref<1x128xf32, #tpu.memory_space<vmem>>, vector<1x128xf32>
    %55 = vector.broadcast %54 : vector<1x128xf32> to vector<8x128xf32>
    %56 = arith.addf %53, %55 : vector<8x128xf32>
    %cst_53 = arith.constant 0.000000e+00 : f32
    %57 = vector.broadcast %cst_53 : f32 to vector<8x128xf32>
    %58 = arith.maximumf %56, %57 : vector<8x128xf32>
    %59 = arith.truncf %58 : vector<8x128xf32> to vector<8x128xbf16>
    %c0_54 = arith.constant 0 : index
    %c0_55 = arith.constant 0 : index
    %60 = vector.load %arg10[%c0_54, %c0_55] : memref<128x512xbf16, #tpu.memory_space<vmem>>, vector<128x128xbf16>
    %cst_56 = arith.constant dense<0.000000e+00> : vector<8x128xf32>
    %61 = tpu.matmul %59, %60, %cst_56 {dimension_numbers = #tpu.dot_dimension_numbers<[1], [0], [0], [1], [0, 0, 1, 1], [], []>} : vector<8x128xbf16>, vector<128x128xbf16>, vector<8x128xf32> -> vector<8x128xf32>
    %c0_57 = arith.constant 0 : index
    %c0_58 = arith.constant 0 : index
    %62 = vector.load %arg11[%c0_57, %c0_58] : memref<8x32xf32, #tpu.memory_space<vmem>>, vector<8x8xf32>
    %cst_59 = arith.constant dense<0.000000e+00> : vector<8x128xf32>
    %63 = tpu.matmul %62, %61, %cst_59 {dimension_numbers = #tpu.dot_dimension_numbers<[1], [0], [0], [1], [0, 0, 1, 1], [], []>} : vector<8x8xf32>, vector<8x128xf32>, vector<8x128xf32> -> vector<8x128xf32>
    %c0_60 = arith.constant 0 : index
    %c128_61 = arith.constant 128 : index
    %64 = vector.load %arg10[%c0_60, %c128_61] : memref<128x512xbf16, #tpu.memory_space<vmem>>, vector<128x128xbf16>
    %cst_62 = arith.constant dense<0.000000e+00> : vector<8x128xf32>
    %65 = tpu.matmul %59, %64, %cst_62 {dimension_numbers = #tpu.dot_dimension_numbers<[1], [0], [0], [1], [0, 0, 1, 1], [], []>} : vector<8x128xbf16>, vector<128x128xbf16>, vector<8x128xf32> -> vector<8x128xf32>
    %c0_63 = arith.constant 0 : index
    %c8_64 = arith.constant 8 : index
    %66 = vector.load %arg11[%c0_63, %c8_64] : memref<8x32xf32, #tpu.memory_space<vmem>>, vector<8x8xf32>
    %cst_65 = arith.constant dense<0.000000e+00> : vector<8x128xf32>
    %67 = tpu.matmul %66, %65, %cst_65 {dimension_numbers = #tpu.dot_dimension_numbers<[1], [0], [0], [1], [0, 0, 1, 1], [], []>} : vector<8x8xf32>, vector<8x128xf32>, vector<8x128xf32> -> vector<8x128xf32>
    %68 = arith.addf %63, %67 : vector<8x128xf32>
    %c0_66 = arith.constant 0 : index
    %c256_67 = arith.constant 256 : index
    %69 = vector.load %arg10[%c0_66, %c256_67] : memref<128x512xbf16, #tpu.memory_space<vmem>>, vector<128x128xbf16>
    %cst_68 = arith.constant dense<0.000000e+00> : vector<8x128xf32>
    %70 = tpu.matmul %59, %69, %cst_68 {dimension_numbers = #tpu.dot_dimension_numbers<[1], [0], [0], [1], [0, 0, 1, 1], [], []>} : vector<8x128xbf16>, vector<128x128xbf16>, vector<8x128xf32> -> vector<8x128xf32>
    %c0_69 = arith.constant 0 : index
    %c16_70 = arith.constant 16 : index
    %71 = vector.load %arg11[%c0_69, %c16_70] : memref<8x32xf32, #tpu.memory_space<vmem>>, vector<8x8xf32>
    %cst_71 = arith.constant dense<0.000000e+00> : vector<8x128xf32>
    %72 = tpu.matmul %71, %70, %cst_71 {dimension_numbers = #tpu.dot_dimension_numbers<[1], [0], [0], [1], [0, 0, 1, 1], [], []>} : vector<8x8xf32>, vector<8x128xf32>, vector<8x128xf32> -> vector<8x128xf32>
    %73 = arith.addf %68, %72 : vector<8x128xf32>
    %c0_72 = arith.constant 0 : index
    %c384_73 = arith.constant 384 : index
    %74 = vector.load %arg10[%c0_72, %c384_73] : memref<128x512xbf16, #tpu.memory_space<vmem>>, vector<128x128xbf16>
    %cst_74 = arith.constant dense<0.000000e+00> : vector<8x128xf32>
    %75 = tpu.matmul %59, %74, %cst_74 {dimension_numbers = #tpu.dot_dimension_numbers<[1], [0], [0], [1], [0, 0, 1, 1], [], []>} : vector<8x128xbf16>, vector<128x128xbf16>, vector<8x128xf32> -> vector<8x128xf32>
    %c0_75 = arith.constant 0 : index
    %c24_76 = arith.constant 24 : index
    %76 = vector.load %arg11[%c0_75, %c24_76] : memref<8x32xf32, #tpu.memory_space<vmem>>, vector<8x8xf32>
    %cst_77 = arith.constant dense<0.000000e+00> : vector<8x128xf32>
    %77 = tpu.matmul %76, %75, %cst_77 {dimension_numbers = #tpu.dot_dimension_numbers<[1], [0], [0], [1], [0, 0, 1, 1], [], []>} : vector<8x8xf32>, vector<8x128xf32>, vector<8x128xf32> -> vector<8x128xf32>
    %78 = arith.addf %73, %77 : vector<8x128xf32>
    %c0_78 = arith.constant 0 : index
    %c0_79 = arith.constant 0 : index
    %79 = vector.load %arg12[%c0_78, %c0_79] : memref<1x128xf32, #tpu.memory_space<vmem>>, vector<1x128xf32>
    %80 = vector.broadcast %79 : vector<1x128xf32> to vector<8x128xf32>
    %81 = arith.addf %78, %80 : vector<8x128xf32>
    %cst_80 = arith.constant 0.000000e+00 : f32
    %82 = vector.broadcast %cst_80 : f32 to vector<8x128xf32>
    %83 = arith.maximumf %81, %82 : vector<8x128xf32>
    %84 = arith.truncf %83 : vector<8x128xf32> to vector<8x128xbf16>
    %c0_81 = arith.constant 0 : index
    %c0_82 = arith.constant 0 : index
    %85 = vector.load %arg20[%c0_81, %c0_82] : memref<128x256xbf16, #tpu.memory_space<vmem>>, vector<128x256xbf16>
    %cst_83 = arith.constant dense<0.000000e+00> : vector<8x256xf32>
    %86 = tpu.matmul %59, %85, %cst_83 {dimension_numbers = #tpu.dot_dimension_numbers<[1], [0], [0], [1], [0, 0, 1, 1], [], []>} : vector<8x128xbf16>, vector<128x256xbf16>, vector<8x256xf32> -> vector<8x256xf32>
    %87 = arith.truncf %86 : vector<8x256xf32> to vector<8x256xbf16>
    %c0_84 = arith.constant 0 : index
    %c0_85 = arith.constant 0 : index
    %88 = vector.load %arg19[%c0_84, %c0_85] : memref<8x8xbf16, #tpu.memory_space<vmem>>, vector<8x8xbf16>
    %cst_86 = arith.constant dense<0.000000e+00> : vector<8x256xf32>
    %89 = tpu.matmul %88, %87, %cst_86 {dimension_numbers = #tpu.dot_dimension_numbers<[1], [0], [0], [1], [0, 0, 1, 1], [], []>} : vector<8x8xbf16>, vector<8x256xbf16>, vector<8x256xf32> -> vector<8x256xf32>
    %90 = arith.truncf %89 : vector<8x256xf32> to vector<8x256xbf16>
    %c0_87 = arith.constant 0 : index
    %c0_88 = arith.constant 0 : index
    %91 = vector.load %arg13[%c0_87, %c0_88] : memref<128x1024xbf16, #tpu.memory_space<vmem>>, vector<128x256xbf16>
    %cst_89 = arith.constant dense<0.000000e+00> : vector<8x256xf32>
    %92 = tpu.matmul %84, %91, %cst_89 {dimension_numbers = #tpu.dot_dimension_numbers<[1], [0], [0], [1], [0, 0, 1, 1], [], []>} : vector<8x128xbf16>, vector<128x256xbf16>, vector<8x256xf32> -> vector<8x256xf32>
    %c0_90 = arith.constant 0 : index
    %c0_91 = arith.constant 0 : index
    %93 = vector.load %arg14[%c0_90, %c0_91] : memref<256x1024xbf16, #tpu.memory_space<vmem>>, vector<256x256xbf16>
    %cst_92 = arith.constant dense<0.000000e+00> : vector<8x256xf32>
    %94 = tpu.matmul %90, %93, %cst_92 {dimension_numbers = #tpu.dot_dimension_numbers<[1], [0], [0], [1], [0, 0, 1, 1], [], []>} : vector<8x256xbf16>, vector<256x256xbf16>, vector<8x256xf32> -> vector<8x256xf32>
    %95 = arith.addf %92, %94 : vector<8x256xf32>
    %c0_93 = arith.constant 0 : index
    %c0_94 = arith.constant 0 : index
    %96 = vector.load %arg15[%c0_93, %c0_94] : memref<16x32xf32, #tpu.memory_space<vmem>>, vector<16x8xf32>
    %cst_95 = arith.constant dense<0.000000e+00> : vector<16x256xf32>
    %97 = tpu.matmul %96, %95, %cst_95 {dimension_numbers = #tpu.dot_dimension_numbers<[1], [0], [0], [1], [0, 0, 1, 1], [], []>} : vector<16x8xf32>, vector<8x256xf32>, vector<16x256xf32> -> vector<16x256xf32>
    %c0_96 = arith.constant 0 : index
    %c256_97 = arith.constant 256 : index
    %98 = vector.load %arg13[%c0_96, %c256_97] : memref<128x1024xbf16, #tpu.memory_space<vmem>>, vector<128x256xbf16>
    %cst_98 = arith.constant dense<0.000000e+00> : vector<8x256xf32>
    %99 = tpu.matmul %84, %98, %cst_98 {dimension_numbers = #tpu.dot_dimension_numbers<[1], [0], [0], [1], [0, 0, 1, 1], [], []>} : vector<8x128xbf16>, vector<128x256xbf16>, vector<8x256xf32> -> vector<8x256xf32>
    %c0_99 = arith.constant 0 : index
    %c256_100 = arith.constant 256 : index
    %100 = vector.load %arg14[%c0_99, %c256_100] : memref<256x1024xbf16, #tpu.memory_space<vmem>>, vector<256x256xbf16>
    %cst_101 = arith.constant dense<0.000000e+00> : vector<8x256xf32>
    %101 = tpu.matmul %90, %100, %cst_101 {dimension_numbers = #tpu.dot_dimension_numbers<[1], [0], [0], [1], [0, 0, 1, 1], [], []>} : vector<8x256xbf16>, vector<256x256xbf16>, vector<8x256xf32> -> vector<8x256xf32>
    %102 = arith.addf %99, %101 : vector<8x256xf32>
    %c0_102 = arith.constant 0 : index
    %c8_103 = arith.constant 8 : index
    %103 = vector.load %arg15[%c0_102, %c8_103] : memref<16x32xf32, #tpu.memory_space<vmem>>, vector<16x8xf32>
    %cst_104 = arith.constant dense<0.000000e+00> : vector<16x256xf32>
    %104 = tpu.matmul %103, %102, %cst_104 {dimension_numbers = #tpu.dot_dimension_numbers<[1], [0], [0], [1], [0, 0, 1, 1], [], []>} : vector<16x8xf32>, vector<8x256xf32>, vector<16x256xf32> -> vector<16x256xf32>
    %105 = arith.addf %97, %104 : vector<16x256xf32>
    %c0_105 = arith.constant 0 : index
    %c512 = arith.constant 512 : index
    %106 = vector.load %arg13[%c0_105, %c512] : memref<128x1024xbf16, #tpu.memory_space<vmem>>, vector<128x256xbf16>
    %cst_106 = arith.constant dense<0.000000e+00> : vector<8x256xf32>
    %107 = tpu.matmul %84, %106, %cst_106 {dimension_numbers = #tpu.dot_dimension_numbers<[1], [0], [0], [1], [0, 0, 1, 1], [], []>} : vector<8x128xbf16>, vector<128x256xbf16>, vector<8x256xf32> -> vector<8x256xf32>
    %c0_107 = arith.constant 0 : index
    %c512_108 = arith.constant 512 : index
    %108 = vector.load %arg14[%c0_107, %c512_108] : memref<256x1024xbf16, #tpu.memory_space<vmem>>, vector<256x256xbf16>
    %cst_109 = arith.constant dense<0.000000e+00> : vector<8x256xf32>
    %109 = tpu.matmul %90, %108, %cst_109 {dimension_numbers = #tpu.dot_dimension_numbers<[1], [0], [0], [1], [0, 0, 1, 1], [], []>} : vector<8x256xbf16>, vector<256x256xbf16>, vector<8x256xf32> -> vector<8x256xf32>
    %110 = arith.addf %107, %109 : vector<8x256xf32>
    %c0_110 = arith.constant 0 : index
    %c16_111 = arith.constant 16 : index
    %111 = vector.load %arg15[%c0_110, %c16_111] : memref<16x32xf32, #tpu.memory_space<vmem>>, vector<16x8xf32>
    %cst_112 = arith.constant dense<0.000000e+00> : vector<16x256xf32>
    %112 = tpu.matmul %111, %110, %cst_112 {dimension_numbers = #tpu.dot_dimension_numbers<[1], [0], [0], [1], [0, 0, 1, 1], [], []>} : vector<16x8xf32>, vector<8x256xf32>, vector<16x256xf32> -> vector<16x256xf32>
    %113 = arith.addf %105, %112 : vector<16x256xf32>
    %c0_113 = arith.constant 0 : index
    %c768 = arith.constant 768 : index
    %114 = vector.load %arg13[%c0_113, %c768] : memref<128x1024xbf16, #tpu.memory_space<vmem>>, vector<128x256xbf16>
    %cst_114 = arith.constant dense<0.000000e+00> : vector<8x256xf32>
    %115 = tpu.matmul %84, %114, %cst_114 {dimension_numbers = #tpu.dot_dimension_numbers<[1], [0], [0], [1], [0, 0, 1, 1], [], []>} : vector<8x128xbf16>, vector<128x256xbf16>, vector<8x256xf32> -> vector<8x256xf32>
    %c0_115 = arith.constant 0 : index
    %c768_116 = arith.constant 768 : index
    %116 = vector.load %arg14[%c0_115, %c768_116] : memref<256x1024xbf16, #tpu.memory_space<vmem>>, vector<256x256xbf16>
    %cst_117 = arith.constant dense<0.000000e+00> : vector<8x256xf32>
    %117 = tpu.matmul %90, %116, %cst_117 {dimension_numbers = #tpu.dot_dimension_numbers<[1], [0], [0], [1], [0, 0, 1, 1], [], []>} : vector<8x256xbf16>, vector<256x256xbf16>, vector<8x256xf32> -> vector<8x256xf32>
    %118 = arith.addf %115, %117 : vector<8x256xf32>
    %c0_118 = arith.constant 0 : index
    %c24_119 = arith.constant 24 : index
    %119 = vector.load %arg15[%c0_118, %c24_119] : memref<16x32xf32, #tpu.memory_space<vmem>>, vector<16x8xf32>
    %cst_120 = arith.constant dense<0.000000e+00> : vector<16x256xf32>
    %120 = tpu.matmul %119, %118, %cst_120 {dimension_numbers = #tpu.dot_dimension_numbers<[1], [0], [0], [1], [0, 0, 1, 1], [], []>} : vector<16x8xf32>, vector<8x256xf32>, vector<16x256xf32> -> vector<16x256xf32>
    %121 = arith.addf %113, %120 : vector<16x256xf32>
    %c0_121 = arith.constant 0 : index
    %c0_122 = arith.constant 0 : index
    %122 = vector.load %arg16[%c0_121, %c0_122] : memref<1x256xf32, #tpu.memory_space<vmem>>, vector<1x256xf32>
    %123 = vector.broadcast %122 : vector<1x256xf32> to vector<16x256xf32>
    %124 = arith.addf %121, %123 : vector<16x256xf32>
    %cst_123 = arith.constant 0.000000e+00 : f32
    %125 = vector.broadcast %cst_123 : f32 to vector<16x256xf32>
    %126 = arith.maximumf %124, %125 : vector<16x256xf32>
    %127 = arith.truncf %126 : vector<16x256xf32> to vector<16x256xbf16>
    %c0_124 = arith.constant 0 : index
    %c0_125 = arith.constant 0 : index
    %128 = vector.load %arg17[%c0_124, %c0_125] : memref<256x384xbf16, #tpu.memory_space<vmem>>, vector<256x96xbf16>
    %cst_126 = arith.constant dense<0.000000e+00> : vector<16x96xf32>
    %129 = tpu.matmul %127, %128, %cst_126 {dimension_numbers = #tpu.dot_dimension_numbers<[1], [0], [0], [1], [0, 0, 1, 1], [], []>} : vector<16x256xbf16>, vector<256x96xbf16>, vector<16x96xf32> -> vector<16x96xf32>
    %c0_127 = arith.constant 0 : index
    %c0_128 = arith.constant 0 : index
    %130 = vector.load %arg18[%c0_127, %c0_128] : memref<32x64xf32, #tpu.memory_space<vmem>>, vector<32x16xf32>
    %cst_129 = arith.constant dense<0.000000e+00> : vector<32x96xf32>
    %131 = tpu.matmul %130, %129, %cst_129 {dimension_numbers = #tpu.dot_dimension_numbers<[1], [0], [0], [1], [0, 0, 1, 1], [], []>} : vector<32x16xf32>, vector<16x96xf32>, vector<32x96xf32> -> vector<32x96xf32>
    %c0_130 = arith.constant 0 : index
    %c96 = arith.constant 96 : index
    %132 = vector.load %arg17[%c0_130, %c96] : memref<256x384xbf16, #tpu.memory_space<vmem>>, vector<256x96xbf16>
    %cst_131 = arith.constant dense<0.000000e+00> : vector<16x96xf32>
    %133 = tpu.matmul %127, %132, %cst_131 {dimension_numbers = #tpu.dot_dimension_numbers<[1], [0], [0], [1], [0, 0, 1, 1], [], []>} : vector<16x256xbf16>, vector<256x96xbf16>, vector<16x96xf32> -> vector<16x96xf32>
    %c0_132 = arith.constant 0 : index
    %c16_133 = arith.constant 16 : index
    %134 = vector.load %arg18[%c0_132, %c16_133] : memref<32x64xf32, #tpu.memory_space<vmem>>, vector<32x16xf32>
    %cst_134 = arith.constant dense<0.000000e+00> : vector<32x96xf32>
    %135 = tpu.matmul %134, %133, %cst_134 {dimension_numbers = #tpu.dot_dimension_numbers<[1], [0], [0], [1], [0, 0, 1, 1], [], []>} : vector<32x16xf32>, vector<16x96xf32>, vector<32x96xf32> -> vector<32x96xf32>
    %136 = arith.addf %131, %135 : vector<32x96xf32>
    %c0_135 = arith.constant 0 : index
    %c192 = arith.constant 192 : index
    %137 = vector.load %arg17[%c0_135, %c192] : memref<256x384xbf16, #tpu.memory_space<vmem>>, vector<256x96xbf16>
    %cst_136 = arith.constant dense<0.000000e+00> : vector<16x96xf32>
    %138 = tpu.matmul %127, %137, %cst_136 {dimension_numbers = #tpu.dot_dimension_numbers<[1], [0], [0], [1], [0, 0, 1, 1], [], []>} : vector<16x256xbf16>, vector<256x96xbf16>, vector<16x96xf32> -> vector<16x96xf32>
    %c0_137 = arith.constant 0 : index
    %c32 = arith.constant 32 : index
    %139 = vector.load %arg18[%c0_137, %c32] : memref<32x64xf32, #tpu.memory_space<vmem>>, vector<32x16xf32>
    %cst_138 = arith.constant dense<0.000000e+00> : vector<32x96xf32>
    %140 = tpu.matmul %139, %138, %cst_138 {dimension_numbers = #tpu.dot_dimension_numbers<[1], [0], [0], [1], [0, 0, 1, 1], [], []>} : vector<32x16xf32>, vector<16x96xf32>, vector<32x96xf32> -> vector<32x96xf32>
    %141 = arith.addf %136, %140 : vector<32x96xf32>
    %c0_139 = arith.constant 0 : index
    %c288 = arith.constant 288 : index
    %142 = vector.load %arg17[%c0_139, %c288] : memref<256x384xbf16, #tpu.memory_space<vmem>>, vector<256x96xbf16>
    %cst_140 = arith.constant dense<0.000000e+00> : vector<16x96xf32>
    %143 = tpu.matmul %127, %142, %cst_140 {dimension_numbers = #tpu.dot_dimension_numbers<[1], [0], [0], [1], [0, 0, 1, 1], [], []>} : vector<16x256xbf16>, vector<256x96xbf16>, vector<16x96xf32> -> vector<16x96xf32>
    %c0_141 = arith.constant 0 : index
    %c48 = arith.constant 48 : index
    %144 = vector.load %arg18[%c0_141, %c48] : memref<32x64xf32, #tpu.memory_space<vmem>>, vector<32x16xf32>
    %cst_142 = arith.constant dense<0.000000e+00> : vector<32x96xf32>
    %145 = tpu.matmul %144, %143, %cst_142 {dimension_numbers = #tpu.dot_dimension_numbers<[1], [0], [0], [1], [0, 0, 1, 1], [], []>} : vector<32x16xf32>, vector<16x96xf32>, vector<32x96xf32> -> vector<32x96xf32>
    %146 = arith.addf %141, %145 : vector<32x96xf32>
    %147 = math.tanh %146 : vector<32x96xf32>
    %c0_143 = arith.constant 0 : index
    %c0_144 = arith.constant 0 : index
    %148 = vector.load %arg21[%c0_143, %c0_144] : memref<64x32xf32, #tpu.memory_space<vmem>>, vector<64x32xf32>
    %cst_145 = arith.constant dense<0.000000e+00> : vector<64x96xf32>
    %149 = tpu.matmul %148, %147, %cst_145 {dimension_numbers = #tpu.dot_dimension_numbers<[1], [0], [0], [1], [0, 0, 1, 1], [], []>} : vector<64x32xf32>, vector<32x96xf32>, vector<64x96xf32> -> vector<64x96xf32>
    %c0_146 = arith.constant 0 : index
    %c0_147 = arith.constant 0 : index
    %150 = vector.load %arg22[%c0_146, %c0_147] : memref<96x192xf32, #tpu.memory_space<vmem>>, vector<96x64xf32>
    %cst_148 = arith.constant dense<0.000000e+00> : vector<64x64xf32>
    %151 = tpu.matmul %149, %150, %cst_148 {dimension_numbers = #tpu.dot_dimension_numbers<[1], [0], [0], [1], [0, 0, 1, 1], [], []>} : vector<64x96xf32>, vector<96x64xf32>, vector<64x64xf32> -> vector<64x64xf32>
    %c0_149 = arith.constant 0 : index
    %c0_150 = arith.constant 0 : index
    %c0_151 = arith.constant 0 : index
    %c0_152 = arith.constant 0 : index
    %152 = vector.load %arg23[%c0_149, %c0_150, %c0_151, %c0_152] : memref<1x3x64x64xf32, #tpu.memory_space<vmem>>, vector<1x1x64x64xf32>
    %153 = vector.shape_cast %152 : vector<1x1x64x64xf32> to vector<64x64xf32>
    %154 = vector.shape_cast %151 : vector<64x64xf32> to vector<1x1x64x64xf32>
    tpu.vector_store %arg23[%c0_149, %c0_150, %c0_151, %c0_152], %154 {strides = array<i32>} : memref<1x3x64x64xf32, #tpu.memory_space<vmem>>, vector<1x1x64x64xf32>,
    %c0_153 = arith.constant 0 : index
    %c64 = arith.constant 64 : index
    %155 = vector.load %arg22[%c0_153, %c64] : memref<96x192xf32, #tpu.memory_space<vmem>>, vector<96x64xf32>
    %cst_154 = arith.constant dense<0.000000e+00> : vector<64x64xf32>
    %156 = tpu.matmul %149, %155, %cst_154 {dimension_numbers = #tpu.dot_dimension_numbers<[1], [0], [0], [1], [0, 0, 1, 1], [], []>} : vector<64x96xf32>, vector<96x64xf32>, vector<64x64xf32> -> vector<64x64xf32>
    %c0_155 = arith.constant 0 : index
    %c1 = arith.constant 1 : index
    %c0_156 = arith.constant 0 : index
    %c0_157 = arith.constant 0 : index
    %157 = vector.load %arg23[%c0_155, %c1, %c0_156, %c0_157] : memref<1x3x64x64xf32, #tpu.memory_space<vmem>>, vector<1x1x64x64xf32>
    %158 = vector.shape_cast %157 : vector<1x1x64x64xf32> to vector<64x64xf32>
    %159 = vector.shape_cast %156 : vector<64x64xf32> to vector<1x1x64x64xf32>
    tpu.vector_store %arg23[%c0_155, %c1, %c0_156, %c0_157], %159 {strides = array<i32>} : memref<1x3x64x64xf32, #tpu.memory_space<vmem>>, vector<1x1x64x64xf32>,
    %c0_158 = arith.constant 0 : index
    %c128_159 = arith.constant 128 : index
    %160 = vector.load %arg22[%c0_158, %c128_159] : memref<96x192xf32, #tpu.memory_space<vmem>>, vector<96x64xf32>
    %cst_160 = arith.constant dense<0.000000e+00> : vector<64x64xf32>
    %161 = tpu.matmul %149, %160, %cst_160 {dimension_numbers = #tpu.dot_dimension_numbers<[1], [0], [0], [1], [0, 0, 1, 1], [], []>} : vector<64x96xf32>, vector<96x64xf32>, vector<64x64xf32> -> vector<64x64xf32>
    %c0_161 = arith.constant 0 : index
    %c2 = arith.constant 2 : index
    %c0_162 = arith.constant 0 : index
    %c0_163 = arith.constant 0 : index
    %162 = vector.load %arg23[%c0_161, %c2, %c0_162, %c0_163] : memref<1x3x64x64xf32, #tpu.memory_space<vmem>>, vector<1x1x64x64xf32>
    %163 = vector.shape_cast %162 : vector<1x1x64x64xf32> to vector<64x64xf32>
    %164 = vector.shape_cast %161 : vector<64x64xf32> to vector<1x1x64x64xf32>
    tpu.vector_store %arg23[%c0_161, %c2, %c0_162, %c0_163], %164 {strides = array<i32>} : memref<1x3x64x64xf32, #tpu.memory_space<vmem>>, vector<1x1x64x64xf32>,
    return
  }
  func.func @transform_0(%arg0: i32) -> (i32, i32, i32) {
    %c0_i32 = arith.constant 0 : i32
    %c0_i32_0 = arith.constant 0 : i32
    %c0_i32_1 = arith.constant 0 : i32
    return %arg0, %c0_i32, %c0_i32_0 : i32, i32, i32
  }
  func.func @transform_1(%arg0: i32) -> (i32, i32) {
    %c0_i32 = arith.constant 0 : i32
    %c0_i32_0 = arith.constant 0 : i32
    %c0_i32_1 = arith.constant 0 : i32
    return %c0_i32, %c0_i32_0 : i32, i32
  }
  func.func @transform_2(%arg0: i32) -> (i32, i32) {
    %c0_i32 = arith.constant 0 : i32
    %c0_i32_0 = arith.constant 0 : i32
    %c0_i32_1 = arith.constant 0 : i32
    return %c0_i32, %c0_i32_0 : i32, i32
  }
  func.func @transform_3(%arg0: i32) -> (i32, i32) {
    %c0_i32 = arith.constant 0 : i32
    %c0_i32_0 = arith.constant 0 : i32
    %c0_i32_1 = arith.constant 0 : i32
    return %c0_i32, %c0_i32_0 : i32, i32
  }
  func.func @transform_4(%arg0: i32) -> (i32, i32) {
    %c0_i32 = arith.constant 0 : i32
    %c0_i32_0 = arith.constant 0 : i32
    %c0_i32_1 = arith.constant 0 : i32
    return %c0_i32, %c0_i32_0 : i32, i32
  }
  func.func @transform_5(%arg0: i32) -> (i32, i32) {
    %c0_i32 = arith.constant 0 : i32
    %c0_i32_0 = arith.constant 0 : i32
    %c0_i32_1 = arith.constant 0 : i32
    return %c0_i32, %c0_i32_0 : i32, i32
  }
  func.func @transform_6(%arg0: i32) -> (i32, i32) {
    %c0_i32 = arith.constant 0 : i32
    %c0_i32_0 = arith.constant 0 : i32
    %c0_i32_1 = arith.constant 0 : i32
    return %c0_i32, %c0_i32_0 : i32, i32
  }
  func.func @transform_7(%arg0: i32) -> (i32, i32) {
    %c0_i32 = arith.constant 0 : i32
    %c0_i32_0 = arith.constant 0 : i32
    %c0_i32_1 = arith.constant 0 : i32
    return %c0_i32, %c0_i32_0 : i32, i32
  }
  func.func @transform_8(%arg0: i32) -> (i32, i32) {
    %c0_i32 = arith.constant 0 : i32
    %c0_i32_0 = arith.constant 0 : i32
    %c0_i32_1 = arith.constant 0 : i32
    return %c0_i32, %c0_i32_0 : i32, i32
  }
  func.func @transform_9(%arg0: i32) -> (i32, i32) {
    %c0_i32 = arith.constant 0 : i32
    %c0_i32_0 = arith.constant 0 : i32
    %c0_i32_1 = arith.constant 0 : i32
    return %c0_i32, %c0_i32_0 : i32, i32
  }
  func.func @transform_10(%arg0: i32) -> (i32, i32) {
    %c0_i32 = arith.constant 0 : i32
    %c0_i32_0 = arith.constant 0 : i32
    %c0_i32_1 = arith.constant 0 : i32
    return %c0_i32, %c0_i32_0 : i32, i32
  }
  func.func @transform_11(%arg0: i32) -> (i32, i32) {
    %c0_i32 = arith.constant 0 : i32
    %c0_i32_0 = arith.constant 0 : i32
    %c0_i32_1 = arith.constant 0 : i32
    return %c0_i32, %c0_i32_0 : i32, i32
  }
  func.func @transform_12(%arg0: i32) -> (i32, i32) {
    %c0_i32 = arith.constant 0 : i32
    %c0_i32_0 = arith.constant 0 : i32
    %c0_i32_1 = arith.constant 0 : i32
    return %c0_i32, %c0_i32_0 : i32, i32
  }
  func.func @transform_13(%arg0: i32) -> (i32, i32) {
    %c0_i32 = arith.constant 0 : i32
    %c0_i32_0 = arith.constant 0 : i32
    %c0_i32_1 = arith.constant 0 : i32
    return %c0_i32, %c0_i32_0 : i32, i32
  }
  func.func @transform_14(%arg0: i32) -> (i32, i32) {
    %c0_i32 = arith.constant 0 : i32
    %c0_i32_0 = arith.constant 0 : i32
    %c0_i32_1 = arith.constant 0 : i32
    return %c0_i32, %c0_i32_0 : i32, i32
  }
  func.func @transform_15(%arg0: i32) -> (i32, i32) {
    %c0_i32 = arith.constant 0 : i32
    %c0_i32_0 = arith.constant 0 : i32
    %c0_i32_1 = arith.constant 0 : i32
    return %c0_i32, %c0_i32_0 : i32, i32
  }
  func.func @transform_16(%arg0: i32) -> (i32, i32) {
    %c0_i32 = arith.constant 0 : i32
    %c0_i32_0 = arith.constant 0 : i32
    %c0_i32_1 = arith.constant 0 : i32
    return %c0_i32, %c0_i32_0 : i32, i32
  }
  func.func @transform_17(%arg0: i32) -> (i32, i32) {
    %c0_i32 = arith.constant 0 : i32
    %c0_i32_0 = arith.constant 0 : i32
    %c0_i32_1 = arith.constant 0 : i32
    return %c0_i32, %c0_i32_0 : i32, i32
  }
  func.func @transform_18(%arg0: i32) -> (i32, i32) {
    %c0_i32 = arith.constant 0 : i32
    %c0_i32_0 = arith.constant 0 : i32
    %c0_i32_1 = arith.constant 0 : i32
    return %c0_i32, %c0_i32_0 : i32, i32
  }
  func.func @transform_19(%arg0: i32) -> (i32, i32) {
    %c0_i32 = arith.constant 0 : i32
    %c0_i32_0 = arith.constant 0 : i32
    %c0_i32_1 = arith.constant 0 : i32
    return %c0_i32, %c0_i32_0 : i32, i32
  }
  func.func @transform_20(%arg0: i32) -> (i32, i32) {
    %c0_i32 = arith.constant 0 : i32
    %c0_i32_0 = arith.constant 0 : i32
    %c0_i32_1 = arith.constant 0 : i32
    return %c0_i32, %c0_i32_0 : i32, i32
  }
  func.func @transform_21(%arg0: i32) -> (i32, i32) {
    %c0_i32 = arith.constant 0 : i32
    %c0_i32_0 = arith.constant 0 : i32
    %c0_i32_1 = arith.constant 0 : i32
    return %c0_i32, %c0_i32_0 : i32, i32
  }
  func.func @transform_22(%arg0: i32) -> (i32, i32, i32, i32) {
    %c0_i32 = arith.constant 0 : i32
    %c0_i32_0 = arith.constant 0 : i32
    %c0_i32_1 = arith.constant 0 : i32
    %c0_i32_2 = arith.constant 0 : i32
    return %arg0, %c0_i32, %c0_i32_0, %c0_i32_1 : i32, i32, i32, i32
  }
}

</mosaic_0001>

<bundles_post_ra>
// kernel: generator_forward.1
= control target key start
LH: loop header
LB: loop body
LE: loop exit
PB: predicated region body
PF: predicated region fallthrough
CT: control target
= control target key end

     0   :  { %s10241_s0 = inlined_call_operand.vmem [shape: f32[2,1,16], index: 0, kind: input, shape index: {}]   ;;  %s10242_s1 = inlined_call_operand.vmem [shape: bf16[16,128], index: 1, kind: input, shape index: {}]   ;;  %s10243_s2 = inlined_call_operand.vmem [shape: f32[1,128], index: 2, kind: input, shape index: {}]   ;;  %s10244_s3 = inlined_call_operand.hbm [shape: bf16[128,512], index: 3, kind: input, shape index: {}]   ;;  %s10245_s4 = inlined_call_operand.vmem [shape: f32[8,32], index: 4, kind: input, shape index: {}]   ;;  %s10246_s5 = inlined_call_operand.vmem [shape: f32[1,128], index: 5, kind: input, shape index: {}]   ;;  %s10247_s6 = inlined_call_operand.hbm [shape: bf16[128,512], index: 6, kind: input, shape index: {}]   ;;  %s10248_s7 = inlined_call_operand.vmem [shape: f32[8,32], index: 7, kind: input, shape index: {}]   ;;  %s10249_s8 = inlined_call_operand.vmem [shape: f32[1,128], index: 8, kind: input, shape index: {}]   ;;  %s10250_s9 = inlined_call_operand.hbm [shape: bf16[128,512], index: 9, kind: input, shape index: {}]   ;;  %s10251_s10 = inlined_call_operand.vmem [shape: f32[8,32], index: 10, kind: input, shape index: {}]   ;;  %s10252_s11 = inlined_call_operand.vmem [shape: f32[1,128], index: 11, kind: input, shape index: {}]   ;;  %s10253_s12 = inlined_call_operand.hbm [shape: bf16[128,1024], index: 12, kind: input, shape index: {}]   ;;  %s10254_s13 = inlined_call_operand.hbm [shape: bf16[256,1024], index: 13, kind: input, shape index: {}]   ;;  %s10255_s14 = inlined_call_operand.vmem [shape: f32[16,32], index: 14, kind: input, shape index: {}]   ;;  %s10256_s15 = inlined_call_operand.vmem [shape: f32[1,256], index: 15, kind: input, shape index: {}]   ;;  %s10257_s16 = inlined_call_operand.hbm [shape: bf16[256,384], index: 16, kind: input, shape index: {}]   ;;  %s10258_s17 = inlined_call_operand.vmem [shape: f32[32,64], index: 17, kind: input, shape index: {}]   ;;  %s10259_s18 = inlined_call_operand.vmem [shape: bf16[8,8], index: 18, kind: input, shape index: {}]   ;;  %s10260_s19 = inlined_call_operand.hbm [shape: bf16[128,256], index: 19, kind: input, shape index: {}]   ;;  %s10261_s20 = inlined_call_operand.vmem [shape: f32[64,32], index: 20, kind: input, shape index: {}]   ;;  %s10262_s21 = inlined_call_operand.hbm [shape: f32[96,192], index: 21, kind: input, shape index: {}]   ;;  %s10263_s22 = inlined_call_operand.hbm [shape: f32[2,3,64,64], index: 22, kind: output, shape index: {}]  }
   0x1   :  { %10278 = sst [smem:[#allocation29_spill]] %s10241_s0 }
   0x2   :  { %10279 = sst [smem:[#allocation30_spill]] %s10242_s1 }
   0x3   :  { %10280 = sst [smem:[#allocation31_spill]] %s10243_s2 }
   0x4   :  { %10281 = sst [smem:[#allocation32_spill]] %s10244_s3 }
   0x5   :  { %10282 = sst [smem:[#allocation33_spill]] %s10245_s4 }
   0x6   :  { %10283 = sst [smem:[#allocation34_spill]] %s10246_s5 }
   0x7   :  { %10284 = sst [smem:[#allocation35_spill]] %s10247_s6 }
   0x8   :  { %10285 = sst [smem:[#allocation36_spill]] %s10250_s9 }
   0x9   :  { %10286 = sst [smem:[#allocation37_spill]] %s10253_s12 }
   0xa   :  { %10287 = sst [smem:[#allocation38_spill]] %s10263_s22 }
   0xb   :  { %27 = vsyncpa [#allocation3], 0 }
   0xc   :  { %28 = vsyncpa [#allocation6], 0 }
   0xd   :  { %29 = vsyncpa [#allocation9], 0 }
   0xe   :  { %30 = vsyncpa [#allocation12], 0 }
   0xf   :  { %31 = vsyncpa [#allocation15], 0 }
  0x10   :  { %32 = vsyncpa [#allocation4], 0 }
  0x11   :  { %34 = vsyncpa [#allocation4 + $0x1], 0  ;;  %s9332_s3 = smov 0   ;;  %s9334_s28 = smov 0  }
  0x12   :  { %s9336_s29 = smov 0   ;;  %s9338_s30 = smov 0  }
  0x13 LB: > { %10288 = sst [smem:[#allocation23_spill]] %s9174_s3  ;;  %s9353_s4 = sadd.s32 4294967295, %s9186_s30   ;;  %s9186_s30 = sphi %s9338_s30, %s10326_s30   ;;  %s9182_s29 = sphi %s9336_s29, %s10331_s29   ;;  %s9178_s28 = sphi %s9334_s28, %s10330_s28   ;;  %s9174_s3 = sphi %s9332_s3, %s10329_s3  }
  0x14   : > { %10289 = sst [smem:[#allocation24_spill]] %s9182_s29  ;;  %s7193_s0 = sadd.s32 4294967294, %s9186_s30  }
  0x15   : > { %10290 = sst [smem:[#allocation25_spill]] %s9186_s30  ;;  %s9357_s23 = sadd.s32 1, %s9186_s30  }
  0x16   : > { %10291 = sst [smem:[#allocation26_spill]] %s9357_s23  ;;  %s514_s1 = sadd.s32 1, %s9182_s29 }
  0x17   : > { %s511_s5 = ssub.s32 %s9186_s30, %s9357_s23  ;;  %p524_p0 = scmp.ne.s32.totalorder %s9182_s29, %s9178_s28 }
  0x18   : > { %p512_p1 = scmp.eq.s32.totalorder %s511_s5, 0  ;;  %p525_p2 = scmp.eq.s32.totalorder %s9353_s4, 1 }
  0x19   : > { %p530_p3 = scmp.ne.s32.totalorder %s9178_s28, %s9174_s3  ;;  %p531_p4 = scmp.eq.s32.totalorder %s7193_s0, 1 }
  0x1a   : > { %s9368_s24 = scalar_select %p512_p1, %s9182_s29, %s514_s1  }
  0x1b   : > { %p9370_p5 = por %p525_p2, %p524_p0  ;;  %p9374_p6 = por %p531_p4, %p530_p3 }
  0x1c   : > { %10292 = sst [smem:[#allocation27_spill]] %s9368_s24  ;;  %p7194_p7 = scmp.ge.s32.totalorder %s9186_s30, 1 }
  0x1d   : > { %s10294_s25 = scalar_select %p9374_p6, 1, 0 }
  0x1e   : > { %p538_p8 = scmp.lt.s32.totalorder %s9186_s30, 3  ;;  %p10277_p9 = scmp.eq.s32.totalorder %s9353_s4, 0 }
  0x1f   : > { %10295 = sst [smem:[#allocation28_spill]] %s10294_s25  ;;  %s9188_s2 = smov [#allocation5]  }
  0x20   : > { %p9381_p10 = pnand %p7194_p7, %p538_p8  ;;  %s575_s27 = sshll.u32 %s9188_s2, 4  ;;  %s576_s27 = int_to_ptr.vmem [resolvable:$true] %s575_s27 }
  0x21   : > { %s9189_s1 = smov [#allocation8]   ;;  %s8909_s29 = scalar_lea.vmem %s576_s27, 4096 }
  0x22   : > { %p8535_p11 = pneg %p9381_p10  ;;  %s613_s5 = sshll.u32 %s9189_s1, 4  ;;  %s614_s5 = int_to_ptr.vmem [resolvable:$true] %s613_s5 }
  0x23   : > { %p8910_p0 = scmp.ne.s32.totalorder %s576_s27, %s8909_s29  ;;  %p8917_p3 = scmp.lt.s32.totalorder %s576_s27, %s576_s27 }
  0x24   : > { %p9389_p12 = pnand %p10277_p9, %p8535_p11  ;;  %p8918_p4 = scmp.lt.s32.totalorder %s8909_s29, %s8909_s29 }
  0x26   : > { %p9395_p13 = pneg %p9389_p12  ;;  %p8919_p7 = por %p8918_p4, %p8917_p3 }
  0x28   : > { %p8912_p1 = pnand %p8910_p0, %p9395_p13 }
  0x2a   : > { %p8913_p2 = pneg %p8912_p1 }
  0x2c   : > { %p8920_p8 = pnand %p8919_p7, %p8913_p2 }
  0x2e   : > { %8923 = shalt.err (!%p8920_p8)
}
  0x2f   : > { %s10271_s2 = smov 256   ;;  %s10273_s1 = smov 16  }
  0x30   : > { %s10299_s3 = sld [smem:[#allocation35_spill]]  ;;  %s8935_s30 = scalar_lea.vmem %s614_s5, 8192 }
  0x31   : > { %p8936_p11 = scmp.ne.s32.totalorder %s614_s5, %s8935_s30  ;;  %p8943_p3 = scmp.lt.s32.totalorder %s614_s5, %s614_s5 }
  0x32   : > { %p8944_p2 = scmp.lt.s32.totalorder %s8935_s30, %s8935_s30 }
  0x33   : > { %p8938_p0 = pnand %p8936_p11, %p9395_p13 }
  0x34   : > { %p8945_p4 = por %p8944_p2, %p8943_p3 }
  0x35   : > { %p8939_p1 = pneg %p8938_p0 }
  0x36   : > { %8541 = dma.hbm_to_vmem [thread:$0]  (!%p9389_p12), %s10299_s3, 4096, %s576_s27, [#allocation6], %s10271_s2, %s10271_s2, %s10273_s1  }
  0x37   : > { %p8946_p7 = pnand %p8945_p4, %p8939_p1 }
  0x39   : > { %8949 = shalt.err (!%p8946_p7)
}
  0x3a   : > { %s10275_s29 = smov 512   ;;  %s10276_s22 = smov 32  }
  0x3b   : > { %s10300_s12 = sld [smem:[#allocation37_spill]]  ;;  %s9194_s25 = smov [#allocation11]  }
  0x3c   : > { %s645_s27 = sshll.u32 %s9194_s25, 4  ;;  %s646_s27 = int_to_ptr.vmem [resolvable:$true] %s645_s27 }
  0x3d   : > { %s8961_s2 = scalar_lea.vmem %s646_s27, 6144  ;;  %p8969_p1 = scmp.lt.s32.totalorder %s646_s27, %s646_s27 }
  0x3e   : > { %p8962_p8 = scmp.ne.s32.totalorder %s646_s27, %s8961_s2  ;;  %p8970_p3 = scmp.lt.s32.totalorder %s8961_s2, %s8961_s2 }
  0x40   : > { %p8964_p11 = pnand %p8962_p8, %p9395_p13  ;;  %p8971_p2 = por %p8970_p3, %p8969_p1 }
  0x41   : > { %8547 = dma.hbm_to_vmem [thread:$0]  (!%p9389_p12), %s10300_s12, 8192, %s614_s5, [#allocation9], %s10275_s29, %s10275_s29, %s10276_s22  }
  0x42   : > { %p8965_p0 = pneg %p8964_p11 }
  0x44   : > { %p8972_p4 = pnand %p8971_p2, %p8965_p0 }
  0x46   : > { %8975 = shalt.err (!%p8972_p4)
}
  0x47   : > { %s9195_s30 = smov 192   ;;  %s9196_s1 = smov 12  }
  0x48   : > { %8553 = dma.hbm_to_vmem [thread:$0]  (!%p9389_p12), %s10257_s16, 6144, %s646_s27, [#allocation12], %s9195_s30, %s9195_s30, %s9196_s1  }
  0x49   : > { %s9197_s3 = smov [#allocation2]   ;;  %s9198_s29 = smov [#allocation7]  }
  0x4a   : > { %s556_s25 = sshll.u32 %s9197_s3, 4  ;;  %s594_s22 = sshll.u32 %s9198_s29, 4  ;;  %s557_s25 = int_to_ptr.vmem [resolvable:$true] %s556_s25  ;;  %s595_s22 = int_to_ptr.vmem [resolvable:$true] %s594_s22 }
  0x4b   : > { %s8987_s12 = scalar_lea.vmem %s557_s25, 4096  ;;  %p8995_p0 = scmp.lt.s32.totalorder %s557_s25, %s557_s25 }
  0x4c   : > { %p8988_p7 = scmp.ne.s32.totalorder %s557_s25, %s8987_s12  ;;  %p8996_p1 = scmp.lt.s32.totalorder %s8987_s12, %s8987_s12 }
  0x4e   : > { %p8990_p8 = pnand %p8988_p7, %p9395_p13  ;;  %p8997_p3 = por %p8996_p1, %p8995_p0 }
  0x50   : > { %p8991_p11 = pneg %p8990_p8 }
  0x52   : > { %p8998_p2 = pnand %p8997_p3, %p8991_p11 }
  0x54   : > { %9001 = shalt.err (!%p8998_p2)
}
  0x55   : > { %s10301_s2 = smov 16   ;;  %s10302_s23 = smov 256  }
  0x56   : > { %s10303_s30 = sld [smem:[#allocation32_spill]]  ;;  %s9013_s29 = scalar_lea.vmem %s595_s22, 4096 }
  0x57   : > { %p9014_p4 = scmp.ne.s32.totalorder %s595_s22, %s9013_s29  ;;  %p9021_p9 = scmp.lt.s32.totalorder %s595_s22, %s595_s22 }
  0x58   : > { %p9022_p0 = scmp.lt.s32.totalorder %s9013_s29, %s9013_s29 }
  0x59   : > { %p9016_p7 = pnand %p9014_p4, %p9395_p13 }
  0x5a   : > { %p9023_p11 = por %p9022_p0, %p9021_p9 }
  0x5b   : > { %p9017_p8 = pneg %p9016_p7 }
  0x5c   : > { %8538 = dma.hbm_to_vmem [thread:$0]  (!%p9389_p12), %s10303_s30, 4096, %s557_s25, [#allocation3], %s10302_s23, %s10302_s23, %s10301_s2  }
  0x5d   : > { %p9024_p1 = pnand %p9023_p11, %p9017_p8 }
  0x5f   : > { %9027 = shalt.err (!%p9024_p1)
}
  0x60   : > { %s10304_s9 = sld [smem:[#allocation36_spill]]  ;;  %s9199_s3 = smov [#allocation10]  }
  0x61   : > { %s626_s25 = sshll.u32 %s9199_s3, 4  ;;  %s9200_s1 = smov [#allocation13]   ;;  %s627_s25 = int_to_ptr.vmem [resolvable:$true] %s626_s25 }
  0x62   : > { %s664_s27 = sshll.u32 %s9200_s1, 4  ;;  %s9039_s30 = scalar_lea.vmem %s627_s25, 16384  ;;  %s665_s27 = int_to_ptr.vmem [resolvable:$true] %s664_s27 }
  0x63   : > { %p9040_p3 = scmp.ne.s32.totalorder %s627_s25, %s9039_s30  ;;  %p9047_p4 = scmp.lt.s32.totalorder %s627_s25, %s627_s25 }
  0x64   : > { %p9048_p7 = scmp.lt.s32.totalorder %s9039_s30, %s9039_s30 }
  0x65   : > { %p9042_p9 = pnand %p9040_p3, %p9395_p13 }
  0x66   : > { %8544 = dma.hbm_to_vmem [thread:$0]  (!%p9389_p12), %s10304_s9, 4096, %s595_s22, [#allocation6], %s10302_s23, %s10302_s23, %s10301_s2  }
  0x67   : > { %p9043_p2 = pneg %p9042_p9  ;;  %p9049_p8 = por %p9048_p7, %p9047_p4 }
  0x69   : > { %p9050_p0 = pnand %p9049_p8, %p9043_p2 }
  0x6b   : > { %9053 = shalt.err (!%p9050_p0)
}
  0x6c   : > { %s10305_s29 = smov 32   ;;  %s10306_s12 = smov 512  }
  0x6d   : > { %8550 = dma.hbm_to_vmem [thread:$0]  (!%p9389_p12), %s10254_s13, 16384, %s627_s25, [#allocation9], %s10306_s12, %s10306_s12, %s10305_s29  }
  0x6e   : > { %s9065_s3 = scalar_lea.vmem %s665_s27, 2048  ;;  %p9073_p9 = scmp.lt.s32.totalorder %s665_s27, %s665_s27 }
  0x6f   : > { %p9066_p11 = scmp.ne.s32.totalorder %s665_s27, %s9065_s3  ;;  %p9074_p4 = scmp.lt.s32.totalorder %s9065_s3, %s9065_s3 }
  0x71   : > { %p9068_p1 = pnand %p9066_p11, %p9395_p13  ;;  %p9075_p2 = por %p9074_p4, %p9073_p9 }
  0x73   : > { %p9069_p3 = pneg %p9068_p1 }
  0x75   : > { %p9076_p7 = pnand %p9075_p2, %p9069_p3 }
  0x77   : > { %9079 = shalt.err (!%p9076_p7)
}
  0x78   : > { %s9201_s1 = smov 128   ;;  %s9202_s30 = smov 8  }
  0x79   : > { %8556 = dma.hbm_to_vmem [thread:$0]  (!%p9389_p12), %s10260_s19, 2048, %s665_s27, [#allocation12], %s9201_s1, %s9201_s1, %s9202_s30  }
  0x7a   : > { %s9203_s25 = smov [#allocation14]  }
  0x7b   : > { %s680_s29 = sshll.u32 %s9203_s25, 4  ;;  %s681_s29 = int_to_ptr.vmem [resolvable:$true] %s680_s29 }
  0x7c   : > { %s9091_s12 = scalar_lea.vmem %s681_s29, 3072  ;;  %p9099_p1 = scmp.lt.s32.totalorder %s681_s29, %s681_s29 }
  0x7d   : > { %p9092_p8 = scmp.ne.s32.totalorder %s681_s29, %s9091_s12  ;;  %p9100_p3 = scmp.lt.s32.totalorder %s9091_s12, %s9091_s12 }
  0x7f   : > { %p9094_p0 = pnand %p9092_p8, %p9395_p13  ;;  %p9101_p9 = por %p9100_p3, %p9099_p1 }
  0x81   : > { %p9095_p11 = pneg %p9094_p0 }
  0x83   : > { %p9102_p4 = pnand %p9101_p9, %p9095_p11 }
  0x85   : > { %9105 = shalt.err (!%p9102_p4)
}
  0x86   : > { %8559 = dma.hbm_to_vmem [thread:$0]  (!%p9389_p12), %s10262_s21, 3072, %s681_s29, [#allocation15], %s10302_s23, %s10302_s23, %s10301_s2  }
  0x87   : > { %702 = sbr.rel (%p9381_p10) target bundleno = 4860 (0x12fc), region = 108  ;;  %p10307_p13 = scmp.eq.s32.totalorder (!%p9381_p10), %s9353_s4, 0 }
  0x8c   : > { %9149 = dma.done.wait (%p10307_p13), [#allocation3], 4096   ;;  %p10308_p2 = pmov %p10307_p13 }
  0x8e   : > { %9151 = vsyncadd (%p10308_p2), [#allocation3], 4294963200  ;;  %p10309_p7 = pmov %p10308_p2 }
  0x8f   : > { %p10310_p8 = pmov %p10308_p2 }
  0x90   : > { %9153 = dma.done.wait (%p10309_p7), [#allocation6], 8192  }
  0x91   : > { %9155 = vsyncadd (%p10310_p8), [#allocation6], 4294959104  ;;  %p10311_p0 = pmov %p10308_p2 }
  0x93   : > { %9157 = dma.done.wait (%p10311_p0), [#allocation9], 24576   ;;  %p10312_p12 = pmov %p10311_p0 }
  0x94   : > { %p10313_p10 = pmov %p10311_p0 }
  0x95   : > { %9159 = vsyncadd (%p10312_p12), [#allocation9], 4294942720 }
  0x96   : > { %9161 = dma.done.wait (%p10313_p10), [#allocation12], 8192   ;;  %p10314_p11 = pmov %p10311_p0 }
  0x97   : > { %p10315_p1 = pmov %p10311_p0 }
  0x98   : > { %9163 = vsyncadd (%p10314_p11), [#allocation12], 4294959104 }
  0x99   : > { %9165 = dma.done.wait (%p10315_p1), [#allocation15], 3072   ;;  %p10316_p3 = pmov %p10311_p0 }
  0x9a   : > { %p790_p9 = scmp.lt.s32.totalorder %s9353_s4, 1  ;;  %v9204_v0 = vmov 0.0   ;;  %vm9205_vm0 = vmmov 0   ;;  %s10317_s2 = sld [smem:[#allocation29_spill]]  ;;  %vm805_vm1 = vcmask 130048   ;;  %v849_v21 = vlaneseq }
  0x9b   : > { %9167 = vsyncadd (%p10316_p3), [#allocation15], 4294964224  ;;  %8025 = vmatprep.subr.bf16.mxu0 %v9204_v0  ;;  %8027 = vmatprep.mubr.msk.bf16.mxu0 %vm9205_vm0, %v9204_v0  ;;  %s10318_s1 = sld [smem:[#allocation30_spill]]  ;;  %v8642_v4 = vld [vmem:[#allocation2 + $0xe0] ss:$16 sps:$4 sm:$0xff]   ;;  %s9206_s29 = smov 120  }
  0x9c   : > { %s791_s24 = scalar_select %p790_p9, %s9353_s4, 1  ;;  %8031 = vmatprep.subr.bf16.mxu1 %v9204_v0  ;;  %8047 = vmatprep.mubr.msk.bf16.mxu1 %vm9205_vm0, %v9204_v0  ;;  %v8643_v5 = vld [vmem:[#allocation2 + $0xe4] ss:$16 sps:$4 sm:$0xff]   ;;  %v8644_v6 = vld [vmem:[#allocation2 + $0xc0] ss:$16 sps:$4 sm:$0xff]   ;;  %v9538_v22 = vshrl.u32 %v849_v21, 7 }
  0x9d   : > { %8032 = vmatpush3.bf16.msra.mxu1 %v8642_v4  ;;  %v8645_v7 = vld [vmem:[#allocation2 + $0xc4] ss:$16 sps:$4 sm:$0xff]   ;;  %v8646_v8 = vld [vmem:[#allocation2 + $0xa0] ss:$16 sps:$4 sm:$0xff]   ;;  %s10319_s25 = sld [smem:[#allocation33_spill]]  ;;  %s9207_s12 = smov 112  }
  0x9e   : > { %8033 = vmatprep.subr.bf16.mxu1 %v9204_v0  ;;  %v8647_v9 = vld [vmem:[#allocation2 + $0xa4] ss:$16 sps:$4 sm:$0xff]   ;;  %v8648_v10 = vld [vmem:[#allocation2 + $0x80] ss:$16 sps:$4 sm:$0xff]   ;;  %v851_v24 = vsub.s32 0, %v9538_v22  ;;  %s9208_s26 = smov 104  }
  0x9f   : > { %v8649_v11 = vld [vmem:[#allocation2 + $0x84] ss:$16 sps:$4 sm:$0xff]   ;;  %v8650_v12 = vld [vmem:[#allocation2 + $0x60] ss:$16 sps:$4 sm:$0xff]   ;;  %v8658_v30 = vld [vmem:[#allocation2 + $0xe8] ss:$16 sps:$4 sm:$0xff]  }
  0xa0   : > { %s792_s23 = scalar_lea.vmem %s10317_s2, %s791_s24  ;;  %v8651_v13 = vld [vmem:[#allocation2 + $0x64] ss:$16 sps:$4 sm:$0xff]   ;;  %v8652_v14 = vld [vmem:[#allocation2 + $0x40] ss:$16 sps:$4 sm:$0xff]   ;;  %s10320_s24 = sld [smem:[#allocation31_spill]]  ;;  %vm1066_vm2 = vcmask 64512  }
  0xa1   : > { %v8641_v1 = vld [vmem:[%s10318_s1] sm:$0xff]   ;;  %8034 = vmatpush3.bf16.msra.mxu1 %v8644_v6  ;;  %v8659_v33 = vld [vmem:[#allocation2 + $0xc8] ss:$16 sps:$4 sm:$0xff]   ;;  %v8666_v50 = vld [vmem:[#allocation2 + $0xec] ss:$16 sps:$4 sm:$0xff]   ;;  %s10321_s3 = sld [smem:[#allocation34_spill]] }
  0xa2   : > { %v794_v2 = vld [vmem:[%s792_s23] sm:$0x1]  ;;  %8026 = vmatpush3.bf16.msra.mxu0 %v8641_v1  ;;  %8035 = vmatprep.subr.bf16.mxu1 %v9204_v0  ;;  %v8653_v15 = vld [vmem:[#allocation2 + $0x44] ss:$16 sps:$4 sm:$0xff]   ;;  %v8660_v34 = vld [vmem:[#allocation2 + $0xa8] ss:$16 sps:$4 sm:$0xff]  }
  0xa3   : > { %v795_v3 = vpack.c.bf16 %v794_v2, %v794_v2  ;;  %8051 = vmatprep.subr.bf16.mxu0 %v9204_v0  ;;  %v8654_v16 = vld [vmem:[#allocation2 + $0x20] ss:$16 sps:$4 sm:$0xff]   ;;  %v8655_v17 = vld [vmem:[#allocation2 + $0x24] ss:$16 sps:$4 sm:$0xff]   ;;  %v8661_v35 = vld [vmem:[#allocation2 + $0x88] ss:$16 sps:$4 sm:$0xff]  }
  0xa4   : > { %v8656_v18 = vld [vmem:[#allocation2] ss:$16 sps:$4 sm:$0xff]   ;;  %v8657_v19 = vld [vmem:[#allocation2 + $0x4] ss:$16 sps:$4 sm:$0xff]   ;;  %v8662_v36 = vld [vmem:[#allocation2 + $0x68] ss:$16 sps:$4 sm:$0xff]  }
  0xa5   : > { %8028 = vmatmul.mubr.msk.bf16.vlgmr.msra.gmra.mxu0 %vm805_vm1, %v795_v3  ;;  %8036 = vmatpush3.bf16.msra.mxu1 %v8646_v8  ;;  %v9532_v20 = vld [vmem:[%s10319_s25] sm:$0xff]  ;;  %v8663_v37 = vld [vmem:[#allocation2 + $0x48] ss:$16 sps:$4 sm:$0xff]   ;;  %v8667_v53 = vld [vmem:[#allocation2 + $0xcc] ss:$16 sps:$4 sm:$0xff]   ;;  %vm3170_vm3 = vcmask 1043456  }
  0xa6   : > { %8052 = vmatpush3.bf16.msra.mxu0 %v8643_v5  ;;  %8067 = vmatprep.mubr.msk.bf16.mxu0 %vm9205_vm0, %v9204_v0  ;;  %v798_v23 = vld [vmem:[%s10320_s24] sm:$0x1]  ;;  %v8664_v38 = vld [vmem:[#allocation2 + $0x28] ss:$16 sps:$4 sm:$0xff]   ;;  %v8668_v56 = vld [vmem:[#allocation2 + $0xac] ss:$16 sps:$4 sm:$0xff]  }
  0xa7   : > { %8053 = vmatprep.subr.bf16.mxu0 %v9204_v0  ;;  %8037 = vmatprep.subr.bf16.mxu1 %v9204_v0  ;;  %v8665_v39 = vld [vmem:[#allocation2 + $0x8] ss:$16 sps:$4 sm:$0xff]   ;;  %v8669_v57 = vld [vmem:[#allocation2 + $0x8c] ss:$16 sps:$4 sm:$0xff]   ;;  %v8674_v62 = vld [vmem:[#allocation5 + $0xe0] ss:$16 sps:$4 sm:$0xff]  }
  0xa8   : > { %1064 = vrot.lane.b32.xlu0 %v9532_v20, %s9206_s29  ;;  %1494 = vrot.lane.b32.xlu1 %v9532_v20, %s9208_s26  ;;  %v8670_v58 = vld [vmem:[#allocation2 + $0x6c] ss:$16 sps:$4 sm:$0xff]   ;;  %v8676_v63 = vld [vmem:[#allocation5 + $0xc0] ss:$16 sps:$4 sm:$0xff]   ;;  %v8681_v21 = vld [vmem:[#allocation5 + $0x84] ss:$16 sps:$4 sm:$0xff]  }
  0xa9   : > { %8038 = vmatpush3.bf16.msra.mxu1 %v8648_v10  ;;  %v8671_v59 = vld [vmem:[#allocation2 + $0x4c] ss:$16 sps:$4 sm:$0xff]   ;;  %v8678_v1 = vld [vmem:[#allocation5 + $0xa0] ss:$16 sps:$4 sm:$0xff]   ;;  %vm5467_vm4 = vcmask 261120   ;;  %vm5963_vm5 = vcmask 523264  }
  0xaa   : > { %8054 = vmatpush3.bf16.msra.mxu0 %v8645_v7  ;;  %8039 = vmatprep.subr.bf16.mxu1 %v9204_v0  ;;  %v8672_v60 = vld [vmem:[#allocation2 + $0x2c] ss:$16 sps:$4 sm:$0xff]   ;;  %v8680_v2 = vld [vmem:[#allocation5 + $0x80] ss:$16 sps:$4 sm:$0xff]   ;;  %s9212_s2 = smov 96   ;;  %s9213_s5 = smov 80  }
  0xab   : > { %8055 = vmatprep.subr.bf16.mxu0 %v9204_v0  ;;  %v8673_v61 = vld [vmem:[#allocation2 + $0xc] ss:$16 sps:$4 sm:$0xff]   ;;  %v8682_v3 = vld [vmem:[#allocation5 + $0x60] ss:$16 sps:$4 sm:$0xff]   ;;  %vm6602_vm6 = vcmask 785408   ;;  %s8500_s30 = smul.u32 3072, %s9353_s4 }
  0xac   : > { %1315 = vrot.lane.b32.xlu0 %v9532_v20, %s9207_s12  ;;  %v8684_v4 = vld [vmem:[#allocation5 + $0x40] ss:$16 sps:$4 sm:$0xff]   ;;  %s10322_s27 = sld [smem:[#allocation38_spill]] }
  0xad   : > { %8040 = vmatpush3.bf16.msra.mxu1 %v8650_v12 }
  0xae   : > { %8056 = vmatpush3.bf16.msra.mxu0 %v8647_v9  ;;  %8041 = vmatprep.subr.bf16.mxu1 %v9204_v0 }
  0xaf   : > { %8057 = vmatprep.subr.bf16.mxu0 %v9204_v0 }
  0xb1   : > { %8042 = vmatpush3.bf16.msra.mxu1 %v8652_v14  ;;  %v8675_v14 = vld [vmem:[#allocation5 + $0xe4] ss:$16 sps:$4 sm:$0xff]  }
  0xb2   : > { %8058 = vmatpush3.bf16.msra.mxu0 %v8649_v11  ;;  %8043 = vmatprep.subr.bf16.mxu1 %v9204_v0  ;;  %s10191_s24 = scalar_lea.hbm %s10322_s27, %s8500_s30 }
  0xb3   : > { %8059 = vmatprep.subr.bf16.mxu0 %v9204_v0 }
  0xb5   : > { %8044 = vmatpush3.bf16.msra.mxu1 %v8654_v16 }
  0xb6   : > { %8060 = vmatpush3.bf16.msra.mxu0 %v8651_v13  ;;  %8045 = vmatprep.subr.bf16.mxu1 %v9204_v0 }
  0xb7   : > { %8061 = vmatprep.subr.bf16.mxu0 %v9204_v0 }
  0xb9   : > { %8046 = vmatpush3.bf16.msra.mxu1 %v8656_v18 }
  0xba   : > { %8062 = vmatpush3.bf16.msra.mxu0 %v8653_v15  ;;  %8081 = vmatprep.subr.bf16.mxu1 %v9204_v0 }
  0xbb   : > { %8063 = vmatprep.subr.bf16.mxu0 %v9204_v0 }
  0xbe   : > { %8064 = vmatpush3.bf16.msra.mxu0 %v8655_v17  ;;  %v8677_v17 = vld [vmem:[#allocation5 + $0xc4] ss:$16 sps:$4 sm:$0xff]  }
  0xbf   : > { %8065 = vmatprep.subr.bf16.mxu0 %v9204_v0 }
  0xc2   : > { %8066 = vmatpush3.bf16.msra.mxu0 %v8657_v19 }
  0xc3   : > { %8071 = vmatprep.subr.mxu0 %v9204_v0 }
 0x11a   : > { %v1065_v40 = vpop.permute.xlu0 %1064  ;;  %v1495_v13 = vpop.permute.xlu1 %1494 }
 0x11e   : > { %v1316_v49 = vpop.permute.xlu0 %1315 }
 0x165   : > { %v843_v25 = vpop.f32.mrf.mxu0 }
 0x166   : > { %v844_v26 = vadd.f32 %v843_v25, %v798_v23  ;;  %v8683_v23 = vld [vmem:[#allocation5 + $0x64] ss:$16 sps:$4 sm:$0xff]  }
 0x167   : > { %v8029_v27 = vpop.f32.mrf.mxu0  ;;  %v8685_v25 = vld [vmem:[#allocation5 + $0x44] ss:$16 sps:$4 sm:$0xff]  }
 0x168   : > { %v852_v28 = vrot.slane %v844_v26, %v851_v24  ;;  %v8686_v26 = vld [vmem:[#allocation5 + $0x20] ss:$16 sps:$4 sm:$0xff]   ;;  %v8687_v27 = vld [vmem:[#allocation5 + $0x24] ss:$16 sps:$4 sm:$0xff]  }
 0x169   : > { %v846_v29 = vpop.f32.mrf.mxu0 }
 0x16a   : > { %v9546_v31 = vpack.c.bf16 %v852_v28, %v852_v28  ;;  %v8688_v28 = vld [vmem:[#allocation5] ss:$16 sps:$4 sm:$0xff]   ;;  %v8689_v29 = vld [vmem:[#allocation5 + $0x4] ss:$16 sps:$4 sm:$0xff]  }
 0x16b   : > { %v8030_v32 = vpop.f32.mrf.mxu0 }
 0x16c   : > { %8048 = vmatmul.mubr.bf16.vlgmr.msra.gmra.mxu1 %v9546_v31  ;;  %8068 = vmatmul.mubr.bf16.vlgmr.msra.gmra.mxu0 %v9546_v31  ;;  %v7251_v32 = vld [vmem:[%s10321_s3] ss:$0 sm:$0xff] }
 0x16d   : > { %8082 = vmatpush3.bf16.msra.mxu1 %v8658_v30  ;;  %8097 = vmatprep.mubr.msk.bf16.mxu1 %vm9205_vm0, %v9204_v0  ;;  %v1683_v30 = vld [vmem:[%s10248_s7] sm:$0xff] }
 0x16e   : > { %8083 = vmatprep.subr.bf16.mxu1 %v9204_v0  ;;  %8073 = vmatprep.mubr.msk.f32.mxu0 %vm9205_vm0, %v9204_v0 }
 0x16f   : > { %1789 = vrot.lane.b32.xlu1 %v1683_v30, %s9206_s29  ;;  %2039 = vrot.lane.b32.xlu0 %v1683_v30, %s9207_s12 }
 0x171   : > { %8084 = vmatpush3.bf16.msra.mxu1 %v8659_v33 }
 0x172   : > { %8085 = vmatprep.subr.bf16.mxu1 %v9204_v0 }
 0x173   : > { %2218 = vrot.lane.b32.xlu1 %v1683_v30, %s9208_s26 }
 0x175   : > { %8086 = vmatpush3.bf16.msra.mxu1 %v8660_v34 }
 0x176   : > { %8087 = vmatprep.subr.bf16.mxu1 %v9204_v0 }
 0x179   : > { %8088 = vmatpush3.bf16.msra.mxu1 %v8661_v35 }
 0x17a   : > { %8089 = vmatprep.subr.bf16.mxu1 %v9204_v0 }
 0x17d   : > { %8090 = vmatpush3.bf16.msra.mxu1 %v8662_v36 }
 0x17e   : > { %8091 = vmatprep.subr.bf16.mxu1 %v9204_v0 }
 0x181   : > { %8092 = vmatpush3.bf16.msra.mxu1 %v8663_v37 }
 0x182   : > { %8093 = vmatprep.subr.bf16.mxu1 %v9204_v0 }
 0x185   : > { %8094 = vmatpush3.bf16.msra.mxu1 %v8664_v38 }
 0x186   : > { %8095 = vmatprep.subr.bf16.mxu1 %v9204_v0 }
 0x189   : > { %8096 = vmatpush3.bf16.msra.mxu1 %v8665_v39 }
 0x18a   : > { %8126 = vmatprep.subr.mxu1 %v9204_v0 }
 0x18c   : > { %8098 = vmatmul.mubr.bf16.vlgmr.msra.gmra.mxu1 %v9546_v31 }
 0x18d   : > { %8128 = vmatprep.mubr.msk.f32.mxu1 %vm9205_vm0, %v9204_v0 }
 0x1e1   : > { %v1790_v38 = vpop.permute.xlu1 %1789 }
 0x22c   : > { %v952_v41 = vpop.f32.mrf.mxu1  ;;  %v1057_v42 = vpop.f32.mrf.mxu0 }
 0x22d   : > { %8072 = vmatpush3.msra.mxu0 %v1057_v42 }
 0x22e   : > { %v8049_v43 = vpop.f32.mrf.mxu1  ;;  %v8069_v44 = vpop.f32.mrf.mxu0  ;;  %8076 = vmatprep.subr.mxu0 %v9204_v0  ;;  %8074 = vmatmul.mubr.msk.f32.vlgmr.msra.gmra.mxu0 %vm1066_vm2, %v1065_v40 }
 0x22f   : > { %8077 = vmatpush3.msra.mxu0 %v952_v41  ;;  %8078 = vmatprep.mubr.msk.f32.mxu0 %vm9205_vm0, %v9204_v0  ;;  %v8690_v43 = vld [vmem:[#allocation5 + $0xe8] ss:$16 sps:$4 sm:$0xff]  }
 0x230   : > { %v955_v45 = vpop.f32.mrf.mxu1  ;;  %v1060_v46 = vpop.f32.mrf.mxu0  ;;  %8101 = vmatprep.subr.mxu0 %v9204_v0 }
 0x232   : > { %v8050_v47 = vpop.f32.mrf.mxu1  ;;  %v8070_v48 = vpop.f32.mrf.mxu0  ;;  %8079 = vmatmul.mubr.msk.f32.vlgmr.msra.gmra.mxu0 %vm1066_vm2, %v9532_v20  ;;  %v8679_v20 = vld [vmem:[#allocation5 + $0xa4] ss:$16 sps:$4 sm:$0xff]  }
 0x233   : > { %8103 = vmatprep.mubr.msk.f32.mxu0 %vm9205_vm0, %v9204_v0  ;;  %v8691_v48 = vld [vmem:[#allocation5 + $0xc8] ss:$16 sps:$4 sm:$0xff]  }
 0x24c   : > { %v1309_v51 = vpop.f32.mrf.mxu1 }
 0x24d   : > { %8102 = vmatpush3.msra.mxu0 %v1309_v51  ;;  %v8694_v51 = vld [vmem:[#allocation5 + $0x68] ss:$16 sps:$4 sm:$0xff]  }
 0x24e   : > { %v8099_v52 = vpop.f32.mrf.mxu1  ;;  %8104 = vmatmul.mubr.msk.f32.vlgmr.msra.gmra.mxu0 %vm1066_vm2, %v1316_v49  ;;  %8106 = vmatprep.subr.bf16.mxu0 %v9204_v0  ;;  %v8692_v49 = vld [vmem:[#allocation5 + $0xa8] ss:$16 sps:$4 sm:$0xff]  }
 0x24f   : > { %8107 = vmatpush3.bf16.msra.mxu0 %v8666_v50  ;;  %8122 = vmatprep.mubr.msk.bf16.mxu0 %vm9205_vm0, %v9204_v0  ;;  %v8693_v50 = vld [vmem:[#allocation5 + $0x88] ss:$16 sps:$4 sm:$0xff]  }
 0x250   : > { %v1312_v54 = vpop.f32.mrf.mxu1  ;;  %8108 = vmatprep.subr.bf16.mxu0 %v9204_v0  ;;  %v8695_v52 = vld [vmem:[#allocation5 + $0x48] ss:$16 sps:$4 sm:$0xff]  }
 0x251   : > { %v8697_v54 = vld [vmem:[#allocation5 + $0x8] ss:$16 sps:$4 sm:$0xff]  }
 0x252   : > { %v8100_v55 = vpop.f32.mrf.mxu1 }
 0x253   : > { %8109 = vmatpush3.bf16.msra.mxu0 %v8667_v53  ;;  %v8696_v53 = vld [vmem:[#allocation5 + $0x28] ss:$16 sps:$4 sm:$0xff]  }
 0x254   : > { %8110 = vmatprep.subr.bf16.mxu0 %v9204_v0 }
 0x257   : > { %8111 = vmatpush3.bf16.msra.mxu0 %v8668_v56 }
 0x258   : > { %8112 = vmatprep.subr.bf16.mxu0 %v9204_v0 }
 0x25b   : > { %8113 = vmatpush3.bf16.msra.mxu0 %v8669_v57 }
 0x25c   : > { %8114 = vmatprep.subr.bf16.mxu0 %v9204_v0 }
 0x25f   : > { %8115 = vmatpush3.bf16.msra.mxu0 %v8670_v58 }
 0x260   : > { %8116 = vmatprep.subr.bf16.mxu0 %v9204_v0 }
 0x263   : > { %8117 = vmatpush3.bf16.msra.mxu0 %v8671_v59 }
 0x264   : > { %8118 = vmatprep.subr.bf16.mxu0 %v9204_v0 }
 0x267   : > { %8119 = vmatpush3.bf16.msra.mxu0 %v8672_v60  ;;  %v2040_v60 = vpop.permute.xlu0 %2039 }
 0x268   : > { %8120 = vmatprep.subr.bf16.mxu0 %v9204_v0 }
 0x26b   : > { %8121 = vmatpush3.bf16.msra.mxu0 %v8673_v61  ;;  %v8698_v61 = vld [vmem:[#allocation5 + $0xec] ss:$16 sps:$4 sm:$0xff]  }
 0x26c   : > { %8131 = vmatprep.subr.bf16.mxu0 %v9204_v0 }
 0x26e   : > { %8123 = vmatmul.mubr.bf16.vlgmr.msra.gmra.mxu0 %v9546_v31 }
 0x26f   : > { %8147 = vmatprep.mubr.msk.bf16.mxu0 %vm9205_vm0, %v9204_v0  ;;  %8132 = vmatpush3.bf16.msra.mxu0 %v8674_v62 }
 0x270   : > { %8133 = vmatprep.subr.bf16.mxu0 %v9204_v0 }
 0x273   : > { %8134 = vmatpush3.bf16.msra.mxu0 %v8676_v63 }
 0x274   : > { %8135 = vmatprep.subr.bf16.mxu0 %v9204_v0 }
 0x277   : > { %8136 = vmatpush3.bf16.msra.mxu0 %v8678_v1  ;;  %v8699_v1 = vld [vmem:[#allocation5 + $0xcc] ss:$16 sps:$4 sm:$0xff]  }
 0x278   : > { %8137 = vmatprep.subr.bf16.mxu0 %v9204_v0 }
 0x27b   : > { %8138 = vmatpush3.bf16.msra.mxu0 %v8680_v2 }
 0x27c   : > { %8139 = vmatprep.subr.bf16.mxu0 %v9204_v0 }
 0x27f   : > { %8140 = vmatpush3.bf16.msra.mxu0 %v8682_v3 }
 0x280   : > { %8141 = vmatprep.subr.bf16.mxu0 %v9204_v0 }
 0x283   : > { %8142 = vmatpush3.bf16.msra.mxu0 %v8684_v4  ;;  %v8700_v4 = vld [vmem:[#allocation5 + $0xac] ss:$16 sps:$4 sm:$0xff]  }
 0x284   : > { %8143 = vmatprep.subr.bf16.mxu0 %v9204_v0 }
 0x287   : > { %8144 = vmatpush3.bf16.msra.mxu0 %v8686_v26 }
 0x288   : > { %8145 = vmatprep.subr.bf16.mxu0 %v9204_v0 }
 0x28b   : > { %8146 = vmatpush3.bf16.msra.mxu0 %v8688_v28  ;;  %v8711_v28 = vld [vmem:[#allocation7 + $0xa4] ss:$16 sps:$4 sm:$0xff]  }
 0x28c   : > { %8171 = vmatprep.subr.mxu0 %v9204_v0 }
 0x2ee   : > { %v1135_v5 = vpop.f32.mrf.mxu0 }
 0x2f0   : > { %v8075_v6 = vpop.f32.mrf.mxu0 }
 0x2f1   : > { %v8702_v6 = vld [vmem:[#allocation5 + $0x6c] ss:$16 sps:$4 sm:$0xff]  }
 0x2f2   : > { %v1207_v7 = vpop.f32.mrf.mxu0 }
 0x2f3   : > { %v1208_v8 = vadd.f32 %v1207_v7, %v1135_v5  ;;  %v8701_v5 = vld [vmem:[#allocation5 + $0x8c] ss:$16 sps:$4 sm:$0xff]  }
 0x2f4   : > { %v8080_v9 = vpop.f32.mrf.mxu0  ;;  %v8703_v7 = vld [vmem:[#allocation5 + $0x4c] ss:$16 sps:$4 sm:$0xff]  }
 0x2f5   : > { %v8705_v9 = vld [vmem:[#allocation5 + $0xc] ss:$16 sps:$4 sm:$0xff]  }
 0x30e   : > { %v1385_v10 = vpop.f32.mrf.mxu0 }
 0x30f   : > { %v1389_v11 = vadd.f32 %v1385_v10, %v1208_v8  ;;  %v8704_v8 = vld [vmem:[#allocation5 + $0x2c] ss:$16 sps:$4 sm:$0xff]   ;;  %v8706_v10 = vld [vmem:[#allocation7 + $0xe0] ss:$16 sps:$4 sm:$0xff]  }
 0x310   : > { %v8105_v12 = vpop.f32.mrf.mxu0 }
 0x311   : > { %v8710_v12 = vld [vmem:[#allocation7 + $0xa0] ss:$16 sps:$4 sm:$0xff]  }
 0x32e   : > { %v1488_v15 = vpop.f32.mrf.mxu0 }
 0x32f   : > { %8127 = vmatpush3.msra.mxu1 %v1488_v15  ;;  %v8716_v15 = vld [vmem:[#allocation7 + $0x40] ss:$16 sps:$4 sm:$0xff]  }
 0x330   : > { %v8124_v16 = vpop.f32.mrf.mxu0  ;;  %8129 = vmatmul.mubr.msk.f32.vlgmr.msra.gmra.mxu1 %vm1066_vm2, %v1495_v13  ;;  %8151 = vmatprep.subr.bf16.mxu1 %v9204_v0  ;;  %v8712_v13 = vld [vmem:[#allocation7 + $0x80] ss:$16 sps:$4 sm:$0xff]  }
 0x331   : > { %8152 = vmatpush3.bf16.msra.mxu1 %v8675_v14  ;;  %8167 = vmatprep.mubr.msk.bf16.mxu1 %vm9205_vm0, %v9204_v0  ;;  %v8714_v14 = vld [vmem:[#allocation7 + $0x60] ss:$16 sps:$4 sm:$0xff]  }
 0x332   : > { %v1491_v18 = vpop.f32.mrf.mxu0  ;;  %8153 = vmatprep.subr.bf16.mxu1 %v9204_v0 }
 0x334   : > { %v8125_v19 = vpop.f32.mrf.mxu0 }
 0x335   : > { %8154 = vmatpush3.bf16.msra.mxu1 %v8677_v17  ;;  %v2219_v19 = vpop.permute.xlu1 %2218 }
 0x336   : > { %8155 = vmatprep.subr.bf16.mxu1 %v9204_v0 }
 0x339   : > { %8156 = vmatpush3.bf16.msra.mxu1 %v8679_v20  ;;  %v8707_v20 = vld [vmem:[#allocation7 + $0xe4] ss:$16 sps:$4 sm:$0xff]  }
 0x33a   : > { %8157 = vmatprep.subr.bf16.mxu1 %v9204_v0 }
 0x33d   : > { %8158 = vmatpush3.bf16.msra.mxu1 %v8681_v21 }
 0x33e   : > { %8159 = vmatprep.subr.bf16.mxu1 %v9204_v0 }
 0x341   : > { %8160 = vmatpush3.bf16.msra.mxu1 %v8683_v23 }
 0x342   : > { %8161 = vmatprep.subr.bf16.mxu1 %v9204_v0 }
 0x345   : > { %8162 = vmatpush3.bf16.msra.mxu1 %v8685_v25  ;;  %v8709_v25 = vld [vmem:[#allocation7 + $0xc4] ss:$16 sps:$4 sm:$0xff]  }
 0x346   : > { %8163 = vmatprep.subr.bf16.mxu1 %v9204_v0 }
 0x349   : > { %8164 = vmatpush3.bf16.msra.mxu1 %v8687_v27 }
 0x34a   : > { %8165 = vmatprep.subr.bf16.mxu1 %v9204_v0 }
 0x34d   : > { %8166 = vmatpush3.bf16.msra.mxu1 %v8689_v29  ;;  %v8713_v29 = vld [vmem:[#allocation7 + $0x84] ss:$16 sps:$4 sm:$0xff]  }
 0x34e   : > { %8201 = vmatprep.subr.mxu1 %v9204_v0 }
 0x3f0   : > { %v1564_v31 = vpop.f32.mrf.mxu1 }
 0x3f1   : > { %v1568_v33 = vadd.f32 %v1564_v31, %v1389_v11  ;;  %v8708_v11 = vld [vmem:[#allocation7 + $0xc0] ss:$16 sps:$4 sm:$0xff]   ;;  %v8717_v31 = vld [vmem:[#allocation7 + $0x44] ss:$16 sps:$4 sm:$0xff]  }
 0x3f2   : > { %v8130_v34 = vpop.f32.mrf.mxu1 }
 0x3f3   : > { %v1576_v35 = vadd.f32 %v7251_v32, %v1568_v33  ;;  %v8718_v32 = vld [vmem:[#allocation7 + $0x20] ss:$16 sps:$4 sm:$0xff]   ;;  %v8719_v33 = vld [vmem:[#allocation7 + $0x24] ss:$16 sps:$4 sm:$0xff]  }
 0x3f4   : > { %v8720_v34 = vld [vmem:[#allocation7] ss:$16 sps:$4 sm:$0xff]  }
 0x3f5   : > { %v1577_v36 = vmax.f32 %v1576_v35, 0.0  ;;  %v8721_v35 = vld [vmem:[#allocation7 + $0x4] ss:$16 sps:$4 sm:$0xff]  }
 0x3f7   : > { %v9620_v37 = vpack.c.bf16 %v1577_v36, %v1577_v36  ;;  %v2407_v36 = vld [vmem:[%s10251_s10] sm:$0xff] }
 0x3f8   : > { %2513 = vrot.lane.b32.xlu0 %v2407_v36, %s9206_s29  ;;  %2763 = vrot.lane.b32.xlu1 %v2407_v36, %s9207_s12 }
 0x3f9   : > { %8148 = vmatmul.mubr.bf16.vlgmr.msra.gmra.mxu0 %v9620_v37  ;;  %8168 = vmatmul.mubr.bf16.vlgmr.msra.gmra.mxu1 %v9620_v37 }
 0x3fa   : > { %8173 = vmatprep.mubr.msk.f32.mxu0 %vm9205_vm0, %v9204_v0  ;;  %8203 = vmatprep.mubr.msk.f32.mxu1 %vm9205_vm0, %v9204_v0 }
 0x3fc   : > { %2942 = vrot.lane.b32.xlu0 %v2407_v36, %s9208_s26 }
 0x4b9   : > { %v1677_v39 = vpop.f32.mrf.mxu0  ;;  %v1782_v40 = vpop.f32.mrf.mxu1 }
 0x4ba   : > { %8172 = vmatpush3.msra.mxu0 %v1782_v40 }
 0x4bb   : > { %v8149_v41 = vpop.f32.mrf.mxu0  ;;  %v8169_v42 = vpop.f32.mrf.mxu1  ;;  %8174 = vmatmul.mubr.msk.f32.vlgmr.msra.gmra.mxu0 %vm1066_vm2, %v1790_v38  ;;  %8176 = vmatprep.subr.mxu0 %v9204_v0  ;;  %v7288_v38 = vld [vmem:[%s10249_s8] ss:$0 sm:$0xff] }
 0x4bc   : > { %8177 = vmatpush3.msra.mxu0 %v1677_v39  ;;  %8178 = vmatprep.mubr.msk.f32.mxu0 %vm9205_vm0, %v9204_v0 }
 0x4bd   : > { %v1680_v44 = vpop.f32.mrf.mxu0  ;;  %v1785_v45 = vpop.f32.mrf.mxu1  ;;  %8181 = vmatprep.subr.bf16.mxu0 %v9204_v0 }
 0x4be   : > { %v2514_v44 = vpop.permute.xlu0 %2513  ;;  %v8722_v45 = vld [vmem:[#allocation7 + $0xe8] ss:$16 sps:$4 sm:$0xff]  }
 0x4bf   : > { %v8150_v46 = vpop.f32.mrf.mxu0  ;;  %v8170_v47 = vpop.f32.mrf.mxu1  ;;  %8179 = vmatmul.mubr.msk.f32.vlgmr.msra.gmra.mxu0 %vm1066_vm2, %v1683_v30  ;;  %v8715_v30 = vld [vmem:[#allocation7 + $0x64] ss:$16 sps:$4 sm:$0xff]  }
 0x4c0   : > { %8182 = vmatpush3.bf16.msra.mxu0 %v8690_v43  ;;  %8197 = vmatprep.mubr.msk.bf16.mxu0 %vm9205_vm0, %v9204_v0 }
 0x4c1   : > { %8183 = vmatprep.subr.bf16.mxu0 %v9204_v0 }
 0x4c4   : > { %8184 = vmatpush3.bf16.msra.mxu0 %v8691_v48 }
 0x4c5   : > { %8185 = vmatprep.subr.bf16.mxu0 %v9204_v0 }
 0x4c8   : > { %8186 = vmatpush3.bf16.msra.mxu0 %v8692_v49 }
 0x4c9   : > { %8187 = vmatprep.subr.bf16.mxu0 %v9204_v0 }
 0x4cc   : > { %8188 = vmatpush3.bf16.msra.mxu0 %v8693_v50  ;;  %v8723_v50 = vld [vmem:[#allocation7 + $0xc8] ss:$16 sps:$4 sm:$0xff]  }
 0x4cd   : > { %8189 = vmatprep.subr.bf16.mxu0 %v9204_v0 }
 0x4d0   : > { %8190 = vmatpush3.bf16.msra.mxu0 %v8694_v51 }
 0x4d1   : > { %8191 = vmatprep.subr.bf16.mxu0 %v9204_v0 }
 0x4d4   : > { %8192 = vmatpush3.bf16.msra.mxu0 %v8695_v52 }
 0x4d5   : > { %8193 = vmatprep.subr.bf16.mxu0 %v9204_v0 }
 0x4d8   : > { %8194 = vmatpush3.bf16.msra.mxu0 %v8696_v53 }
 0x4d9   : > { %8195 = vmatprep.subr.bf16.mxu0 %v9204_v0 }
 0x4dc   : > { %8196 = vmatpush3.bf16.msra.mxu0 %v8697_v54 }
 0x4dd   : > { %8226 = vmatprep.subr.mxu0 %v9204_v0 }
 0x4df   : > { %8198 = vmatmul.mubr.bf16.vlgmr.msra.gmra.mxu0 %v9620_v37 }
 0x4e0   : > { %8228 = vmatprep.mubr.msk.f32.mxu0 %vm9205_vm0, %v9204_v0 }
 0x57b   : > { %v1859_v55 = vpop.f32.mrf.mxu0 }
 0x57d   : > { %v8175_v56 = vpop.f32.mrf.mxu0 }
 0x57e   : > { %v8725_v56 = vld [vmem:[#allocation7 + $0x88] ss:$16 sps:$4 sm:$0xff]  }
 0x57f   : > { %v1931_v57 = vpop.f32.mrf.mxu0 }
 0x580   : > { %v1932_v58 = vadd.f32 %v1931_v57, %v1859_v55  ;;  %v8724_v55 = vld [vmem:[#allocation7 + $0xa8] ss:$16 sps:$4 sm:$0xff]  }
 0x581   : > { %v8180_v59 = vpop.f32.mrf.mxu0  ;;  %v8726_v57 = vld [vmem:[#allocation7 + $0x68] ss:$16 sps:$4 sm:$0xff]  }
 0x582   : > { %v8728_v59 = vld [vmem:[#allocation7 + $0x28] ss:$16 sps:$4 sm:$0xff]  }
 0x59f   : > { %v2033_v62 = vpop.f32.mrf.mxu0 }
 0x5a0   : > { %8202 = vmatpush3.msra.mxu1 %v2033_v62 }
 0x5a1   : > { %v8199_v63 = vpop.f32.mrf.mxu0  ;;  %8204 = vmatmul.mubr.msk.f32.vlgmr.msra.gmra.mxu1 %vm1066_vm2, %v2040_v60  ;;  %8206 = vmatprep.subr.bf16.mxu1 %v9204_v0  ;;  %v8729_v60 = vld [vmem:[#allocation7 + $0x8] ss:$16 sps:$4 sm:$0xff]  }
 0x5a2   : > { %8207 = vmatpush3.bf16.msra.mxu1 %v8698_v61  ;;  %8222 = vmatprep.mubr.msk.bf16.mxu1 %vm9205_vm0, %v9204_v0 }
 0x5a3   : > { %v2036_v2 = vpop.f32.mrf.mxu0  ;;  %8208 = vmatprep.subr.bf16.mxu1 %v9204_v0 }
 0x5a5   : > { %v8200_v3 = vpop.f32.mrf.mxu0 }
 0x5a6   : > { %8209 = vmatpush3.bf16.msra.mxu1 %v8699_v1  ;;  %v2764_v3 = vpop.permute.xlu1 %2763 }
 0x5a7   : > { %8210 = vmatprep.subr.bf16.mxu1 %v9204_v0 }
 0x5aa   : > { %8211 = vmatpush3.bf16.msra.mxu1 %v8700_v4  ;;  %v8730_v4 = vld [vmem:[#allocation7 + $0xec] ss:$16 sps:$4 sm:$0xff]  }
 0x5ab   : > { %8212 = vmatprep.subr.bf16.mxu1 %v9204_v0 }
 0x5ae   : > { %8213 = vmatpush3.bf16.msra.mxu1 %v8701_v5 }
 0x5af   : > { %8214 = vmatprep.subr.bf16.mxu1 %v9204_v0 }
 0x5b2   : > { %8215 = vmatpush3.bf16.msra.mxu1 %v8702_v6 }
 0x5b3   : > { %8216 = vmatprep.subr.bf16.mxu1 %v9204_v0 }
 0x5b6   : > { %8217 = vmatpush3.bf16.msra.mxu1 %v8703_v7  ;;  %v8731_v7 = vld [vmem:[#allocation7 + $0xcc] ss:$16 sps:$4 sm:$0xff]  }
 0x5b7   : > { %8218 = vmatprep.subr.bf16.mxu1 %v9204_v0 }
 0x5ba   : > { %8219 = vmatpush3.bf16.msra.mxu1 %v8704_v8 }
 0x5bb   : > { %8220 = vmatprep.subr.bf16.mxu1 %v9204_v0 }
 0x5be   : > { %8221 = vmatpush3.bf16.msra.mxu1 %v8705_v9 }
 0x5bf   : > { %8231 = vmatprep.subr.bf16.mxu1 %v9204_v0 }
 0x5c1   : > { %8223 = vmatmul.mubr.bf16.vlgmr.msra.gmra.mxu1 %v9620_v37 }
 0x5c2   : > { %8247 = vmatprep.mubr.msk.bf16.mxu1 %vm9205_vm0, %v9204_v0  ;;  %8232 = vmatpush3.bf16.msra.mxu1 %v8706_v10  ;;  %v8732_v10 = vld [vmem:[#allocation7 + $0xac] ss:$16 sps:$4 sm:$0xff]  }
 0x5c3   : > { %8233 = vmatprep.subr.bf16.mxu1 %v9204_v0 }
 0x5c6   : > { %8234 = vmatpush3.bf16.msra.mxu1 %v8708_v11  ;;  %v8733_v11 = vld [vmem:[#allocation7 + $0x8c] ss:$16 sps:$4 sm:$0xff]  }
 0x5c7   : > { %8235 = vmatprep.subr.bf16.mxu1 %v9204_v0 }
 0x5ca   : > { %8236 = vmatpush3.bf16.msra.mxu1 %v8710_v12  ;;  %v8734_v12 = vld [vmem:[#allocation7 + $0x6c] ss:$16 sps:$4 sm:$0xff]  }
 0x5cb   : > { %8237 = vmatprep.subr.bf16.mxu1 %v9204_v0 }
 0x5ce   : > { %8238 = vmatpush3.bf16.msra.mxu1 %v8712_v13  ;;  %v8735_v13 = vld [vmem:[#allocation7 + $0x4c] ss:$16 sps:$4 sm:$0xff]  }
 0x5cf   : > { %8239 = vmatprep.subr.bf16.mxu1 %v9204_v0 }
 0x5d2   : > { %8240 = vmatpush3.bf16.msra.mxu1 %v8714_v14  ;;  %v8736_v14 = vld [vmem:[#allocation7 + $0x2c] ss:$16 sps:$4 sm:$0xff]  }
 0x5d3   : > { %8241 = vmatprep.subr.bf16.mxu1 %v9204_v0 }
 0x5d6   : > { %8242 = vmatpush3.bf16.msra.mxu1 %v8716_v15  ;;  %v8737_v15 = vld [vmem:[#allocation7 + $0xc] ss:$16 sps:$4 sm:$0xff]  }
 0x5d7   : > { %8243 = vmatprep.subr.bf16.mxu1 %v9204_v0 }
 0x5da   : > { %8244 = vmatpush3.bf16.msra.mxu1 %v8718_v32  ;;  %v8756_v32 = vld [vmem:[#allocation13 + $0x10] ss:$8 sps:$4 sm:$0xff]  }
 0x5db   : > { %8245 = vmatprep.subr.bf16.mxu1 %v9204_v0 }
 0x5de   : > { %8246 = vmatpush3.bf16.msra.mxu1 %v8720_v34  ;;  %v8759_v34 = vld [vmem:[#allocation13] ss:$8 sps:$4 sm:$0xff]  }
 0x5df   : > { %8271 = vmatprep.subr.mxu1 %v9204_v0 }
 0x661   : > { %v2109_v16 = vpop.f32.mrf.mxu1 }
 0x662   : > { %v2113_v17 = vadd.f32 %v2109_v16, %v1932_v58  ;;  %v8727_v58 = vld [vmem:[#allocation7 + $0x48] ss:$16 sps:$4 sm:$0xff]   ;;  %v8740_v16 = vld [vmem:[#allocation13 + $0x74] ss:$8 sps:$4 sm:$0xff]  }
 0x663   : > { %v8205_v18 = vpop.f32.mrf.mxu1 }
 0x664   : > { %v8743_v18 = vld [vmem:[#allocation13 + $0x64] ss:$8 sps:$4 sm:$0xff]  }
 0x681   : > { %v2212_v21 = vpop.f32.mrf.mxu1 }
 0x682   : > { %8227 = vmatpush3.msra.mxu0 %v2212_v21  ;;  %v8746_v21 = vld [vmem:[#allocation13 + $0x54] ss:$8 sps:$4 sm:$0xff]  }
 0x683   : > { %v8224_v23 = vpop.f32.mrf.mxu1  ;;  %8229 = vmatmul.mubr.msk.f32.vlgmr.msra.gmra.mxu0 %vm1066_vm2, %v2219_v19  ;;  %8251 = vmatprep.subr.bf16.mxu0 %v9204_v0  ;;  %v8741_v19 = vld [vmem:[#allocation13 + $0x60] ss:$8 sps:$4 sm:$0xff]  }
 0x684   : > { %8252 = vmatpush3.bf16.msra.mxu0 %v8707_v20  ;;  %8267 = vmatprep.mubr.msk.bf16.mxu0 %vm9205_vm0, %v9204_v0  ;;  %v9209_v20 = vmov 0   ;;  %v8744_v23 = vld [vmem:[#allocation13 + $0x50] ss:$8 sps:$4 sm:$0xff]  }
 0x685   : > { %v2215_v26 = vpop.f32.mrf.mxu1  ;;  %8253 = vmatprep.subr.bf16.mxu0 %v9204_v0 }
 0x686   : > { %v8747_v26 = vld [vmem:[#allocation13 + $0x40] ss:$8 sps:$4 sm:$0xff]  }
 0x687   : > { %v8225_v27 = vpop.f32.mrf.mxu1 }
 0x688   : > { %8254 = vmatpush3.bf16.msra.mxu0 %v8709_v25  ;;  %v8749_v25 = vld [vmem:[#allocation13 + $0x44] ss:$8 sps:$4 sm:$0xff]   ;;  %v8752_v27 = vld [vmem:[#allocation13 + $0x34] ss:$8 sps:$4 sm:$0xff]  }
 0x689   : > { %8255 = vmatprep.subr.bf16.mxu0 %v9204_v0 }
 0x68c   : > { %8256 = vmatpush3.bf16.msra.mxu0 %v8711_v28  ;;  %v8750_v28 = vld [vmem:[#allocation13 + $0x30] ss:$8 sps:$4 sm:$0xff]  }
 0x68d   : > { %8257 = vmatprep.subr.bf16.mxu0 %v9204_v0 }
 0x690   : > { %8258 = vmatpush3.bf16.msra.mxu0 %v8713_v29  ;;  %v8755_v29 = vld [vmem:[#allocation13 + $0x24] ss:$8 sps:$4 sm:$0xff]  }
 0x691   : > { %8259 = vmatprep.subr.bf16.mxu0 %v9204_v0 }
 0x694   : > { %8260 = vmatpush3.bf16.msra.mxu0 %v8715_v30  ;;  %v8753_v30 = vld [vmem:[#allocation13 + $0x20] ss:$8 sps:$4 sm:$0xff]  }
 0x695   : > { %8261 = vmatprep.subr.bf16.mxu0 %v9204_v0 }
 0x698   : > { %8262 = vmatpush3.bf16.msra.mxu0 %v8717_v31  ;;  %v8758_v31 = vld [vmem:[#allocation13 + $0x14] ss:$8 sps:$4 sm:$0xff]  }
 0x699   : > { %8263 = vmatprep.subr.bf16.mxu0 %v9204_v0 }
 0x69c   : > { %8264 = vmatpush3.bf16.msra.mxu0 %v8719_v33  ;;  %v8761_v33 = vld [vmem:[#allocation13 + $0x4] ss:$8 sps:$4 sm:$0xff]  }
 0x69d   : > { %8265 = vmatprep.subr.bf16.mxu0 %v9204_v0 }
 0x6a0   : > { %8266 = vmatpush3.bf16.msra.mxu0 %v8721_v35  ;;  %v3234_v35 = vld [vmem:[#allocation8 + $0x1c0] sm:$0xff] }
 0x6a1   : > { %8276 = vmatprep.subr.mxu0 %v9204_v0 }
 0x743   : > { %v2288_v37 = vpop.f32.mrf.mxu0 }
 0x744   : > { %v2292_v39 = vadd.f32 %v2288_v37, %v2113_v17  ;;  %v8738_v17 = vld [vmem:[#allocation13 + $0x70] ss:$8 sps:$4 sm:$0xff]  }
 0x745   : > { %v8230_v40 = vpop.f32.mrf.mxu0 }
 0x746   : > { %v2300_v41 = vadd.f32 %v7288_v38, %v2292_v39  ;;  %v3232_v39 = vld [vmem:[#allocation8 + $0x180] sm:$0xff] }
 0x747   : > { %v3233_v40 = vld [vmem:[#allocation8 + $0x1a0] sm:$0xff] }
 0x748   : > { %v2301_v42 = vmax.f32 %v2300_v41, 0.0  ;;  %v7389_v41 = vcombine.high %v3232_v39, %v3233_v40 }
 0x74a   : > { %v9691_v43 = vpack.c.bf16 %v2301_v42, %v2301_v42  ;;  %v3230_v42 = vld [vmem:[#allocation8 + $0x140] sm:$0xff] }
 0x74c   : > { %8248 = vmatmul.mubr.bf16.vlgmr.msra.gmra.mxu1 %v9691_v43  ;;  %8268 = vmatmul.mubr.bf16.vlgmr.msra.gmra.mxu0 %v9691_v43 }
 0x74d   : > { %8273 = vmatprep.mubr.msk.f32.mxu1 %vm9205_vm0, %v9204_v0  ;;  %8278 = vmatprep.mubr.msk.f32.mxu0 %vm9205_vm0, %v9204_v0 }
 0x80c   : > { %v2401_v46 = vpop.f32.mrf.mxu1  ;;  %v2506_v47 = vpop.f32.mrf.mxu0 }
 0x80d   : > { %8272 = vmatpush3.msra.mxu1 %v2506_v47  ;;  %8277 = vmatpush3.msra.mxu0 %v2401_v46  ;;  %v3228_v47 = vld [vmem:[#allocation8 + $0x100] sm:$0xff] }
 0x80e   : > { %v8249_v48 = vpop.f32.mrf.mxu1  ;;  %v8269_v49 = vpop.f32.mrf.mxu0  ;;  %8274 = vmatmul.mubr.msk.f32.vlgmr.msra.gmra.mxu1 %vm1066_vm2, %v2514_v44  ;;  %8281 = vmatprep.subr.bf16.mxu1 %v9204_v0  ;;  %v3231_v44 = vld [vmem:[#allocation8 + $0x160] sm:$0xff] }
 0x80f   : > { %8279 = vmatmul.mubr.msk.f32.vlgmr.msra.gmra.mxu0 %vm1066_vm2, %v2407_v36  ;;  %8282 = vmatpush3.bf16.msra.mxu1 %v8722_v45  ;;  %v3235_v36 = vld [vmem:[#allocation8 + $0x1e0] sm:$0xff]  ;;  %v7388_v45 = vcombine.low %v3232_v39, %v3233_v40  ;;  %v7387_v46 = vcombine.high %v3230_v42, %v3231_v44 }
 0x810   : > { %v2404_v51 = vpop.f32.mrf.mxu1  ;;  %v2509_v52 = vpop.f32.mrf.mxu0  ;;  %8283 = vmatprep.subr.bf16.mxu1 %v9204_v0  ;;  %8297 = vmatprep.mubr.msk.bf16.mxu1 %vm9205_vm0, %v9204_v0  ;;  %v7390_v37 = vcombine.low %v3234_v35, %v3235_v36  ;;  %v7391_v38 = vcombine.high %v3234_v35, %v3235_v36  ;;  %v3229_v48 = vld [vmem:[#allocation8 + $0x120] sm:$0xff] }
 0x811   : > { %8301 = vmatprep.subr.mxu0 %v9204_v0  ;;  %8303 = vmatprep.mubr.msk.f32.mxu0 %vm9205_vm0, %v9204_v0  ;;  %v7385_v49 = vcombine.high %v3228_v47, %v3229_v48  ;;  %v3227_v51 = vld [vmem:[#allocation8 + $0xe0] sm:$0xff]  ;;  %v7384_v52 = vcombine.low %v3228_v47, %v3229_v48 }
 0x812   : > { %v8250_v53 = vpop.f32.mrf.mxu1  ;;  %v8270_v54 = vpop.f32.mrf.mxu0  ;;  %v3240_v35 = vld [vmem:[#allocation10 + $0x80] sm:$0xff] }
 0x813   : > { %8284 = vmatpush3.bf16.msra.mxu1 %v8723_v50  ;;  %v3226_v50 = vld [vmem:[#allocation8 + $0xc0] sm:$0xff] }
 0x814   : > { %8285 = vmatprep.subr.bf16.mxu1 %v9204_v0  ;;  %v7383_v53 = vcombine.high %v3226_v50, %v3227_v51  ;;  %v3224_v54 = vld [vmem:[#allocation8 + $0x80] sm:$0xff] }
 0x815   : > { %v3241_v36 = vld [vmem:[#allocation10 + $0xa0] sm:$0xff] }
 0x816   : > { %v3223_v39 = vld [vmem:[#allocation8 + $0x60] sm:$0xff]  ;;  %v7348_v40 = vcombine.low %v3240_v35, %v3241_v36 }
 0x817   : > { %8286 = vmatpush3.bf16.msra.mxu1 %v8724_v55  ;;  %v3225_v55 = vld [vmem:[#allocation8 + $0xa0] sm:$0xff] }
 0x818   : > { %8287 = vmatprep.subr.bf16.mxu1 %v9204_v0  ;;  %v3220_v47 = vld [vmem:[#allocation8] sm:$0xff] }
 0x819   : > { %v3221_v48 = vld [vmem:[#allocation8 + $0x20] sm:$0xff] }
 0x81b   : > { %8288 = vmatpush3.bf16.msra.mxu1 %v8725_v56  ;;  %v7382_v56 = vcombine.low %v3226_v50, %v3227_v51  ;;  %v7377_v50 = vcombine.high %v3220_v47, %v3221_v48  ;;  %v3236_v51 = vld [vmem:[#allocation10] sm:$0xff] }
 0x81c   : > { %8289 = vmatprep.subr.bf16.mxu1 %v9204_v0 }
 0x81f   : > { %8290 = vmatpush3.bf16.msra.mxu1 %v8726_v57  ;;  %v7381_v57 = vcombine.high %v3224_v54, %v3225_v55 }
 0x820   : > { %8291 = vmatprep.subr.bf16.mxu1 %v9204_v0 }
 0x823   : > { %8292 = vmatpush3.bf16.msra.mxu1 %v8727_v58  ;;  %v7380_v58 = vcombine.low %v3224_v54, %v3225_v55  ;;  %v9746_v55 = vld [vmem:[#allocation10 + $0x1e8] sm:$0xff] }
 0x824   : > { %8293 = vmatprep.subr.bf16.mxu1 %v9204_v0 }
 0x827   : > { %8294 = vmatpush3.bf16.msra.mxu1 %v8728_v59 }
 0x828   : > { %8295 = vmatprep.subr.bf16.mxu1 %v9204_v0 }
 0x82b   : > { %8296 = vmatpush3.bf16.msra.mxu1 %v8729_v60 }
 0x82c   : > { %8326 = vmatprep.subr.mxu1 %v9204_v0 }
 0x82e   : > { %8298 = vmatmul.mubr.bf16.vlgmr.msra.gmra.mxu1 %v9691_v43 }
 0x82f   : > { %8328 = vmatprep.mubr.msk.f32.mxu1 %vm9205_vm0, %v9204_v0 }
 0x8ce   : > { %v2583_v61 = vpop.f32.mrf.mxu1 }
 0x8cf   : > { %v2655_v62 = vpop.f32.mrf.mxu0 }
 0x8d0   : > { %v9718_v63 = vadd.f32 %v2655_v62, %v2583_v61  ;;  %v8275_v1 = vpop.f32.mrf.mxu1  ;;  %v2943_v62 = vpop.permute.xlu0 %2942 }
 0x8d1   : > { %v8280_v2 = vpop.f32.mrf.mxu0 }
 0x8ee   : > { %v2757_v5 = vpop.f32.mrf.mxu1 }
 0x8ef   : > { %8302 = vmatpush3.msra.mxu0 %v2757_v5 }
 0x8f0   : > { %v8299_v6 = vpop.f32.mrf.mxu1  ;;  %8304 = vmatmul.mubr.msk.f32.vlgmr.msra.gmra.mxu0 %vm1066_vm2, %v2764_v3  ;;  %8306 = vmatprep.subr.bf16.mxu0 %v9204_v0 }
 0x8f1   : > { %8307 = vmatpush3.bf16.msra.mxu0 %v8730_v4  ;;  %8322 = vmatprep.mubr.msk.bf16.mxu0 %vm9205_vm0, %v9204_v0  ;;  %v3250_v6 = vld [vmem:[#allocation10 + $0x1c0] sm:$0xff] }
 0x8f2   : > { %v2760_v8 = vpop.f32.mrf.mxu1  ;;  %8308 = vmatprep.subr.bf16.mxu0 %v9204_v0 }
 0x8f4   : > { %v8300_v9 = vpop.f32.mrf.mxu1 }
 0x8f5   : > { %8309 = vmatpush3.bf16.msra.mxu0 %v8731_v7  ;;  %v3251_v7 = vld [vmem:[#allocation10 + $0x1e0] sm:$0xff] }
 0x8f6   : > { %8310 = vmatprep.subr.bf16.mxu0 %v9204_v0 }
 0x8f9   : > { %8311 = vmatpush3.bf16.msra.mxu0 %v8732_v10 }
 0x8fa   : > { %8312 = vmatprep.subr.bf16.mxu0 %v9204_v0 }
 0x8fd   : > { %8313 = vmatpush3.bf16.msra.mxu0 %v8733_v11 }
 0x8fe   : > { %8314 = vmatprep.subr.bf16.mxu0 %v9204_v0 }
 0x901   : > { %8315 = vmatpush3.bf16.msra.mxu0 %v8734_v12  ;;  %v3248_v12 = vld [vmem:[#allocation10 + $0x180] sm:$0xff] }
 0x902   : > { %8316 = vmatprep.subr.bf16.mxu0 %v9204_v0 }
 0x905   : > { %8317 = vmatpush3.bf16.msra.mxu0 %v8735_v13  ;;  %v3249_v13 = vld [vmem:[#allocation10 + $0x1a0] sm:$0xff] }
 0x906   : > { %8318 = vmatprep.subr.bf16.mxu0 %v9204_v0 }
 0x909   : > { %8319 = vmatpush3.bf16.msra.mxu0 %v8736_v14 }
 0x90a   : > { %8320 = vmatprep.subr.bf16.mxu0 %v9204_v0 }
 0x90d   : > { %8321 = vmatpush3.bf16.msra.mxu0 %v8737_v15 }
 0x90e   : > { %3123 = vmatprep.subr.bf16.mxu0 %v8740_v16  ;;  %v3166_v16 = vld [vmem:[%s10259_s18] sm:$0xf] }
 0x910   : > { %8323 = vmatmul.mubr.bf16.vlgmr.msra.gmra.mxu0 %v9691_v43 }
 0x911   : > { %3124 = vmatpush1.bf16.msra.mxu0 %v8738_v17  ;;  %3155 = vmatprep.mubr.bf16.mxu0 %v9209_v20  ;;  %v7358_v17 = vcombine.low %v3250_v6, %v3251_v7 }
 0x912   : > { %3125 = vmatprep.subr.bf16.mxu0 %v8743_v18  ;;  %v7357_v18 = vcombine.high %v3248_v12, %v3249_v13 }
 0x915   : > { %3126 = vmatpush1.bf16.msra.mxu0 %v8741_v19  ;;  %v3246_v19 = vld [vmem:[#allocation10 + $0x140] sm:$0xff] }
 0x916   : > { %3127 = vmatprep.subr.bf16.mxu0 %v8746_v21  ;;  %v3247_v21 = vld [vmem:[#allocation10 + $0x160] sm:$0xff] }
 0x919   : > { %3128 = vmatpush1.bf16.msra.mxu0 %v8744_v23  ;;  %v7356_v23 = vcombine.low %v3248_v12, %v3249_v13  ;;  %v3258_v13 = vld [vmem:[#allocation10 + $0x2c0] sm:$0xff] }
 0x91a   : > { %3129 = vmatprep.subr.bf16.mxu0 %v8749_v25  ;;  %v7355_v25 = vcombine.high %v3246_v19, %v3247_v21 }
 0x91d   : > { %3130 = vmatpush1.bf16.msra.mxu0 %v8747_v26  ;;  %v3244_v26 = vld [vmem:[#allocation10 + $0x100] sm:$0xff] }
 0x91e   : > { %3131 = vmatprep.subr.bf16.mxu0 %v8752_v27  ;;  %v3245_v27 = vld [vmem:[#allocation10 + $0x120] sm:$0xff] }
 0x921   : > { %3132 = vmatpush1.bf16.msra.mxu0 %v8750_v28  ;;  %v7354_v28 = vcombine.low %v3246_v19, %v3247_v21 }
 0x922   : > { %3133 = vmatprep.subr.bf16.mxu0 %v8755_v29  ;;  %v7353_v29 = vcombine.high %v3244_v26, %v3245_v27 }
 0x925   : > { %3134 = vmatpush1.bf16.msra.mxu0 %v8753_v30  ;;  %v3242_v30 = vld [vmem:[#allocation10 + $0xc0] sm:$0xff] }
 0x926   : > { %3135 = vmatprep.subr.bf16.mxu0 %v8758_v31  ;;  %v3243_v31 = vld [vmem:[#allocation10 + $0xe0] sm:$0xff] }
 0x929   : > { %3136 = vmatpush1.bf16.msra.mxu0 %v8756_v32  ;;  %v7352_v32 = vcombine.low %v3244_v26, %v3245_v27 }
 0x92a   : > { %3137 = vmatprep.subr.bf16.mxu0 %v8761_v33  ;;  %v7351_v33 = vcombine.high %v3242_v30, %v3243_v31 }
 0x92d   : > { %3138 = vmatpush1.bf16.msra.mxu0 %v8759_v34  ;;  %v7350_v34 = vcombine.low %v3242_v30, %v3243_v31 }
 0x92e   : > { %3549 = vmatprep.subr.bf16.mxu0 %v7391_v38  ;;  %v7349_v38 = vcombine.high %v3240_v35, %v3241_v36  ;;  %v9763_v36 = vld [vmem:[%s10255_s14] sm:$0xff] }
 0x92f   : > { %3964 = vrot.lane.b32.xlu1 %v9763_v36, %s9206_s29 }
 0x930   : > { %3156 = vmatmul.mubr.bf16.vlgmr.msra.gmra.mxu0 %v9691_v43  ;;  %v7386_v43 = vcombine.low %v3230_v42, %v3231_v44  ;;  %v3238_v44 = vld [vmem:[#allocation10 + $0x40] sm:$0xff] }
 0x931   : > { %3581 = vmatprep.mubr.bf16.mxu0 %v9209_v20  ;;  %3550 = vmatpush1.bf16.msra.mxu0 %v7390_v37  ;;  %v3222_v37 = vld [vmem:[#allocation8 + $0x40] sm:$0xff] }
 0x932   : > { %3551 = vmatprep.subr.bf16.mxu0 %v7389_v41  ;;  %v7378_v41 = vcombine.low %v3222_v37, %v3223_v39  ;;  %v7379_v42 = vcombine.high %v3222_v37, %v3223_v39  ;;  %v9768_v37 = vld [vmem:[%s10255_s14 + $0x8] sm:$0xff]  ;;  %v7325_v39 = vld [vmem:[%s10252_s11] ss:$0 sm:$0xff] }
 0x933   : > { %3966 = vrot.lane.b32.xlu0 %v9768_v37, %s9206_s29  ;;  %4500 = vrot.lane.b32.xlu1 %v9763_v36, %s9207_s12  ;;  %s9210_s29 = smov 32  }
 0x935   : > { %3552 = vmatpush1.bf16.msra.mxu0 %v7388_v45  ;;  %v3239_v45 = vld [vmem:[#allocation10 + $0x60] sm:$0xff] }
 0x936   : > { %3553 = vmatprep.subr.bf16.mxu0 %v7387_v46  ;;  %v7347_v46 = vcombine.high %v3238_v44, %v3239_v45 }
 0x937   : > { %4502 = vrot.lane.b32.xlu0 %v9768_v37, %s9207_s12  ;;  %4959 = vrot.lane.b32.xlu1 %v9763_v36, %s9208_s26 }
 0x939   : > { %3554 = vmatpush1.bf16.msra.mxu0 %v7386_v43  ;;  %v7346_v43 = vcombine.low %v3238_v44, %v3239_v45  ;;  %v3620_v44 = vld [vmem:[#allocation10 + $0x188] sm:$0xff] }
 0x93a   : > { %3555 = vmatprep.subr.bf16.mxu0 %v7385_v49  ;;  %v7376_v49 = vcombine.low %v3220_v47, %v3221_v48  ;;  %v3621_v45 = vld [vmem:[#allocation10 + $0x1a8] sm:$0xff] }
 0x93b   : > { %4961 = vrot.lane.b32.xlu0 %v9768_v37, %s9208_s26  ;;  %v7405_v48 = vcombine.high %v3620_v44, %v3621_v45  ;;  %s9211_s26 = smov 64  }
 0x93d   : > { %3556 = vmatpush1.bf16.msra.mxu0 %v7384_v52  ;;  %v3237_v52 = vld [vmem:[#allocation10 + $0x20] sm:$0xff] }
 0x93e   : > { %3557 = vmatprep.subr.bf16.mxu0 %v7383_v53  ;;  %v9744_v53 = vld [vmem:[#allocation10 + $0x1c8] sm:$0xff]  ;;  %v7345_v54 = vcombine.high %v3236_v51, %v3237_v52 }
 0x941   : > { %3558 = vmatpush1.bf16.msra.mxu0 %v7382_v56  ;;  %v7344_v56 = vcombine.low %v3236_v51, %v3237_v52  ;;  %v3617_v52 = vld [vmem:[#allocation10 + $0x128] sm:$0xff] }
 0x942   : > { %3559 = vmatprep.subr.bf16.mxu0 %v7381_v57  ;;  %v7406_v57 = vcombine.low %v9744_v53, %v9746_v55 }
 0x945   : > { %3560 = vmatpush1.bf16.msra.mxu0 %v7380_v58  ;;  %v7407_v58 = vcombine.high %v9744_v53, %v9746_v55 }
 0x946   : > { %3561 = vmatprep.subr.bf16.mxu0 %v7379_v42 }
 0x949   : > { %3562 = vmatpush1.bf16.msra.mxu0 %v7378_v41 }
 0x94a   : > { %3563 = vmatprep.subr.bf16.mxu0 %v7377_v50  ;;  %v7404_v50 = vcombine.low %v3620_v44, %v3621_v45 }
 0x94d   : > { %3564 = vmatpush1.bf16.msra.mxu0 %v7376_v49  ;;  %v3619_v49 = vld [vmem:[#allocation10 + $0x168] sm:$0xff] }
 0x94e   : > { %3800 = vmatprep.subr.bf16.mxu0 %v7407_v58  ;;  %v3614_v58 = vld [vmem:[#allocation10 + $0xc8] sm:$0xff] }
 0x9b0   : > { %v2833_v59 = vpop.f32.mrf.mxu0 }
 0x9b1   : > { %v9736_v60 = vadd.f32 %v2833_v59, %v9718_v63  ;;  %v7359_v63 = vcombine.high %v3250_v6, %v3251_v7  ;;  %v3266_v59 = vld [vmem:[#allocation10 + $0x3c0] sm:$0xff] }
 0x9b2   : > { %v8305_v61 = vpop.f32.mrf.mxu0  ;;  %v3262_v6 = vld [vmem:[#allocation10 + $0x340] sm:$0xff] }
 0x9b3   : > { %v3267_v61 = vld [vmem:[#allocation10 + $0x3e0] sm:$0xff] }
 0x9b4   : > { %v3263_v7 = vld [vmem:[#allocation10 + $0x360] sm:$0xff] }
 0x9d0   : > { %v2936_v1 = vpop.f32.mrf.mxu0 }
 0x9d1   : > { %8327 = vmatpush3.msra.mxu1 %v2936_v1  ;;  %v7375_v1 = vcombine.high %v3266_v59, %v3267_v61 }
 0x9d2   : > { %v8324_v2 = vpop.f32.mrf.mxu0  ;;  %8329 = vmatmul.mubr.msk.f32.vlgmr.msra.gmra.mxu1 %vm1066_vm2, %v2943_v62  ;;  %v7374_v62 = vcombine.low %v3266_v59, %v3267_v61  ;;  %v3615_v59 = vld [vmem:[#allocation10 + $0xe8] sm:$0xff] }
 0x9d3   : > { %3209 = vmatprep.mubr.bf16.mxu1 %v9209_v20  ;;  %v3264_v2 = vld [vmem:[#allocation10 + $0x380] sm:$0xff]  ;;  %v7398_v53 = vcombine.low %v3614_v58, %v3615_v59 }
 0x9d4   : > { %v2939_v3 = vpop.f32.mrf.mxu0 }
 0x9d5   : > { %v3265_v3 = vld [vmem:[#allocation10 + $0x3a0] sm:$0xff] }
 0x9d6   : > { %v8325_v4 = vpop.f32.mrf.mxu0 }
 0x9d7   : > { %v7372_v4 = vcombine.low %v3264_v2, %v3265_v3 }
 0x9f0   : > { %v3157_v5 = vpop.f32.mrf.mxu0 }
 0x9f1   : > { %v3164_v8 = vpack.c.bf16 %v3157_v5, %v3157_v5  ;;  %v7373_v5 = vcombine.high %v3264_v2, %v3265_v3  ;;  %v3613_v2 = vld [vmem:[#allocation10 + $0xa8] sm:$0xff] }
 0x9f2   : > { %v3159_v9 = vpop.f32.mrf.mxu0  ;;  %v3611_v3 = vld [vmem:[#allocation10 + $0x68] sm:$0xff] }
 0x9f3   : > { %v3165_v10 = vpack.c.bf16 %v3159_v9, %v3159_v9  ;;  %v3172_v14 = vsel %vm3170_vm3, %v3164_v8, 0  ;;  %v7370_v8 = vcombine.low %v3262_v6, %v3263_v7  ;;  %v7371_v9 = vcombine.high %v3262_v6, %v3263_v7  ;;  %v3608_v6 = vld [vmem:[#allocation10 + $0x8] sm:$0xff] }
 0x9f4   : > { %v3161_v11 = vpop.f32.mrf.mxu0  ;;  %v3609_v7 = vld [vmem:[#allocation10 + $0x28] sm:$0xff] }
 0x9f5   : > { %7342 = vmatprep.subr.msk.bf16.mxu1 %vm3170_vm3, %v3165_v10  ;;  %v3260_v10 = vld [vmem:[#allocation10 + $0x300] sm:$0xff] }
 0x9f6   : > { %v3162_v15 = vpop.f32.mrf.mxu0  ;;  %3192 = vmatpush1.bf16.msra.mxu1 %v3172_v14  ;;  %v3259_v14 = vld [vmem:[#allocation10 + $0x2e0] sm:$0xff] }
 0x9f7   : > { %3428 = vmatprep.subr.bf16.mxu1 %v7359_v63  ;;  %v3261_v63 = vld [vmem:[#allocation10 + $0x320] sm:$0xff]  ;;  %v7366_v15 = vcombine.low %v3258_v13, %v3259_v14 }
 0x9f8   : > { %v7368_v11 = vcombine.low %v3260_v10, %v3261_v63  ;;  %v7369_v12 = vcombine.high %v3260_v10, %v3261_v63  ;;  %v3638_v10 = vld [vmem:[#allocation10 + $0x3c8] sm:$0xff] }
 0x9f9   : > { %7343 = vmatmul.mubr.msk.bf16.vlgmr.msra.gmra.mxu1 %vm1066_vm2, %v3166_v16  ;;  %v7367_v16 = vcombine.high %v3258_v13, %v3259_v14  ;;  %v3639_v63 = vld [vmem:[#allocation10 + $0x3e8] sm:$0xff] }
 0x9fa   : > { %3429 = vmatpush1.bf16.msra.mxu1 %v7358_v17  ;;  %v3256_v17 = vld [vmem:[#allocation10 + $0x280] sm:$0xff]  ;;  %v3636_v13 = vld [vmem:[#allocation10 + $0x388] sm:$0xff] }
 0x9fb   : > { %3430 = vmatprep.subr.bf16.mxu1 %v7357_v18  ;;  %v3257_v18 = vld [vmem:[#allocation10 + $0x2a0] sm:$0xff]  ;;  %v3637_v14 = vld [vmem:[#allocation10 + $0x3a8] sm:$0xff] }
 0x9fc   : > { %v7364_v19 = vcombine.low %v3256_v17, %v3257_v18  ;;  %v7365_v21 = vcombine.high %v3256_v17, %v3257_v18  ;;  %v7421_v17 = vcombine.high %v3636_v13, %v3637_v14  ;;  %v3634_v18 = vld [vmem:[#allocation10 + $0x348] sm:$0xff] }
 0x9fe   : > { %3431 = vmatpush1.bf16.msra.mxu1 %v7356_v23  ;;  %v3254_v23 = vld [vmem:[#allocation10 + $0x240] sm:$0xff] }
 0x9ff   : > { %3432 = vmatprep.subr.bf16.mxu1 %v7355_v25  ;;  %v3255_v25 = vld [vmem:[#allocation10 + $0x260] sm:$0xff] }
 0xa00   : > { %v7362_v26 = vcombine.low %v3254_v23, %v3255_v25  ;;  %v7363_v27 = vcombine.high %v3254_v23, %v3255_v25  ;;  %v3605_v23 = vld [vmem:[#allocation8 + $0x1a8] sm:$0xff] }
 0xa02   : > { %3433 = vmatpush1.bf16.msra.mxu1 %v7354_v28  ;;  %v3252_v28 = vld [vmem:[#allocation10 + $0x200] sm:$0xff] }
 0xa03   : > { %3434 = vmatprep.subr.bf16.mxu1 %v7353_v29  ;;  %v3253_v29 = vld [vmem:[#allocation10 + $0x220] sm:$0xff] }
 0xa04   : > { %v7361_v30 = vcombine.high %v3252_v28, %v3253_v29  ;;  %v7360_v31 = vcombine.low %v3252_v28, %v3253_v29 }
 0xa06   : > { %3435 = vmatpush1.bf16.msra.mxu1 %v7352_v32  ;;  %v9752_v32 = vld [vmem:[#allocation8 + $0x1c8] sm:$0xff] }
 0xa07   : > { %3436 = vmatprep.subr.bf16.mxu1 %v7351_v33  ;;  %v9754_v33 = vld [vmem:[#allocation8 + $0x1e8] sm:$0xff] }
 0xa08   : > { %v7439_v35 = vcombine.high %v9752_v32, %v9754_v33 }
 0xa0a   : > { %3437 = vmatpush1.bf16.msra.mxu1 %v7350_v34  ;;  %v7438_v34 = vcombine.low %v9752_v32, %v9754_v33 }
 0xa0b   : > { %3438 = vmatprep.subr.bf16.mxu1 %v7349_v38 }
 0xa0e   : > { %3439 = vmatpush1.bf16.msra.mxu1 %v7348_v40 }
 0xa0f   : > { %3440 = vmatprep.subr.bf16.mxu1 %v7347_v46 }
 0xa12   : > { %3441 = vmatpush1.bf16.msra.mxu1 %v7346_v43  ;;  %v3618_v43 = vld [vmem:[#allocation10 + $0x148] sm:$0xff] }
 0xa13   : > { %3442 = vmatprep.subr.bf16.mxu1 %v7345_v54  ;;  %v7403_v51 = vcombine.high %v3618_v43, %v3619_v49  ;;  %v7402_v54 = vcombine.low %v3618_v43, %v3619_v49  ;;  %v3631_v43 = vld [vmem:[#allocation10 + $0x2e8] sm:$0xff] }
 0xa14   : > { %v3600_v49 = vld [vmem:[#allocation8 + $0x108] sm:$0xff] }
 0xa16   : > { %3443 = vmatpush1.bf16.msra.mxu1 %v7344_v56 }
 0xa17   : > { %3444 = vmatprep.subr.bf16.mxu1 %v7375_v1  ;;  %v3612_v1 = vld [vmem:[#allocation10 + $0x88] sm:$0xff] }
 0xa18   : > { %v7397_v55 = vcombine.high %v3612_v1, %v3613_v2 }
 0xa1a   : > { %3445 = vmatpush2.bf16.msra.mxu1 %v7374_v62  ;;  %v7399_v62 = vcombine.high %v3614_v58, %v3615_v59 }
 0xa1b   : > { %3446 = vmatprep.subr.bf16.mxu1 %v7373_v5 }
 0xa1e   : > { %3447 = vmatpush2.bf16.msra.mxu1 %v7372_v4  ;;  %v7396_v4 = vcombine.low %v3612_v1, %v3613_v2  ;;  %v3626_v1 = vld [vmem:[#allocation10 + $0x248] sm:$0xff] }
 0xa1f   : > { %3448 = vmatprep.subr.bf16.mxu1 %v7371_v9  ;;  %v7393_v9 = vcombine.high %v3608_v6, %v3609_v7  ;;  %v3627_v2 = vld [vmem:[#allocation10 + $0x268] sm:$0xff] }
 0xa22   : > { %3449 = vmatpush2.bf16.msra.mxu1 %v7370_v8 }
 0xa23   : > { %3450 = vmatprep.subr.bf16.mxu1 %v7369_v12  ;;  %v7423_v12 = vcombine.high %v3638_v10, %v3639_v63 }
 0xa26   : > { %3451 = vmatpush2.bf16.msra.mxu1 %v7368_v11  ;;  %v7392_v11 = vcombine.low %v3608_v6, %v3609_v7  ;;  %v3624_v6 = vld [vmem:[#allocation10 + $0x208] sm:$0xff] }
 0xa27   : > { %3452 = vmatprep.subr.bf16.mxu1 %v7367_v16  ;;  %v3625_v7 = vld [vmem:[#allocation10 + $0x228] sm:$0xff] }
 0xa2a   : > { %3453 = vmatpush2.bf16.msra.mxu1 %v7366_v15  ;;  %v7422_v15 = vcombine.low %v3638_v10, %v3639_v63  ;;  %v7410_v10 = vcombine.low %v3626_v1, %v3627_v2 }
 0xa2b   : > { %3454 = vmatprep.subr.bf16.mxu1 %v7365_v21  ;;  %v3604_v21 = vld [vmem:[#allocation8 + $0x188] sm:$0xff] }
 0xa2c   : > { %v7436_v44 = vcombine.low %v3604_v21, %v3605_v23 }
 0xa2e   : > { %3455 = vmatpush2.bf16.msra.mxu1 %v7364_v19  ;;  %v3635_v19 = vld [vmem:[#allocation10 + $0x368] sm:$0xff] }
 0xa2f   : > { %3456 = vmatprep.subr.bf16.mxu1 %v7363_v27  ;;  %v7420_v27 = vcombine.low %v3636_v13, %v3637_v14  ;;  %v3592_v13 = vld [vmem:[#allocation8 + $0x8] sm:$0xff] }
 0xa30   : > { %v3593_v14 = vld [vmem:[#allocation8 + $0x28] sm:$0xff] }
 0xa32   : > { %3457 = vmatpush2.bf16.msra.mxu1 %v7362_v26 }
 0xa33   : > { %3458 = vmatprep.subr.bf16.mxu1 %v7361_v30  ;;  %v7419_v30 = vcombine.high %v3634_v18, %v3635_v19 }
 0xa36   : > { %3459 = vmatpush2.bf16.msra.mxu1 %v7360_v31  ;;  %v7437_v31 = vcombine.high %v3604_v21, %v3605_v23  ;;  %v4142_v23 = vld [vmem:[#allocation8 + $0x190] sm:$0xff] }
 0xa37   : > { %3921 = vmatprep.subr.bf16.mxu1 %v7439_v35  ;;  %v3632_v35 = vld [vmem:[#allocation10 + $0x308] sm:$0xff] }
 0xa92   : > { %v3012_v38 = vpop.f32.mrf.mxu1 }
 0xa93   : > { %v3016_v40 = vadd.f32 %v3012_v38, %v9736_v60  ;;  %v3616_v60 = vld [vmem:[#allocation10 + $0x108] sm:$0xff] }
 0xa94   : > { %v8330_v41 = vpop.f32.mrf.mxu1  ;;  %v7401_v56 = vcombine.high %v3616_v60, %v3617_v52  ;;  %v7400_v61 = vcombine.low %v3616_v60, %v3617_v52  ;;  %v3633_v38 = vld [vmem:[#allocation10 + $0x328] sm:$0xff] }
 0xa95   : > { %v3024_v42 = vadd.f32 %v7325_v39, %v3016_v40  ;;  %v3602_v39 = vld [vmem:[#allocation8 + $0x148] sm:$0xff]  ;;  %v7417_v45 = vcombine.high %v3632_v35, %v3633_v38 }
 0xa96   : > { %v3603_v40 = vld [vmem:[#allocation8 + $0x168] sm:$0xff] }
 0xa97   : > { %v3025_v46 = vmax.f32 %v3024_v42, 0.0  ;;  %v7418_v42 = vcombine.low %v3634_v18, %v3635_v19  ;;  %v7434_v60 = vcombine.low %v3602_v39, %v3603_v40  ;;  %v3629_v52 = vld [vmem:[#allocation10 + $0x2a8] sm:$0xff]  ;;  %v7425_v19 = vcombine.high %v3592_v13, %v3593_v14 }
 0xa99   : > { %v9786_v47 = vpack.c.bf16 %v3025_v46, %v3025_v46  ;;  %v7435_v46 = vcombine.high %v3602_v39, %v3603_v40  ;;  %v4138_v40 = vld [vmem:[#allocation8 + $0x110] sm:$0xff] }
 0xa9b   : > { %3582 = vmatmul.mubr.bf16.vlgmr.msra.gmra.mxu0 %v9786_v47 }
 0xa9c   : > { %3801 = vmatpush1.bf16.msra.mxu0 %v7406_v57  ;;  %v3610_v57 = vld [vmem:[#allocation10 + $0x48] sm:$0xff] }
 0xa9d   : > { %3802 = vmatprep.subr.bf16.mxu0 %v7405_v48  ;;  %v7395_v5 = vcombine.high %v3610_v57, %v3611_v3  ;;  %v7394_v8 = vcombine.low %v3610_v57, %v3611_v3  ;;  %v3630_v48 = vld [vmem:[#allocation10 + $0x2c8] sm:$0xff] }
 0xa9e   : > { %v7415_v32 = vcombine.high %v3630_v48, %v3631_v43  ;;  %v7414_v58 = vcombine.low %v3630_v48, %v3631_v43 }
 0xaa0   : > { %3803 = vmatpush1.bf16.msra.mxu0 %v7404_v50  ;;  %v3601_v50 = vld [vmem:[#allocation8 + $0x128] sm:$0xff] }
 0xaa1   : > { %3804 = vmatprep.subr.bf16.mxu0 %v7403_v51  ;;  %v7416_v51 = vcombine.low %v3632_v35, %v3633_v38  ;;  %v7433_v33 = vcombine.high %v3600_v49, %v3601_v50  ;;  %v7432_v59 = vcombine.low %v3600_v49, %v3601_v50  ;;  %v4141_v35 = vld [vmem:[#allocation8 + $0x170] sm:$0xff] }
 0xaa2   : > { %v4134_v49 = vld [vmem:[#allocation8 + $0x90] sm:$0xff] }
 0xaa3   : > { %v4135_v50 = vld [vmem:[#allocation8 + $0xb0] sm:$0xff] }
 0xaa4   : > { %3805 = vmatpush1.bf16.msra.mxu0 %v7402_v54  ;;  %v3598_v54 = vld [vmem:[#allocation8 + $0xc8] sm:$0xff] }
 0xaa5   : > { %3806 = vmatprep.subr.bf16.mxu0 %v7401_v56  ;;  %v3599_v56 = vld [vmem:[#allocation8 + $0xe8] sm:$0xff] }
 0xaa6   : > { %v7430_v3 = vcombine.low %v3598_v54, %v3599_v56 }
 0xaa8   : > { %3807 = vmatpush1.bf16.msra.mxu0 %v7400_v61 }
 0xaa9   : > { %3808 = vmatprep.subr.bf16.mxu0 %v7399_v62  ;;  %v7431_v62 = vcombine.high %v3598_v54, %v3599_v56  ;;  %v4130_v54 = vld [vmem:[#allocation8 + $0x10] sm:$0xff] }
 0xaaa   : > { %v4131_v56 = vld [vmem:[#allocation8 + $0x30] sm:$0xff] }
 0xaac   : > { %3809 = vmatpush1.bf16.msra.mxu0 %v7398_v53  ;;  %v3596_v53 = vld [vmem:[#allocation8 + $0x88] sm:$0xff] }
 0xaad   : > { %3810 = vmatprep.subr.bf16.mxu0 %v7397_v55  ;;  %v3597_v55 = vld [vmem:[#allocation8 + $0xa8] sm:$0xff] }
 0xaae   : > { %v7428_v63 = vcombine.low %v3596_v53, %v3597_v55 }
 0xab0   : > { %3811 = vmatpush1.bf16.msra.mxu0 %v7396_v4  ;;  %v7411_v4 = vcombine.high %v3626_v1, %v3627_v2 }
 0xab1   : > { %3812 = vmatprep.subr.bf16.mxu0 %v7395_v5  ;;  %v7429_v5 = vcombine.high %v3596_v53, %v3597_v55 }
 0xab4   : > { %3813 = vmatpush1.bf16.msra.mxu0 %v7394_v8  ;;  %v3594_v8 = vld [vmem:[#allocation8 + $0x48] sm:$0xff] }
 0xab5   : > { %3814 = vmatprep.subr.bf16.mxu0 %v7393_v9  ;;  %v3595_v9 = vld [vmem:[#allocation8 + $0x68] sm:$0xff] }
 0xab6   : > { %v7426_v18 = vcombine.low %v3594_v8, %v3595_v9 }
 0xab8   : > { %3815 = vmatpush1.bf16.msra.mxu0 %v7392_v11  ;;  %v7409_v11 = vcombine.high %v3624_v6, %v3625_v7 }
 0xab9   : > { %v3211_v16 = vpop.f32.mrf.mxu1  ;;  %3816 = vmatprep.subr.bf16.mxu0 %v7423_v12  ;;  %v7427_v12 = vcombine.high %v3594_v8, %v3595_v9 }
 0xaba   : > { %v9794_v28 = vpack.c.bf16 %v3211_v16, %v3211_v16  ;;  %v4145_v16 = vld [vmem:[#allocation8 + $0x1f0] sm:$0xff] }
 0xabb   : > { %v3213_v25 = vpop.f32.mrf.mxu1 }
 0xabc   : > { %v9792_v26 = vpack.c.bf16 %v3213_v25, %v3213_v25  ;;  %3817 = vmatpush2.bf16.msra.mxu0 %v7422_v15  ;;  %v4144_v15 = vld [vmem:[#allocation8 + $0x1d0] sm:$0xff] }
 0xabd   : > { %v3215_v29 = vpop.f32.mrf.mxu1  ;;  %3818 = vmatprep.subr.bf16.mxu0 %v7421_v17  ;;  %v7408_v17 = vcombine.low %v3624_v6, %v3625_v7  ;;  %v7491_v21 = vcombine.high %v4144_v15, %v4145_v16  ;;  %v4143_v25 = vld [vmem:[#allocation8 + $0x1b0] sm:$0xff] }
 0xabe   : > { %3460 = vmatprep.mubr.bf16.mxu1 %v9792_v26  ;;  %3832 = vmatprep.mubr.bf16.mxu0 %v9792_v26  ;;  %v7490_v29 = vcombine.low %v4144_v15, %v4145_v16  ;;  %v7488_v38 = vcombine.low %v4142_v23, %v4143_v25  ;;  %v3965_v15 = vpop.permute.xlu1 %3964 }
 0xabf   : > { %v3216_v41 = vpop.f32.mrf.mxu1  ;;  %3461 = vmatmul.mubr.bf16.vlgmr.msra.gmra.mxu1 %v9794_v28 }
 0xac0   : > { %3819 = vmatpush2.bf16.msra.mxu0 %v7420_v27  ;;  %3922 = vmatpush1.bf16.msra.mxu1 %v7438_v34  ;;  %v3628_v34 = vld [vmem:[#allocation10 + $0x288] sm:$0xff]  ;;  %v7424_v27 = vcombine.low %v3592_v13, %v3593_v14  ;;  %v4139_v41 = vld [vmem:[#allocation8 + $0x130] sm:$0xff] }
 0xac1   : > { %3820 = vmatprep.subr.bf16.mxu0 %v7419_v30  ;;  %3923 = vmatprep.subr.bf16.mxu1 %v7437_v31  ;;  %v7413_v61 = vcombine.high %v3628_v34, %v3629_v52  ;;  %v7412_v57 = vcombine.low %v3628_v34, %v3629_v52  ;;  %v7489_v30 = vcombine.high %v4142_v23, %v4143_v25  ;;  %v4140_v31 = vld [vmem:[#allocation8 + $0x150] sm:$0xff] }
 0xac2   : > { %3953 = vmatprep.mubr.bf16.mxu1 %v9209_v20  ;;  %v7487_v39 = vcombine.high %v4140_v31, %v4141_v35  ;;  %v7484_v48 = vcombine.low %v4138_v40, %v4139_v41  ;;  %v7480_v34 = vcombine.low %v4134_v49, %v4135_v50  ;;  %v4158_v23 = vld [vmem:[#allocation10 + $0x190] sm:$0xff] }
 0xac3   : > { %v4159_v25 = vld [vmem:[#allocation10 + $0x1b0] sm:$0xff] }
 0xac4   : > { %3821 = vmatpush2.bf16.msra.mxu0 %v7418_v42  ;;  %3924 = vmatpush1.bf16.msra.mxu1 %v7436_v44  ;;  %v7486_v42 = vcombine.low %v4140_v31, %v4141_v35  ;;  %v7485_v44 = vcombine.high %v4138_v40, %v4139_v41  ;;  %v4157_v31 = vld [vmem:[#allocation10 + $0x170] sm:$0xff]  ;;  %v7456_v35 = vcombine.low %v4158_v23, %v4159_v25 }
 0xac5   : > { %3822 = vmatprep.subr.bf16.mxu0 %v7417_v45  ;;  %3925 = vmatprep.subr.bf16.mxu1 %v7435_v46  ;;  %v4136_v45 = vld [vmem:[#allocation8 + $0xd0] sm:$0xff] }
 0xac6   : > { %v4137_v46 = vld [vmem:[#allocation8 + $0xf0] sm:$0xff] }
 0xac7   : > { %v7483_v43 = vcombine.high %v4136_v45, %v4137_v46  ;;  %v4155_v40 = vld [vmem:[#allocation10 + $0x130] sm:$0xff] }
 0xac8   : > { %3823 = vmatpush2.bf16.msra.mxu0 %v7416_v51  ;;  %3926 = vmatpush1.bf16.msra.mxu1 %v7434_v60  ;;  %v7482_v51 = vcombine.low %v4136_v45, %v4137_v46  ;;  %v7481_v60 = vcombine.high %v4134_v49, %v4135_v50  ;;  %v4153_v45 = vld [vmem:[#allocation10 + $0xf0] sm:$0xff] }
 0xac9   : > { %3824 = vmatprep.subr.bf16.mxu0 %v7415_v32  ;;  %3927 = vmatprep.subr.bf16.mxu1 %v7433_v33  ;;  %v4132_v32 = vld [vmem:[#allocation8 + $0x50] sm:$0xff] }
 0xaca   : > { %v4133_v33 = vld [vmem:[#allocation8 + $0x70] sm:$0xff] }
 0xacb   : > { %v7479_v52 = vcombine.high %v4132_v32, %v4133_v33 }
 0xacc   : > { %3825 = vmatpush2.bf16.msra.mxu0 %v7414_v58  ;;  %3928 = vmatpush1.bf16.msra.mxu1 %v7432_v59  ;;  %v7478_v58 = vcombine.low %v4132_v32, %v4133_v33  ;;  %v7477_v59 = vcombine.high %v4130_v54, %v4131_v56  ;;  %v4149_v32 = vld [vmem:[#allocation10 + $0x70] sm:$0xff] }
 0xacd   : > { %3826 = vmatprep.subr.bf16.mxu0 %v7413_v61  ;;  %3929 = vmatprep.subr.bf16.mxu1 %v7431_v62  ;;  %v7476_v61 = vcombine.low %v4130_v54, %v4131_v56  ;;  %v4146_v56 = vld [vmem:[#allocation10 + $0x10] sm:$0xff] }
 0xad0   : > { %3827 = vmatpush2.bf16.msra.mxu0 %v7412_v57  ;;  %3930 = vmatpush1.bf16.msra.mxu1 %v7430_v3 }
 0xad1   : > { %3828 = vmatprep.subr.bf16.mxu0 %v7411_v4  ;;  %3931 = vmatprep.subr.bf16.mxu1 %v7429_v5 }
 0xad4   : > { %3829 = vmatpush2.bf16.msra.mxu0 %v7410_v10  ;;  %3932 = vmatpush1.bf16.msra.mxu1 %v7428_v63  ;;  %v4160_v63 = vld [vmem:[#allocation10 + $0x1d0] sm:$0xff] }
 0xad5   : > { %3830 = vmatprep.subr.bf16.mxu0 %v7409_v11  ;;  %3933 = vmatprep.subr.bf16.mxu1 %v7427_v12  ;;  %v4161_v11 = vld [vmem:[#allocation10 + $0x1f0] sm:$0xff] }
 0xad8   : > { %3831 = vmatpush2.bf16.msra.mxu0 %v7408_v17  ;;  %3934 = vmatpush1.bf16.msra.mxu1 %v7426_v18  ;;  %v7459_v17 = vcombine.high %v4160_v63, %v4161_v11 }
 0xad9   : > { %3935 = vmatprep.subr.bf16.mxu1 %v7425_v19  ;;  %4459 = vmatprep.subr.bf16.mxu0 %v7491_v21  ;;  %v3967_v21 = vpop.permute.xlu0 %3966 }
 0xadb   : > { %3833 = vmatmul.mubr.bf16.vlgmr.msra.gmra.mxu0 %v9794_v28 }
 0xadc   : > { %3936 = vmatpush1.bf16.msra.mxu1 %v7424_v27  ;;  %4460 = vmatpush1.bf16.msra.mxu0 %v7490_v29  ;;  %v7458_v27 = vcombine.low %v4160_v63, %v4161_v11  ;;  %v7457_v29 = vcombine.high %v4158_v23, %v4159_v25  ;;  %v4165_v23 = vld [vmem:[#allocation10 + $0x270] sm:$0xff] }
 0xadd   : > { %4461 = vmatprep.subr.bf16.mxu0 %v7489_v30  ;;  %4491 = vmatprep.mubr.bf16.mxu0 %v9209_v20  ;;  %v4156_v30 = vld [vmem:[#allocation10 + $0x150] sm:$0xff] }
 0xade   : > { %v7454_v41 = vcombine.low %v4156_v30, %v4157_v31 }
 0xadf   : > { %3954 = vmatmul.mubr.bf16.vlgmr.msra.gmra.mxu1 %v9786_v47 }
 0xae0   : > { %4462 = vmatpush1.bf16.msra.mxu0 %v7488_v38  ;;  %4036 = vmatprep.mubr.f32.mxu1 %v9204_v0  ;;  %v7455_v38 = vcombine.high %v4156_v30, %v4157_v31  ;;  %v4163_v30 = vld [vmem:[#allocation10 + $0x230] sm:$0xff] }
 0xae1   : > { %4463 = vmatprep.subr.bf16.mxu0 %v7487_v39  ;;  %v4154_v39 = vld [vmem:[#allocation10 + $0x110] sm:$0xff] }
 0xae4   : > { %4464 = vmatpush1.bf16.msra.mxu0 %v7486_v42  ;;  %v7453_v42 = vcombine.high %v4154_v39, %v4155_v40 }
 0xae5   : > { %4465 = vmatprep.subr.bf16.mxu0 %v7485_v44  ;;  %v4152_v44 = vld [vmem:[#allocation10 + $0xd0] sm:$0xff] }
 0xae6   : > { %v7451_v46 = vcombine.high %v4152_v44, %v4153_v45  ;;  %v7450_v50 = vcombine.low %v4152_v44, %v4153_v45  ;;  %v4602_v44 = vld [vmem:[#allocation8 + $0x1b8] sm:$0xff] }
 0xae8   : > { %4466 = vmatpush1.bf16.msra.mxu0 %v7484_v48  ;;  %v4150_v48 = vld [vmem:[#allocation10 + $0x90] sm:$0xff] }
 0xae9   : > { %4467 = vmatprep.subr.bf16.mxu0 %v7483_v43  ;;  %v4151_v43 = vld [vmem:[#allocation10 + $0xb0] sm:$0xff] }
 0xaec   : > { %4468 = vmatpush1.bf16.msra.mxu0 %v7482_v51 }
 0xaed   : > { %4469 = vmatprep.subr.bf16.mxu0 %v7481_v60  ;;  %v4148_v60 = vld [vmem:[#allocation10 + $0x50] sm:$0xff] }
 0xaf0   : > { %4470 = vmatpush1.bf16.msra.mxu0 %v7480_v34  ;;  %v7448_v34 = vcombine.low %v4150_v48, %v4151_v43 }
 0xaf1   : > { %4471 = vmatprep.subr.bf16.mxu0 %v7479_v52  ;;  %v7447_v52 = vcombine.high %v4148_v60, %v4149_v32 }
 0xaf4   : > { %4472 = vmatpush1.bf16.msra.mxu0 %v7478_v58  ;;  %v4147_v58 = vld [vmem:[#allocation10 + $0x30] sm:$0xff] }
 0xaf5   : > { %4473 = vmatprep.subr.bf16.mxu0 %v7477_v59  ;;  %v7446_v59 = vcombine.low %v4148_v60, %v4149_v32  ;;  %v4598_v60 = vld [vmem:[#allocation8 + $0x138] sm:$0xff] }
 0xaf8   : > { %4474 = vmatpush1.bf16.msra.mxu0 %v7476_v61  ;;  %v7445_v61 = vcombine.high %v4146_v56, %v4147_v58 }
 0xafb   : > { %4492 = vmatmul.mubr.bf16.vlgmr.msra.gmra.mxu0 %v9786_v47 }
 0xafc   : > { %4572 = vmatprep.mubr.f32.mxu0 %v9204_v0 }
 0xb5b   : > { %v3583_v62 = vpop.f32.mrf.mxu0 }
 0xb5d   : > { %v3585_v1 = vpop.f32.mrf.mxu0 }
 0xb5f   : > { %v3587_v2 = vpop.f32.mrf.mxu0 }
 0xb60   : > { %v7444_v2 = vcombine.low %v4146_v56, %v4147_v58  ;;  %v4593_v58 = vld [vmem:[#allocation8 + $0x98] sm:$0xff] }
 0xb61   : > { %v3588_v53 = vpop.f32.mrf.mxu0 }
 0xb7f   : > { %v3462_v55 = vpop.f32.mrf.mxu1 }
 0xb80   : > { %v3584_v18 = vadd.f32 %v3583_v62, %v3462_v55  ;;  %v4176_v62 = vld [vmem:[#allocation10 + $0x3d0] sm:$0xff] }
 0xb81   : > { %v3464_v57 = vpop.f32.mrf.mxu1  ;;  %v4174_v55 = vld [vmem:[#allocation10 + $0x390] sm:$0xff] }
 0xb82   : > { %v3586_v16 = vadd.f32 %v3585_v1, %v3464_v57  ;;  %v4177_v1 = vld [vmem:[#allocation10 + $0x3f0] sm:$0xff] }
 0xb83   : > { %v3466_v3 = vpop.f32.mrf.mxu1  ;;  %v7475_v53 = vcombine.high %v4176_v62, %v4177_v1  ;;  %v4175_v57 = vld [vmem:[#allocation10 + $0x3b0] sm:$0xff] }
 0xb84   : > { %v7474_v3 = vcombine.low %v4176_v62, %v4177_v1  ;;  %v4591_v62 = vld [vmem:[#allocation8 + $0x58] sm:$0xff] }
 0xb85   : > { %v3467_v4 = vpop.f32.mrf.mxu1  ;;  %v4592_v1 = vld [vmem:[#allocation8 + $0x78] sm:$0xff] }
 0xb86   : > { %v7473_v4 = vcombine.high %v4174_v55, %v4175_v57 }
 0xb9b   : > { %v3834_v5 = vpop.f32.mrf.mxu0 }
 0xb9d   : > { %v3836_v6 = vpop.f32.mrf.mxu0 }
 0xb9f   : > { %v3838_v7 = vpop.f32.mrf.mxu0  ;;  %v3955_v8 = vpop.f32.mrf.mxu1 }
 0xba0   : > { %v3956_v13 = vadd.f32 %v3955_v8, %v3834_v5  ;;  %v4172_v5 = vld [vmem:[#allocation10 + $0x350] sm:$0xff]  ;;  %v7472_v7 = vcombine.low %v4174_v55, %v4175_v57  ;;  %v4589_v55 = vld [vmem:[#allocation8 + $0x18] sm:$0xff] }
 0xba1   : > { %v3839_v9 = vpop.f32.mrf.mxu0  ;;  %v3957_v10 = vpop.f32.mrf.mxu1  ;;  %v4590_v57 = vld [vmem:[#allocation8 + $0x38] sm:$0xff] }
 0xba2   : > { %v3958_v12 = vadd.f32 %v3957_v10, %v3836_v6  ;;  %v4173_v6 = vld [vmem:[#allocation10 + $0x370] sm:$0xff] }
 0xba3   : > { %v3959_v14 = vpop.f32.mrf.mxu1  ;;  %v7471_v8 = vcombine.high %v4172_v5, %v4173_v6  ;;  %v4170_v9 = vld [vmem:[#allocation10 + $0x310] sm:$0xff]  ;;  %v7470_v63 = vcombine.low %v4172_v5, %v4173_v6  ;;  %v7526_v5 = vcombine.low %v4589_v55, %v4590_v57 }
 0xba4   : > { %4002 = vmatprep.subr.mxu1 %v3958_v12  ;;  %v4171_v10 = vld [vmem:[#allocation10 + $0x330] sm:$0xff] }
 0xba5   : > { %v3960_v19 = vpop.f32.mrf.mxu1  ;;  %4003 = vmatpush1.msra.mxu1 %v3956_v13  ;;  %v7469_v11 = vcombine.high %v4170_v9, %v4171_v10  ;;  %v4168_v12 = vld [vmem:[#allocation10 + $0x2d0] sm:$0xff]  ;;  %v7468_v14 = vcombine.low %v4170_v9, %v4171_v10 }
 0xba6   : > { %7440 = vmatmul.mubr.msk.f32.vlgmr.msra.gmra.mxu1 %vm1066_vm2, %v3965_v15  ;;  %4083 = vmatprep.subr.mxu1 %v3586_v16  ;;  %v4169_v13 = vld [vmem:[#allocation10 + $0x2f0] sm:$0xff] }
 0xba7   : > { %4084 = vmatpush1.msra.mxu1 %v3584_v18  ;;  %4042 = vmatprep.mubr.f32.mxu1 %v9204_v0  ;;  %v7467_v15 = vcombine.high %v4168_v12, %v4169_v13  ;;  %v4166_v16 = vld [vmem:[#allocation10 + $0x290] sm:$0xff]  ;;  %v7466_v18 = vcombine.low %v4168_v12, %v4169_v13 }
 0xba8   : > { %4338 = vmatprep.subr.bf16.mxu1 %v7459_v17  ;;  %v4167_v17 = vld [vmem:[#allocation10 + $0x2b0] sm:$0xff] }
 0xba9   : > { %v7465_v19 = vcombine.high %v4166_v16, %v4167_v17  ;;  %v7464_v25 = vcombine.low %v4166_v16, %v4167_v17 }
 0xbaa   : > { %7441 = vmatmul.mubr.msk.f32.gmra.mxu1 %vm1066_vm2, %v3967_v21  ;;  %v4164_v21 = vld [vmem:[#allocation10 + $0x250] sm:$0xff] }
 0xbab   : > { %4117 = vmatprep.mubr.f32.mxu1 %v9204_v0  ;;  %v7462_v31 = vcombine.low %v4164_v21, %v4165_v23 }
 0xbae   : > { %7442 = vmatmul.mubr.msk.f32.vlgmr.msra.gmra.mxu1 %vm1066_vm2, %v9763_v36  ;;  %v7452_v36 = vcombine.low %v4154_v39, %v4155_v40  ;;  %v4604_v39 = vld [vmem:[#allocation8 + $0x1f8] sm:$0xff] }
 0xbaf   : > { %4339 = vmatpush1.bf16.msra.mxu1 %v7458_v27  ;;  %4123 = vmatprep.mubr.f32.mxu1 %v9204_v0  ;;  %v7463_v27 = vcombine.high %v4164_v21, %v4165_v23  ;;  %v4617_v21 = vld [vmem:[#allocation10 + $0x198] sm:$0xff] }
 0xbb0   : > { %4340 = vmatprep.subr.bf16.mxu1 %v7457_v29  ;;  %v4162_v29 = vld [vmem:[#allocation10 + $0x210] sm:$0xff]  ;;  %v4618_v23 = vld [vmem:[#allocation10 + $0x1b8] sm:$0xff] }
 0xbb1   : > { %v7460_v40 = vcombine.low %v4162_v29, %v4163_v30 }
 0xbb2   : > { %7443 = vmatmul.mubr.msk.f32.gmra.mxu1 %vm1066_vm2, %v9768_v37  ;;  %v7449_v37 = vcombine.high %v4150_v48, %v4151_v43  ;;  %v4600_v48 = vld [vmem:[#allocation8 + $0x178] sm:$0xff] }
 0xbb3   : > { %4341 = vmatpush1.bf16.msra.mxu1 %v7456_v35  ;;  %4370 = vmatprep.mubr.bf16.mxu1 %v9792_v26  ;;  %v7461_v35 = vcombine.high %v4162_v29, %v4163_v30 }
 0xbb4   : > { %4342 = vmatprep.subr.bf16.mxu1 %v7455_v38  ;;  %v4603_v38 = vld [vmem:[#allocation8 + $0x1d8] sm:$0xff] }
 0xbb5   : > { %v7540_v45 = vcombine.low %v4603_v38, %v4604_v39 }
 0xbb7   : > { %4343 = vmatpush1.bf16.msra.mxu1 %v7454_v41  ;;  %v7541_v41 = vcombine.high %v4603_v38, %v4604_v39  ;;  %v7507_v38 = vcombine.high %v4617_v21, %v4618_v23 }
 0xbb8   : > { %4344 = vmatprep.subr.bf16.mxu1 %v7453_v42  ;;  %v4601_v42 = vld [vmem:[#allocation8 + $0x198] sm:$0xff] }
 0xbb9   : > { %v7538_v43 = vcombine.low %v4601_v42, %v4602_v44 }
 0xbbb   : > { %4345 = vmatpush1.bf16.msra.mxu1 %v7452_v36  ;;  %v9819_v49 = vpop.f32.mrf.mxu0  ;;  %v7539_v36 = vcombine.high %v4601_v42, %v4602_v44  ;;  %v4503_v42 = vpop.permute.xlu0 %4502 }
 0xbbc   : > { %4346 = vmatprep.subr.bf16.mxu1 %v7451_v46  ;;  %v4599_v46 = vld [vmem:[#allocation8 + $0x158] sm:$0xff] }
 0xbbd   : > { %v9821_v51 = vpop.f32.mrf.mxu0  ;;  %v7536_v32 = vcombine.low %v4599_v46, %v4600_v48 }
 0xbbf   : > { %4347 = vmatpush1.bf16.msra.mxu1 %v7450_v50  ;;  %v4497_v33 = vpop.f32.mrf.mxu0  ;;  %v7537_v50 = vcombine.high %v4599_v46, %v4600_v48  ;;  %v4611_v48 = vld [vmem:[#allocation10 + $0xd8] sm:$0xff] }
 0xbc0   : > { %4348 = vmatprep.subr.bf16.mxu1 %v7449_v37  ;;  %v4597_v37 = vld [vmem:[#allocation8 + $0x118] sm:$0xff] }
 0xbc1   : > { %v4498_v54 = vpop.f32.mrf.mxu0  ;;  %v7535_v33 = vcombine.high %v4597_v37, %v4598_v60 }
 0xbc2   : > { %v7534_v54 = vcombine.low %v4597_v37, %v4598_v60  ;;  %v4609_v60 = vld [vmem:[#allocation10 + $0x98] sm:$0xff] }
 0xbc3   : > { %4349 = vmatpush1.bf16.msra.mxu1 %v7448_v34  ;;  %v4595_v34 = vld [vmem:[#allocation8 + $0xd8] sm:$0xff] }
 0xbc4   : > { %4350 = vmatprep.subr.bf16.mxu1 %v7447_v52  ;;  %v4596_v52 = vld [vmem:[#allocation8 + $0xf8] sm:$0xff] }
 0xbc5   : > { %v7533_v56 = vcombine.high %v4595_v34, %v4596_v52 }
 0xbc7   : > { %4351 = vmatpush1.bf16.msra.mxu1 %v7446_v59  ;;  %v4594_v59 = vld [vmem:[#allocation8 + $0xb8] sm:$0xff] }
 0xbc8   : > { %4352 = vmatprep.subr.bf16.mxu1 %v7445_v61  ;;  %v7532_v61 = vcombine.low %v4595_v34, %v4596_v52  ;;  %v4607_v52 = vld [vmem:[#allocation10 + $0x58] sm:$0xff] }
 0xbcb   : > { %4353 = vmatpush1.bf16.msra.mxu1 %v7444_v2  ;;  %v7530_v2 = vcombine.low %v4593_v58, %v4594_v59 }
 0xbcc   : > { %4354 = vmatprep.subr.bf16.mxu1 %v7475_v53  ;;  %v7529_v53 = vcombine.high %v4591_v62, %v4592_v1 }
 0xbcf   : > { %4355 = vmatpush2.bf16.msra.mxu1 %v7474_v3  ;;  %v7528_v3 = vcombine.low %v4591_v62, %v4592_v1  ;;  %v4635_v62 = vld [vmem:[#allocation10 + $0x3d8] sm:$0xff] }
 0xbd0   : > { %4356 = vmatprep.subr.bf16.mxu1 %v7473_v4  ;;  %v7527_v4 = vcombine.high %v4589_v55, %v4590_v57  ;;  %v4636_v1 = vld [vmem:[#allocation10 + $0x3f8] sm:$0xff] }
 0xbd1   : > { %v7525_v55 = vcombine.high %v4635_v62, %v4636_v1 }
 0xbd3   : > { %4357 = vmatpush2.bf16.msra.mxu1 %v7472_v7 }
 0xbd4   : > { %4358 = vmatprep.subr.bf16.mxu1 %v7471_v8 }
 0xbd7   : > { %4359 = vmatpush2.bf16.msra.mxu1 %v7470_v63 }
 0xbd8   : > { %4360 = vmatprep.subr.bf16.mxu1 %v7469_v11 }
 0xbdb   : > { %4361 = vmatpush2.bf16.msra.mxu1 %v7468_v14 }
 0xbdc   : > { %4362 = vmatprep.subr.bf16.mxu1 %v7467_v15 }
 0xbdf   : > { %4363 = vmatpush2.bf16.msra.mxu1 %v7466_v18  ;;  %v4620_v18 = vld [vmem:[#allocation10 + $0x1f8] sm:$0xff] }
 0xbe0   : > { %4364 = vmatprep.subr.bf16.mxu1 %v7465_v19 }
 0xbe3   : > { %4365 = vmatpush2.bf16.msra.mxu1 %v7464_v25 }
 0xbe4   : > { %4366 = vmatprep.subr.bf16.mxu1 %v7463_v27 }
 0xbe7   : > { %4367 = vmatpush2.bf16.msra.mxu1 %v7462_v31  ;;  %v4501_v31 = vpop.permute.xlu1 %4500 }
 0xbe8   : > { %4368 = vmatprep.subr.bf16.mxu1 %v7461_v35 }
 0xbeb   : > { %4369 = vmatpush2.bf16.msra.mxu1 %v7460_v40  ;;  %v4615_v40 = vld [vmem:[#allocation10 + $0x158] sm:$0xff] }
 0xbec   : > { %4918 = vmatprep.subr.bf16.mxu1 %v7541_v41  ;;  %v4616_v41 = vld [vmem:[#allocation10 + $0x178] sm:$0xff] }
 0xbed   : > { %v7505_v44 = vcombine.high %v4615_v40, %v4616_v41 }
 0xbee   : > { %4371 = vmatmul.mubr.bf16.vlgmr.msra.gmra.mxu1 %v9794_v28 }
 0xbef   : > { %4919 = vmatpush1.bf16.msra.mxu1 %v7540_v45  ;;  %4950 = vmatprep.mubr.bf16.mxu1 %v9209_v20  ;;  %v7531_v20 = vcombine.high %v4593_v58, %v4594_v59  ;;  %v4614_v45 = vld [vmem:[#allocation10 + $0x138] sm:$0xff] }
 0xbf0   : > { %4920 = vmatprep.subr.bf16.mxu1 %v7539_v36  ;;  %v7504_v36 = vcombine.low %v4615_v40, %v4616_v41  ;;  %v4605_v58 = vld [vmem:[#allocation10 + $0x18] sm:$0xff] }
 0xbf1   : > { %v4606_v59 = vld [vmem:[#allocation10 + $0x38] sm:$0xff] }
 0xbf2   : > { %v4621_v41 = vld [vmem:[#allocation10 + $0x218] sm:$0xff] }
 0xbf3   : > { %4921 = vmatpush1.bf16.msra.mxu1 %v7538_v43  ;;  %v4612_v43 = vld [vmem:[#allocation10 + $0xf8] sm:$0xff] }
 0xbf4   : > { %4922 = vmatprep.subr.bf16.mxu1 %v7537_v50  ;;  %v7501_v37 = vcombine.high %v4611_v48, %v4612_v43 }
 0xbf7   : > { %4923 = vmatpush1.bf16.msra.mxu1 %v7536_v32  ;;  %v4610_v32 = vld [vmem:[#allocation10 + $0xb8] sm:$0xff] }
 0xbf8   : > { %4924 = vmatprep.subr.bf16.mxu1 %v7535_v33  ;;  %v7500_v33 = vcombine.low %v4611_v48, %v4612_v43  ;;  %v7499_v34 = vcombine.high %v4609_v60, %v4610_v32  ;;  %v8767_v48 = vld [vmem:[#allocation11 + $0xac] ss:$12 sps:$4 sm:$0xff]   ;;  %v8768_v43 = vld [vmem:[#allocation11 + $0x150] ss:$12 sps:$4 sm:$0xff]  }
 0xbfb   : > { %4925 = vmatpush1.bf16.msra.mxu1 %v7534_v54  ;;  %v4608_v54 = vld [vmem:[#allocation10 + $0x78] sm:$0xff] }
 0xbfc   : > { %4926 = vmatprep.subr.bf16.mxu1 %v7533_v56  ;;  %v7498_v56 = vcombine.low %v4609_v60, %v4610_v32  ;;  %v8774_v60 = vld [vmem:[#allocation11 + $0x138] ss:$12 sps:$4 sm:$0xff]   ;;  %v8776_v32 = vld [vmem:[#allocation11 + $0x13c] ss:$12 sps:$4 sm:$0xff]  }
 0xbff   : > { %4927 = vmatpush1.bf16.msra.mxu1 %v7532_v61  ;;  %v7496_v61 = vcombine.low %v4607_v52, %v4608_v54 }
 0xc00   : > { %4928 = vmatprep.subr.bf16.mxu1 %v7531_v20  ;;  %v7495_v20 = vcombine.high %v4605_v58, %v4606_v59 }
 0xc03   : > { %4929 = vmatpush1.bf16.msra.mxu1 %v7530_v2 }
 0xc04   : > { %4930 = vmatprep.subr.bf16.mxu1 %v7529_v53  ;;  %v7494_v53 = vcombine.low %v4605_v58, %v4606_v59  ;;  %v8786_v58 = vld [vmem:[#allocation11 + $0x108] ss:$12 sps:$4 sm:$0xff]   ;;  %v8788_v59 = vld [vmem:[#allocation11 + $0x10c] ss:$12 sps:$4 sm:$0xff]  }
 0xc07   : > { %4931 = vmatpush1.bf16.msra.mxu1 %v7528_v3  ;;  %v4633_v3 = vld [vmem:[#allocation10 + $0x398] sm:$0xff] }
 0xc08   : > { %4932 = vmatprep.subr.bf16.mxu1 %v7527_v4  ;;  %v4634_v4 = vld [vmem:[#allocation10 + $0x3b8] sm:$0xff] }
 0xc0b   : > { %4933 = vmatpush1.bf16.msra.mxu1 %v7526_v5 }
 0xc0e   : > { %4951 = vmatmul.mubr.bf16.vlgmr.msra.gmra.mxu1 %v9786_v47  ;;  %v4619_v47 = vld [vmem:[#allocation10 + $0x1d8] sm:$0xff] }
 0xc0f   : > { %5031 = vmatprep.mubr.f32.mxu1 %v9204_v0  ;;  %v7509_v27 = vcombine.high %v4619_v47, %v4620_v18  ;;  %v7508_v35 = vcombine.low %v4619_v47, %v4620_v18 }
 0xc66   : > { %v4038_v6 = vpop.f32.mrf.mxu1 }
 0xc68   : > { %v4040_v7 = vpop.f32.mrf.mxu1 }
 0xc6a   : > { %v4044_v8 = vpop.f32.mrf.mxu1 }
 0xc6c   : > { %v4046_v9 = vpop.f32.mrf.mxu1 }
 0xc6e   : > { %v4119_v10 = vpop.f32.mrf.mxu1 }
 0xc6f   : > { %v9827_v63 = vadd.f32 %v4119_v10, %v4038_v6  ;;  %v7524_v6 = vcombine.low %v4635_v62, %v4636_v1  ;;  %v4632_v10 = vld [vmem:[#allocation10 + $0x378] sm:$0xff]  ;;  %v8794_v1 = vld [vmem:[#allocation11 + $0xf4] ss:$12 sps:$4 sm:$0xff]  }
 0xc70   : > { %v4121_v11 = vpop.f32.mrf.mxu1  ;;  %v8792_v62 = vld [vmem:[#allocation11 + $0xf0] ss:$12 sps:$4 sm:$0xff]  }
 0xc71   : > { %v9829_v12 = vadd.f32 %v4121_v11, %v4040_v7  ;;  %v7523_v7 = vcombine.high %v4633_v3, %v4634_v4  ;;  %v7522_v11 = vcombine.low %v4633_v3, %v4634_v4  ;;  %v8798_v3 = vld [vmem:[#allocation11 + $0xd8] ss:$12 sps:$4 sm:$0xff]   ;;  %v8800_v4 = vld [vmem:[#allocation11 + $0xdc] ss:$12 sps:$4 sm:$0xff]  }
 0xc72   : > { %v4125_v13 = vpop.f32.mrf.mxu1 }
 0xc73   : > { %v9831_v14 = vadd.f32 %v4125_v13, %v4044_v8 }
 0xc74   : > { %v4127_v15 = vpop.f32.mrf.mxu1 }
 0xc75   : > { %v9833_v16 = vadd.f32 %v4127_v15, %v4046_v9  ;;  %v4631_v9 = vld [vmem:[#allocation10 + $0x358] sm:$0xff] }
 0xc76   : > { %v7521_v13 = vcombine.high %v4631_v9, %v4632_v10  ;;  %v4629_v15 = vld [vmem:[#allocation10 + $0x318] sm:$0xff]  ;;  %v7520_v47 = vcombine.low %v4631_v9, %v4632_v10  ;;  %v8807_v9 = vld [vmem:[#allocation11] ss:$12 sps:$4 sm:$0xff]   ;;  %v8809_v10 = vld [vmem:[#allocation11 + $0x4] ss:$12 sps:$4 sm:$0xff]  }
 0xcae   : > { %v4372_v17 = vpop.f32.mrf.mxu1 }
 0xcaf   : > { %v4494_v29 = vadd.f32 %v9819_v49, %v4372_v17  ;;  %v4613_v49 = vld [vmem:[#allocation10 + $0x118] sm:$0xff] }
 0xcb0   : > { %v4374_v19 = vpop.f32.mrf.mxu1  ;;  %v7503_v46 = vcombine.high %v4613_v49, %v4614_v45  ;;  %v7502_v50 = vcombine.low %v4613_v49, %v4614_v45  ;;  %v4630_v17 = vld [vmem:[#allocation10 + $0x338] sm:$0xff]  ;;  %v8762_v45 = vld [vmem:[#allocation11 + $0x168] ss:$12 sps:$4 sm:$0xff]  }
 0xcb1   : > { %v4496_v25 = vadd.f32 %v9821_v51, %v4374_v19  ;;  %v7506_v51 = vcombine.low %v4617_v21, %v4618_v23  ;;  %v7519_v18 = vcombine.high %v4629_v15, %v4630_v17  ;;  %v4627_v19 = vld [vmem:[#allocation10 + $0x2d8] sm:$0xff]  ;;  %v7518_v23 = vcombine.low %v4629_v15, %v4630_v17  ;;  %5463 = vrot.lane.b32.xlu1 %v8762_v45, %s9210_s29 }
 0xcb2   : > { %v4376_v30 = vpop.f32.mrf.mxu1  ;;  %v4628_v21 = vld [vmem:[#allocation10 + $0x2f8] sm:$0xff] }
 0xcb3   : > { %4538 = vmatprep.subr.mxu0 %v4496_v25  ;;  %v7517_v25 = vcombine.high %v4627_v19, %v4628_v21  ;;  %v7516_v30 = vcombine.low %v4627_v19, %v4628_v21  ;;  %v8813_v19 = vld [vmem:[#allocation11 + $0xac] ss:$12 sps:$4 sm:$0xff]   ;;  %v8815_v21 = vld [vmem:[#allocation11 + $0xb0] ss:$12 sps:$4 sm:$0xff]  }
 0xcb4   : > { %v4377_v39 = vpop.f32.mrf.mxu1  ;;  %4539 = vmatpush1.msra.mxu0 %v4494_v29  ;;  %v4626_v29 = vld [vmem:[#allocation10 + $0x2b8] sm:$0xff] }
 0xcb5   : > { %7492 = vmatmul.mubr.msk.f32.vlgmr.msra.gmra.mxu0 %vm1066_vm2, %v4501_v31  ;;  %4797 = vmatprep.subr.bf16.mxu0 %v7509_v27  ;;  %v4625_v27 = vld [vmem:[#allocation10 + $0x298] sm:$0xff] }
 0xcb6   : > { %4798 = vmatpush1.bf16.msra.mxu0 %v7508_v35  ;;  %4578 = vmatprep.mubr.f32.mxu0 %v9204_v0  ;;  %v7515_v31 = vcombine.high %v4625_v27, %v4626_v29  ;;  %v4623_v35 = vld [vmem:[#allocation10 + $0x258] sm:$0xff]  ;;  %v7514_v39 = vcombine.low %v4625_v27, %v4626_v29 }
 0xcb7   : > { %4799 = vmatprep.subr.bf16.mxu0 %v7507_v38  ;;  %v4624_v38 = vld [vmem:[#allocation10 + $0x278] sm:$0xff] }
 0xcb8   : > { %v7513_v40 = vcombine.high %v4623_v35, %v4624_v38  ;;  %v8839_v45 = vld [vmem:[#allocation11 + $0x50] ss:$12 sps:$4 sm:$0xff]  }
 0xcb9   : > { %7493 = vmatmul.mubr.msk.f32.gmra.mxu0 %vm1066_vm2, %v4503_v42  ;;  %v4622_v42 = vld [vmem:[#allocation10 + $0x238] sm:$0xff] }
 0xcba   : > { %4800 = vmatpush1.bf16.msra.mxu0 %v7506_v51  ;;  %4829 = vmatprep.mubr.bf16.mxu0 %v9792_v26  ;;  %v7497_v26 = vcombine.high %v4607_v52, %v4608_v54  ;;  %v7512_v51 = vcombine.low %v4623_v35, %v4624_v38  ;;  %v7510_v49 = vcombine.low %v4621_v41, %v4622_v42  ;;  %v8780_v52 = vld [vmem:[#allocation11 + $0x120] ss:$12 sps:$4 sm:$0xff]   ;;  %v8782_v54 = vld [vmem:[#allocation11 + $0x124] ss:$12 sps:$4 sm:$0xff]  }
 0xcbb   : > { %4801 = vmatprep.subr.bf16.mxu0 %v7505_v44  ;;  %v7511_v44 = vcombine.high %v4621_v41, %v4622_v42  ;;  %v8824_v35 = vld [vmem:[#allocation11 + $0x140] ss:$12 sps:$4 sm:$0xff]   ;;  %v8831_v41 = vld [vmem:[#allocation11 + $0x64] ss:$12 sps:$4 sm:$0xff]   ;;  %v8833_v42 = vld [vmem:[#allocation11 + $0x68] ss:$12 sps:$4 sm:$0xff]  }
 0xcbc   : > { %v8827_v38 = vld [vmem:[#allocation11 + $0x80] ss:$12 sps:$4 sm:$0xff]  }
 0xcbe   : > { %4802 = vmatpush1.bf16.msra.mxu0 %v7504_v36  ;;  %v8764_v36 = vld [vmem:[#allocation11 + $0x16c] ss:$12 sps:$4 sm:$0xff]  }
 0xcbf   : > { %4803 = vmatprep.subr.bf16.mxu0 %v7503_v46  ;;  %5465 = vrot.lane.b32.xlu0 %v8764_v36, %s9210_s29  ;;  %v8765_v46 = vld [vmem:[#allocation11 + $0xa8] ss:$12 sps:$4 sm:$0xff]  }
 0xcc0   : > { %5431 = vrot.lane.b32.xlu1 %v8765_v46, %s9210_s29  ;;  %v8840_v36 = vld [vmem:[#allocation11 + $0xf4] ss:$12 sps:$4 sm:$0xff]   ;;  %v8842_v46 = vld [vmem:[#allocation11 + $0xf8] ss:$12 sps:$4 sm:$0xff]  }
 0xcc2   : > { %4804 = vmatpush1.bf16.msra.mxu0 %v7502_v50  ;;  %v8770_v50 = vld [vmem:[#allocation11 + $0x154] ss:$12 sps:$4 sm:$0xff]  }
 0xcc3   : > { %4805 = vmatprep.subr.bf16.mxu0 %v7501_v37  ;;  %5433 = vrot.lane.b32.xlu0 %v8767_v48, %s9210_s29  ;;  %v8773_v37 = vld [vmem:[#allocation11 + $0x94] ss:$12 sps:$4 sm:$0xff]  }
 0xcc4   : > { %5459 = vrot.lane.b32.xlu1 %v8768_v43, %s9210_s29  ;;  %v8843_v48 = vld [vmem:[#allocation11 + $0x34] ss:$12 sps:$4 sm:$0xff]   ;;  %v8845_v43 = vld [vmem:[#allocation11 + $0x38] ss:$12 sps:$4 sm:$0xff]  }
 0xcc6   : > { %4806 = vmatpush1.bf16.msra.mxu0 %v7500_v33  ;;  %v8777_v33 = vld [vmem:[#allocation11 + $0x78] ss:$12 sps:$4 sm:$0xff]  }
 0xcc7   : > { %4807 = vmatprep.subr.bf16.mxu0 %v7499_v34  ;;  %5461 = vrot.lane.b32.xlu0 %v8770_v50, %s9210_s29  ;;  %v8779_v34 = vld [vmem:[#allocation11 + $0x7c] ss:$12 sps:$4 sm:$0xff]  }
 0xcc8   : > { %v8846_v50 = vld [vmem:[#allocation11 + $0xdc] ss:$12 sps:$4 sm:$0xff]  }
 0xcca   : > { %4808 = vmatpush1.bf16.msra.mxu0 %v7498_v56  ;;  %v8783_v56 = vld [vmem:[#allocation11 + $0x60] ss:$12 sps:$4 sm:$0xff]  }
 0xccb   : > { %4809 = vmatprep.subr.bf16.mxu0 %v7497_v26  ;;  %5429 = vrot.lane.b32.xlu0 %v8773_v37, %s9210_s29  ;;  %v8785_v26 = vld [vmem:[#allocation11 + $0x64] ss:$12 sps:$4 sm:$0xff]   ;;  %v4960_v37 = vpop.permute.xlu1 %4959 }
 0xcce   : > { %4810 = vmatpush1.bf16.msra.mxu0 %v7496_v61  ;;  %v9841_v2 = vpop.f32.mrf.mxu1  ;;  %v8789_v61 = vld [vmem:[#allocation11 + $0x48] ss:$12 sps:$4 sm:$0xff]  }
 0xccf   : > { %4811 = vmatprep.subr.bf16.mxu0 %v7495_v20  ;;  %5457 = vrot.lane.b32.xlu0 %v8776_v32, %s9210_s29  ;;  %v8791_v20 = vld [vmem:[#allocation11 + $0x4c] ss:$12 sps:$4 sm:$0xff]   ;;  %v8849_v32 = vld [vmem:[#allocation11 + $0x1c] ss:$12 sps:$4 sm:$0xff]  }
 0xcd0   : > { %v9843_v57 = vpop.f32.mrf.mxu1 }
 0xcd2   : > { %4812 = vmatpush1.bf16.msra.mxu0 %v7494_v53  ;;  %v4956_v5 = vpop.f32.mrf.mxu1  ;;  %v8795_v53 = vld [vmem:[#allocation11 + $0x30] ss:$12 sps:$4 sm:$0xff]  }
 0xcd3   : > { %4813 = vmatprep.subr.bf16.mxu0 %v7525_v55  ;;  %5425 = vrot.lane.b32.xlu0 %v8779_v34, %s9210_s29  ;;  %v8797_v55 = vld [vmem:[#allocation11 + $0x34] ss:$12 sps:$4 sm:$0xff]   ;;  %v8801_v5 = vld [vmem:[#allocation11 + $0x18] ss:$12 sps:$4 sm:$0xff]  }
 0xcd4   : > { %v4957_v8 = vpop.f32.mrf.mxu1 }
 0xcd5   : > { %v8806_v8 = vld [vmem:[#allocation11 + $0xc4] ss:$12 sps:$4 sm:$0xff]  }
 0xcd6   : > { %4814 = vmatpush2.bf16.msra.mxu0 %v7524_v6  ;;  %v8803_v6 = vld [vmem:[#allocation11 + $0x1c] ss:$12 sps:$4 sm:$0xff]  }
 0xcd7   : > { %4815 = vmatprep.subr.bf16.mxu0 %v7523_v7  ;;  %5453 = vrot.lane.b32.xlu0 %v8782_v54, %s9210_s29  ;;  %v8804_v7 = vld [vmem:[#allocation11 + $0xc0] ss:$12 sps:$4 sm:$0xff]  }
 0xcda   : > { %4816 = vmatpush2.bf16.msra.mxu0 %v7522_v11  ;;  %v8810_v11 = vld [vmem:[#allocation11 + $0x16c] ss:$12 sps:$4 sm:$0xff]  }
 0xcdb   : > { %4817 = vmatprep.subr.bf16.mxu0 %v7521_v13  ;;  %5421 = vrot.lane.b32.xlu0 %v8785_v26, %s9210_s29  ;;  %v8812_v13 = vld [vmem:[#allocation11 + $0x170] ss:$12 sps:$4 sm:$0xff]   ;;  %v8854_v26 = vld [vmem:[#allocation11 + $0xc8] ss:$12 sps:$4 sm:$0xff]  }
 0xcde   : > { %4818 = vmatpush2.bf16.msra.mxu0 %v7520_v47 }
 0xcdf   : > { %4819 = vmatprep.subr.bf16.mxu0 %v7519_v18  ;;  %5449 = vrot.lane.b32.xlu0 %v8788_v59, %s9210_s29 }
 0xce2   : > { %4820 = vmatpush2.bf16.msra.mxu0 %v7518_v23 }
 0xce3   : > { %4821 = vmatprep.subr.bf16.mxu0 %v7517_v25  ;;  %5417 = vrot.lane.b32.xlu0 %v8791_v20, %s9210_s29  ;;  %v8855_v20 = vld [vmem:[#allocation11 + $0x4] ss:$12 sps:$4 sm:$0xff]  }
 0xce6   : > { %4822 = vmatpush2.bf16.msra.mxu0 %v7516_v30  ;;  %v8819_v30 = vld [vmem:[#allocation11 + $0x94] ss:$12 sps:$4 sm:$0xff]  }
 0xce7   : > { %4823 = vmatprep.subr.bf16.mxu0 %v7515_v31  ;;  %5445 = vrot.lane.b32.xlu0 %v8794_v1, %s9210_s29  ;;  %v8821_v31 = vld [vmem:[#allocation11 + $0x98] ss:$12 sps:$4 sm:$0xff]  }
 0xcea   : > { %4824 = vmatpush2.bf16.msra.mxu0 %v7514_v39  ;;  %v8828_v39 = vld [vmem:[#allocation11 + $0x124] ss:$12 sps:$4 sm:$0xff]  }
 0xceb   : > { %4825 = vmatprep.subr.bf16.mxu0 %v7513_v40  ;;  %5413 = vrot.lane.b32.xlu0 %v8797_v55, %s9210_s29  ;;  %v8830_v40 = vld [vmem:[#allocation11 + $0x128] ss:$12 sps:$4 sm:$0xff]  }
 0xcee   : > { %4826 = vmatpush2.bf16.msra.mxu0 %v7512_v51  ;;  %v8834_v51 = vld [vmem:[#allocation11 + $0x10c] ss:$12 sps:$4 sm:$0xff]  }
 0xcef   : > { %4827 = vmatprep.subr.bf16.mxu0 %v7511_v44  ;;  %5441 = vrot.lane.b32.xlu0 %v8800_v4, %s9210_s29  ;;  %v8836_v44 = vld [vmem:[#allocation11 + $0x110] ss:$12 sps:$4 sm:$0xff]  }
 0xcf2   : > { %4828 = vmatpush2.bf16.msra.mxu0 %v7510_v49  ;;  %v8837_v49 = vld [vmem:[#allocation11 + $0x4c] ss:$12 sps:$4 sm:$0xff]  }
 0xcf3   : > { %5409 = vrot.lane.b32.xlu0 %v8803_v6, %s9210_s29 }
 0xcf5   : > { %4830 = vmatmul.mubr.bf16.vlgmr.msra.gmra.mxu0 %v9794_v28  ;;  %v8771_v28 = vld [vmem:[#allocation11 + $0x90] ss:$12 sps:$4 sm:$0xff]  }
 0xcf6   : > { %5427 = vrot.lane.b32.xlu1 %v8771_v28, %s9210_s29  ;;  %v8848_v28 = vld [vmem:[#allocation11 + $0xe0] ss:$12 sps:$4 sm:$0xff]  }
 0xcf7   : > { %5437 = vrot.lane.b32.xlu0 %v8806_v8, %s9210_s29 }
 0xcfa   : > { %5455 = vrot.lane.b32.xlu1 %v8774_v60, %s9210_s29  ;;  %v4962_v60 = vpop.permute.xlu0 %4961 }
 0xcfb   : > { %5405 = vrot.lane.b32.xlu0 %v8809_v10, %s9210_s29 }
 0xcfe   : > { %5423 = vrot.lane.b32.xlu1 %v8777_v33, %s9210_s29  ;;  %v8851_v33 = vld [vmem:[#allocation11 + $0x20] ss:$12 sps:$4 sm:$0xff]  }
 0xcff   : > { %5961 = vrot.lane.b32.xlu0 %v8812_v13, %s9211_s26 }
 0xd02   : > { %5451 = vrot.lane.b32.xlu1 %v8780_v52, %s9210_s29 }
 0xd03   : > { %5929 = vrot.lane.b32.xlu0 %v8815_v21, %s9211_s26 }
 0xd06   : > { %5419 = vrot.lane.b32.xlu1 %v8783_v56, %s9210_s29  ;;  %v8852_v56 = vld [vmem:[#allocation11 + $0xc4] ss:$12 sps:$4 sm:$0xff]  }
 0xd0a   : > { %5447 = vrot.lane.b32.xlu1 %v8786_v58, %s9210_s29 }
 0xd0e   : > { %5415 = vrot.lane.b32.xlu1 %v8789_v61, %s9210_s29 }
 0xd12   : > { %5443 = vrot.lane.b32.xlu1 %v8792_v62, %s9210_s29  ;;  %v8857_v62 = vld [vmem:[#allocation11 + $0x8] ss:$12 sps:$4 sm:$0xff]  }
 0xd16   : > { %5411 = vrot.lane.b32.xlu1 %v8795_v53, %s9210_s29 }
 0xd1a   : > { %5439 = vrot.lane.b32.xlu1 %v8798_v3, %s9210_s29 }
 0xd1e   : > { %5407 = vrot.lane.b32.xlu1 %v8801_v5, %s9210_s29 }
 0xd22   : > { %5435 = vrot.lane.b32.xlu1 %v8804_v7, %s9210_s29 }
 0xd23   : > { %v5464_v34 = vpop.permute.xlu1 %5463 }
 0xd26   : > { %5403 = vrot.lane.b32.xlu1 %v8807_v9, %s9210_s29  ;;  %s787_s29 = sand.u32 1, %s9178_s28  }
 0xd27   : > { %s10201_s4 = scalar_lea.sflag [#allocation4], %s787_s29 }
 0xd2a   : > { %5959 = vrot.lane.b32.xlu1 %v8810_v11, %s9211_s26  ;;  %v8858_v11 = vld [vmem:[#allocation11 + $0x168] ss:$12 sps:$4 sm:$0xff]  }
 0xd2e   : > { %5927 = vrot.lane.b32.xlu1 %v8813_v19, %s9211_s26 }
 0xd31   : > { %v5466_v52 = vpop.permute.xlu0 %5465 }
 0xd32   : > { %v5483_v54 = vsel %vm5467_vm4, %v5464_v34, %v5466_v52  ;;  %v5432_v58 = vpop.permute.xlu1 %5431 }
 0xd33   : > { %7863 = vmatprep.subr.bf16.mxu0 %v5483_v54 }
 0xd35   : > { %v5434_v59 = vpop.permute.xlu0 %5433 }
 0xd36   : > { %v5475_v61 = vsel %vm5467_vm4, %v5432_v58, %v5434_v59  ;;  %v5460_v1 = vpop.permute.xlu1 %5459 }
 0xd37   : > { %7864 = vmatpush3.bf16.msra.mxu0 %v5475_v61 }
 0xd39   : > { %v5462_v53 = vpop.permute.xlu0 %5461 }
 0xd3a   : > { %v5482_v55 = vsel %vm5467_vm4, %v5460_v1, %v5462_v53  ;;  %v8866_v53 = vld [vmem:[#allocation11 + $0x108] ss:$12 sps:$4 sm:$0xff]  }
 0xd3b   : > { %7865 = vmatprep.subr.bf16.mxu0 %v5482_v55  ;;  %v8867_v55 = vld [vmem:[#allocation11 + $0x48] ss:$12 sps:$4 sm:$0xff]  }
 0xd3d   : > { %v5430_v5 = vpop.permute.xlu0 %5429 }
 0xd68   : > { %v5428_v4 = vpop.permute.xlu1 %5427 }
 0xd69   : > { %v5474_v7 = vsel %vm5467_vm4, %v5428_v4, %v5430_v5  ;;  %v8869_v4 = vld [vmem:[#allocation11 + $0x30] ss:$12 sps:$4 sm:$0xff]   ;;  %v8870_v5 = vld [vmem:[#allocation11 + $0xd8] ss:$12 sps:$4 sm:$0xff]  }
 0xd6a   : > { %7866 = vmatpush3.bf16.msra.mxu0 %v5474_v7  ;;  %v8872_v7 = vld [vmem:[#allocation11 + $0xc0] ss:$12 sps:$4 sm:$0xff]  }
 0xd6c   : > { %v5456_v13 = vpop.permute.xlu1 %5455 }
 0xd75   : > { %v4574_v15 = vpop.f32.mrf.mxu0 }
 0xd76   : > { %v9879_v17 = vadd.f32 %v4574_v15, %v9827_v63  ;;  %v8816_v63 = vld [vmem:[#allocation11 + $0x154] ss:$12 sps:$4 sm:$0xff]   ;;  %v5458_v15 = vpop.permute.xlu0 %5457 }
 0xd77   : > { %v4576_v47 = vpop.f32.mrf.mxu0  ;;  %5955 = vrot.lane.b32.xlu1 %v8816_v63, %s9211_s26  ;;  %v5481_v21 = vsel %vm5467_vm4, %v5456_v13, %v5458_v15  ;;  %v9966_v13 = vld [vmem:[%s10258_s17 + $0x18] sm:$0xff] }
 0xd78   : > { %v9882_v18 = vadd.f32 %v4576_v47, %v9829_v12  ;;  %v8818_v12 = vld [vmem:[#allocation11 + $0x158] ss:$12 sps:$4 sm:$0xff]   ;;  %v8859_v47 = vld [vmem:[#allocation11 + $0xa8] ss:$12 sps:$4 sm:$0xff]   ;;  %7867 = vmatprep.subr.bf16.mxu0 %v5481_v21  ;;  %v8874_v15 = vld [vmem:[#allocation11 + $0x170] ss:$12 sps:$4 sm:$0xff]  }
 0xd79   : > { %v4580_v23 = vpop.f32.mrf.mxu0  ;;  %5957 = vrot.lane.b32.xlu0 %v8818_v12, %s9211_s26  ;;  %v8862_v12 = vld [vmem:[#allocation11 + $0x138] ss:$12 sps:$4 sm:$0xff]  }
 0xd7a   : > { %v9887_v25 = vadd.f32 %v4580_v23, %v9831_v14  ;;  %v8822_v14 = vld [vmem:[#allocation11 + $0x13c] ss:$12 sps:$4 sm:$0xff]   ;;  %v8877_v21 = vld [vmem:[#allocation11 + $0x98] ss:$12 sps:$4 sm:$0xff]  }
 0xd7b   : > { %v4582_v27 = vpop.f32.mrf.mxu0  ;;  %5923 = vrot.lane.b32.xlu1 %v8819_v30, %s9211_s26  ;;  %v8860_v23 = vld [vmem:[#allocation11 + $0x150] ss:$12 sps:$4 sm:$0xff]  }
 0xd7c   : > { %v9890_v29 = vadd.f32 %v4582_v27, %v9833_v16  ;;  %v8825_v16 = vld [vmem:[#allocation11 + $0x7c] ss:$12 sps:$4 sm:$0xff]   ;;  %v5426_v27 = vpop.permute.xlu0 %5425 }
 0xd7d   : > { %5925 = vrot.lane.b32.xlu0 %v8821_v31, %s9211_s26 }
 0xd7f   : > { %5951 = vrot.lane.b32.xlu1 %v8822_v14, %s9211_s26  ;;  %v8863_v14 = vld [vmem:[#allocation11 + $0x78] ss:$12 sps:$4 sm:$0xff]  }
 0xd80   : > { %v5454_v31 = vpop.permute.xlu0 %5453 }
 0xd81   : > { %5953 = vrot.lane.b32.xlu0 %v8824_v35, %s9211_s26 }
 0xd83   : > { %5919 = vrot.lane.b32.xlu1 %v8825_v16, %s9211_s26 }
 0xd85   : > { %5921 = vrot.lane.b32.xlu0 %v8827_v38, %s9211_s26  ;;  %v5422_v38 = vpop.permute.xlu0 %5421 }
 0xd87   : > { %5947 = vrot.lane.b32.xlu1 %v8828_v39, %s9211_s26  ;;  %v8865_v39 = vld [vmem:[#allocation11 + $0x60] ss:$12 sps:$4 sm:$0xff]  }
 0xd89   : > { %5949 = vrot.lane.b32.xlu0 %v8830_v40, %s9211_s26 }
 0xd8b   : > { %5915 = vrot.lane.b32.xlu1 %v8831_v41, %s9211_s26 }
 0xd8d   : > { %5917 = vrot.lane.b32.xlu0 %v8833_v42, %s9211_s26  ;;  %v5450_v42 = vpop.permute.xlu0 %5449 }
 0xd8f   : > { %5943 = vrot.lane.b32.xlu1 %v8834_v51, %s9211_s26 }
 0xd91   : > { %5945 = vrot.lane.b32.xlu0 %v8836_v44, %s9211_s26 }
 0xd93   : > { %5911 = vrot.lane.b32.xlu1 %v8837_v49, %s9211_s26  ;;  %v5418_v49 = vpop.permute.xlu0 %5417 }
 0xd95   : > { %5913 = vrot.lane.b32.xlu0 %v8839_v45, %s9211_s26 }
 0xd97   : > { %5939 = vrot.lane.b32.xlu1 %v8840_v36, %s9211_s26 }
 0xd99   : > { %5941 = vrot.lane.b32.xlu0 %v8842_v46, %s9211_s26  ;;  %v5446_v46 = vpop.permute.xlu0 %5445 }
 0xd9b   : > { %5907 = vrot.lane.b32.xlu1 %v8843_v48, %s9211_s26 }
 0xd9d   : > { %5909 = vrot.lane.b32.xlu0 %v8845_v43, %s9211_s26 }
 0xd9f   : > { %5935 = vrot.lane.b32.xlu1 %v8846_v50, %s9211_s26  ;;  %v5414_v50 = vpop.permute.xlu0 %5413 }
 0xda1   : > { %5937 = vrot.lane.b32.xlu0 %v8848_v28, %s9211_s26 }
 0xda3   : > { %5903 = vrot.lane.b32.xlu1 %v8849_v32, %s9211_s26 }
 0xda5   : > { %5905 = vrot.lane.b32.xlu0 %v8851_v33, %s9211_s26 }
 0xda7   : > { %5931 = vrot.lane.b32.xlu1 %v8852_v56, %s9211_s26 }
 0xda9   : > { %5933 = vrot.lane.b32.xlu0 %v8854_v26, %s9211_s26 }
 0xdab   : > { %5899 = vrot.lane.b32.xlu1 %v8855_v20, %s9211_s26 }
 0xdad   : > { %5901 = vrot.lane.b32.xlu0 %v8857_v62, %s9211_s26 }
 0xdb5   : > { %v4831_v3 = vpop.f32.mrf.mxu0 }
 0xdb6   : > { %v4953_v9 = vadd.f32 %v9841_v2, %v4831_v3  ;;  %v8861_v2 = vld [vmem:[#allocation11 + $0x90] ss:$12 sps:$4 sm:$0xff]  }
 0xdb7   : > { %v4833_v6 = vpop.f32.mrf.mxu0  ;;  %v8868_v3 = vld [vmem:[#allocation11 + $0xf0] ss:$12 sps:$4 sm:$0xff]  }
 0xdb8   : > { %v4955_v8 = vadd.f32 %v9843_v57, %v4833_v6  ;;  %v5424_v57 = vpop.permute.xlu1 %5423  ;;  %v8871_v6 = vld [vmem:[#allocation11 + $0x18] ss:$12 sps:$4 sm:$0xff]  }
 0xdb9   : > { %v4835_v10 = vpop.f32.mrf.mxu0  ;;  %v5473_v63 = vsel %vm5467_vm4, %v5424_v57, %v5426_v27  ;;  %v8879_v57 = vld [vmem:[#allocation11 + $0x80] ss:$12 sps:$4 sm:$0xff]   ;;  %v8880_v27 = vld [vmem:[#allocation11 + $0x128] ss:$12 sps:$4 sm:$0xff]  }
 0xdba   : > { %4997 = vmatprep.subr.mxu1 %v4955_v8  ;;  %7868 = vmatpush3.bf16.msra.mxu0 %v5473_v63  ;;  %v8873_v8 = vld [vmem:[#allocation11] ss:$12 sps:$4 sm:$0xff]   ;;  %v8882_v63 = vld [vmem:[#allocation11 + $0x110] ss:$12 sps:$4 sm:$0xff]  }
 0xdbb   : > { %v4836_v19 = vpop.f32.mrf.mxu0  ;;  %4998 = vmatpush1.msra.mxu1 %v4953_v9  ;;  %v9947_v9 = vld [vmem:[%s10258_s17] sm:$0xff]  ;;  %v9952_v10 = vld [vmem:[%s10258_s17 + $0x8] sm:$0xff] }
 0xdbc   : > { %7542 = vmatmul.mubr.msk.f32.vlgmr.msra.gmra.mxu1 %vm1066_vm2, %v4960_v37  ;;  %7841 = vmatprep.subr.bf16.mxu1 %v8858_v11  ;;  %v5452_v30 = vpop.permute.xlu1 %5451  ;;  %v9961_v11 = vld [vmem:[%s10258_s17 + $0x10] sm:$0xff]  ;;  %v8876_v19 = vld [vmem:[#allocation11 + $0x158] ss:$12 sps:$4 sm:$0xff]  }
 0xdbd   : > { %5037 = vmatprep.mubr.f32.mxu1 %v9204_v0  ;;  %7842 = vmatpush3.bf16.msra.mxu1 %v8859_v47  ;;  %v5480_v35 = vsel %vm5467_vm4, %v5452_v30, %v5454_v31  ;;  %v8864_v0 = vld [vmem:[#allocation11 + $0x120] ss:$12 sps:$4 sm:$0xff]   ;;  %v8875_v47 = vld [vmem:[#allocation11 + $0xb0] ss:$12 sps:$4 sm:$0xff]   ;;  %v8884_v30 = vld [vmem:[#allocation11 + $0xf8] ss:$12 sps:$4 sm:$0xff]  }
 0xdbe   : > { %7843 = vmatprep.subr.bf16.mxu1 %v8860_v23  ;;  %7869 = vmatprep.subr.bf16.mxu0 %v5480_v35  ;;  %v8878_v23 = vld [vmem:[#allocation11 + $0x140] ss:$12 sps:$4 sm:$0xff]   ;;  %v8885_v31 = vld [vmem:[#allocation11 + $0x38] ss:$12 sps:$4 sm:$0xff]  }
 0xdbf   : > { %5545 = vrot.lane.b32.xlu1 %v9947_v9, %s9207_s12  ;;  %5547 = vrot.lane.b32.xlu0 %v9952_v10, %s9207_s12  ;;  %v8887_v35 = vld [vmem:[#allocation11 + $0x20] ss:$12 sps:$4 sm:$0xff]  }
 0xdc0   : > { %7543 = vmatmul.mubr.msk.f32.gmra.mxu1 %vm1066_vm2, %v4962_v60  ;;  %v5420_v16 = vpop.permute.xlu1 %5419  ;;  %v5442_v60 = vpop.permute.xlu0 %5441 }
 0xdc1   : > { %7844 = vmatpush3.bf16.msra.mxu1 %v8861_v2  ;;  %v5472_v40 = vsel %vm5467_vm4, %v5420_v16, %v5422_v38  ;;  %v8881_v2 = vld [vmem:[#allocation11 + $0x68] ss:$12 sps:$4 sm:$0xff]  }
 0xdc2   : > { %7845 = vmatprep.subr.bf16.mxu1 %v8862_v12  ;;  %7870 = vmatpush3.bf16.msra.mxu0 %v5472_v40  ;;  %v8883_v12 = vld [vmem:[#allocation11 + $0x50] ss:$12 sps:$4 sm:$0xff]   ;;  %v8888_v40 = vld [vmem:[#allocation11 + $0xc8] ss:$12 sps:$4 sm:$0xff]  }
 0xdc3   : > { %5549 = vrot.lane.b32.xlu1 %v9961_v11, %s9207_s12  ;;  %5551 = vrot.lane.b32.xlu0 %v9966_v13, %s9207_s12 }
 0xdc4   : > { %v5448_v41 = vpop.permute.xlu1 %5447  ;;  %v5410_v34 = vpop.permute.xlu0 %5409 }
 0xdc5   : > { %7846 = vmatpush3.bf16.msra.mxu1 %v8863_v14  ;;  %v5479_v51 = vsel %vm5467_vm4, %v5448_v41, %v5450_v42  ;;  %v8886_v14 = vld [vmem:[#allocation11 + $0xe0] ss:$12 sps:$4 sm:$0xff]   ;;  %v8889_v41 = vld [vmem:[#allocation11 + $0x8] ss:$12 sps:$4 sm:$0xff]  }
 0xdc6   : > { %7847 = vmatprep.subr.bf16.mxu1 %v8864_v0  ;;  %7871 = vmatprep.subr.bf16.mxu0 %v5479_v51 }
 0xdc7   : > { %6037 = vrot.lane.b32.xlu1 %v9947_v9, %s9212_s2  ;;  %6284 = vrot.lane.b32.xlu0 %v8874_v15, %s9212_s2 }
 0xdc8   : > { %v5416_v44 = vpop.permute.xlu1 %5415  ;;  %v5438_v56 = vpop.permute.xlu0 %5437 }
 0xdc9   : > { %7848 = vmatpush3.bf16.msra.mxu1 %v8865_v39  ;;  %v5471_v45 = vsel %vm5467_vm4, %v5416_v44, %v5418_v49 }
 0xdca   : > { %7872 = vmatpush3.bf16.msra.mxu0 %v5471_v45  ;;  %7849 = vmatprep.subr.bf16.mxu1 %v8866_v53 }
 0xdcb   : > { %6039 = vrot.lane.b32.xlu1 %v9952_v10, %s9212_s2  ;;  %6268 = vrot.lane.b32.xlu0 %v8875_v47, %s9212_s2 }
 0xdcc   : > { %v5444_v36 = vpop.permute.xlu1 %5443  ;;  %v5406_v59 = vpop.permute.xlu0 %5405 }
 0xdcd   : > { %v5478_v48 = vsel %vm5467_vm4, %v5444_v36, %v5446_v46  ;;  %7850 = vmatpush3.bf16.msra.mxu1 %v8867_v55 }
 0xdce   : > { %7873 = vmatprep.subr.bf16.mxu0 %v5478_v48  ;;  %7851 = vmatprep.subr.bf16.mxu1 %v8868_v3 }
 0xdcf   : > { %6282 = vrot.lane.b32.xlu1 %v8876_v19, %s9212_s2  ;;  %6266 = vrot.lane.b32.xlu0 %v8877_v21, %s9212_s2 }
 0xdd0   : > { %v5412_v43 = vpop.permute.xlu1 %5411  ;;  %v5962_v62 = vpop.permute.xlu0 %5961 }
 0xdd1   : > { %v5470_v28 = vsel %vm5467_vm4, %v5412_v43, %v5414_v50  ;;  %7852 = vmatpush3.bf16.msra.mxu1 %v8869_v4 }
 0xdd2   : > { %7874 = vmatpush3.bf16.msra.mxu0 %v5470_v28  ;;  %7853 = vmatprep.subr.bf16.mxu1 %v8870_v5 }
 0xdd3   : > { %6280 = vrot.lane.b32.xlu1 %v8878_v23, %s9212_s2  ;;  %6264 = vrot.lane.b32.xlu0 %v8879_v57, %s9212_s2 }
 0xdd4   : > { %v5440_v37 = vpop.permute.xlu1 %5439  ;;  %v5930_v16 = vpop.permute.xlu0 %5929 }
 0xdd5   : > { %v5477_v32 = vsel %vm5467_vm4, %v5440_v37, %v5442_v60  ;;  %7854 = vmatpush3.bf16.msra.mxu1 %v8871_v6  ;;  %v5048_v60 = vld [vmem:[%s10256_s15] sm:$0x3] }
 0xdd6   : > { %7875 = vmatprep.subr.bf16.mxu0 %v5477_v32  ;;  %7855 = vmatprep.subr.bf16.mxu1 %v8872_v7  ;;  %v5056_v32 = vsub.s32 1, %v9538_v22 }
 0xdd7   : > { %6278 = vrot.lane.b32.xlu1 %v8880_v27, %s9212_s2  ;;  %6262 = vrot.lane.b32.xlu0 %v8881_v2, %s9212_s2 }
 0xdd8   : > { %v5408_v33 = vpop.permute.xlu1 %5407 }
 0xdd9   : > { %v5469_v52 = vsel %vm5467_vm4, %v5408_v33, %v5410_v34  ;;  %7856 = vmatpush3.bf16.msra.mxu1 %v8873_v8 }
 0xdda   : > { %7876 = vmatpush3.bf16.msra.mxu0 %v5469_v52  ;;  %v5053_v52 = vrot.slane %v5048_v60, %v851_v24 }
 0xddb   : > { %6276 = vrot.lane.b32.xlu1 %v8882_v63, %s9212_s2  ;;  %6260 = vrot.lane.b32.xlu0 %v8883_v12, %s9212_s2 }
 0xddc   : > { %v5436_v54 = vpop.permute.xlu1 %5435 }
 0xddd   : > { %v5476_v26 = vsel %vm5467_vm4, %v5436_v54, %v5438_v56 }
 0xdde   : > { %7877 = vmatprep.subr.bf16.mxu0 %v5476_v26  ;;  %v5057_v26 = vrot.slane %v5048_v60, %v5056_v32 }
 0xddf   : > { %6274 = vrot.lane.b32.xlu1 %v8884_v30, %s9212_s2  ;;  %6258 = vrot.lane.b32.xlu0 %v8885_v31, %s9212_s2 }
 0xde0   : > { %v5404_v58 = vpop.permute.xlu1 %5403 }
 0xde1   : > { %v5468_v61 = vsel %vm5467_vm4, %v5404_v58, %v5406_v59 }
 0xde2   : > { %7878 = vmatpush3.bf16.msra.mxu0 %v5468_v61 }
 0xde3   : > { %6272 = vrot.lane.b32.xlu1 %v8886_v14, %s9212_s2  ;;  %6256 = vrot.lane.b32.xlu0 %v8887_v35, %s9212_s2 }
 0xde4   : > { %v5960_v20 = vpop.permute.xlu1 %5959 }
 0xde5   : > { %v5979_v1 = vsel %vm5963_vm5, %v5960_v20, %v5962_v62 }
 0xde6   : > { %7897 = vmatprep.subr.bf16.mxu0 %v5979_v1 }
 0xde7   : > { %6041 = vrot.lane.b32.xlu1 %v9961_v11, %s9212_s2  ;;  %6043 = vrot.lane.b32.xlu0 %v9966_v13, %s9212_s2 }
 0xde8   : > { %v5928_v0 = vpop.permute.xlu1 %5927 }
 0xde9   : > { %v5971_v47 = vsel %vm5963_vm5, %v5928_v0, %v5930_v16 }
 0xdeb   : > { %v5958_v39 = vpop.permute.xlu0 %5957  ;;  %6270 = vrot.lane.b32.xlu1 %v8888_v40, %s9212_s2  ;;  %6254 = vrot.lane.b32.xlu0 %v8889_v41, %s9212_s2  ;;  %s9214_s2 = smov [#allocation16]  }
 0xdec   : > { %v5956_v38 = vpop.permute.xlu1 %5955  ;;  %s9110_s12 = sshll.u32 %s9214_s2, 4  ;;  %s9111_s12 = int_to_ptr.vmem [resolvable:$false] %s9110_s12 }
 0xded   : > { %s9112_s23 = scalar_lea.vmem %s9111_s12, 6144 }
 0xdef   : > { %v5926_v51 = vpop.permute.xlu0 %5925  ;;  %6343 = vrot.lane.b32.xlu1 %v9947_v9, %s9213_s5  ;;  %6345 = vrot.lane.b32.xlu0 %v9952_v10, %s9213_s5 }
 0xdf0   : > { %v5924_v42 = vpop.permute.xlu1 %5923 }
 0xdf1   : > { %v5970_v19 = vsel %vm5963_vm5, %v5924_v42, %v5926_v51 }
 0xdf3   : > { %v5954_v49 = vpop.permute.xlu0 %5953  ;;  %6347 = vrot.lane.b32.xlu1 %v9961_v11, %s9213_s5  ;;  %6349 = vrot.lane.b32.xlu0 %v9966_v13, %s9213_s5 }
 0xdf4   : > { %v5952_v44 = vpop.permute.xlu1 %5951 }
 0xdf5   : > { %v5977_v21 = vsel %vm5963_vm5, %v5952_v44, %v5954_v49 }
 0xdf7   : > { %v5922_v36 = vpop.permute.xlu0 %5921 }
 0xdf8   : > { %v5920_v45 = vpop.permute.xlu1 %5919 }
 0xdf9   : > { %v5969_v27 = vsel %vm5963_vm5, %v5920_v45, %v5922_v36 }
 0xdfb   : > { %v5950_v48 = vpop.permute.xlu0 %5949 }
 0xdfc   : > { %v5948_v46 = vpop.permute.xlu1 %5947 }
 0xdfd   : > { %v5976_v2 = vsel %vm5963_vm5, %v5948_v46, %v5950_v48 }
 0xdff   : > { %v5918_v50 = vpop.permute.xlu0 %5917 }
 0xe00   : > { %v5916_v43 = vpop.permute.xlu1 %5915 }
 0xe01   : > { %v5968_v30 = vsel %vm5963_vm5, %v5916_v43, %v5918_v50 }
 0xe03   : > { %v5946_v37 = vpop.permute.xlu0 %5945 }
 0xe04   : > { %v5944_v28 = vpop.permute.xlu1 %5943 }
 0xe05   : > { %v5975_v31 = vsel %vm5963_vm5, %v5944_v28, %v5946_v37 }
 0xe07   : > { %v5914_v59 = vpop.permute.xlu0 %5913 }
 0xe08   : > { %v5912_v58 = vpop.permute.xlu1 %5911 }
 0xe09   : > { %v5967_v14 = vsel %vm5963_vm5, %v5912_v58, %v5914_v59 }
 0xe0b   : > { %v5942_v24 = vpop.permute.xlu0 %5941 }
 0xe0c   : > { %v5940_v22 = vpop.permute.xlu1 %5939 }
 0xe0d   : > { %v5974_v35 = vsel %vm5963_vm5, %v5940_v22, %v5942_v24 }
 0xe0f   : > { %v5910_v15 = vpop.permute.xlu0 %5909 }
 0xe13   : > { %v5938_v57 = vpop.permute.xlu0 %5937 }
 0xe17   : > { %v5906_v12 = vpop.permute.xlu0 %5905 }
 0xe1b   : > { %v5934_v16 = vpop.permute.xlu0 %5933 }
 0xe1f   : > { %v5902_v41 = vpop.permute.xlu0 %5901 }
 0xe31   : > { %v5548_v45 = vpop.permute.xlu0 %5547 }
 0xe35   : > { %v5552_v46 = vpop.permute.xlu0 %5551 }
 0xe39   : > { %v6285_v43 = vpop.permute.xlu0 %6284 }
 0xe7c   : > { %v5033_v33 = vpop.f32.mrf.mxu1 }
 0xe7d   : > { %v5044_v34 = vadd.f32 %v5033_v33, %v9879_v17  ;;  %v6269_v33 = vpop.permute.xlu0 %6268 }
 0xe7e   : > { %v5035_v54 = vpop.f32.mrf.mxu1 }
 0xe7f   : > { %v5045_v56 = vadd.f32 %v5035_v54, %v9882_v18  ;;  %v5060_v20 = vadd.f32 %v5053_v52, %v5044_v34 }
 0xe80   : > { %v5039_v61 = vpop.f32.mrf.mxu1 }
 0xe81   : > { %v5046_v62 = vadd.f32 %v5039_v61, %v9887_v25  ;;  %v5061_v53 = vadd.f32 %v5057_v26, %v5045_v56  ;;  %v5064_v4 = vmax.f32 %v5060_v20, 0.0  ;;  %v5908_v25 = vpop.permute.xlu1 %5907  ;;  %v6267_v61 = vpop.permute.xlu0 %6266 }
 0xe82   : > { %v5041_v1 = vpop.f32.mrf.mxu1 }
 0xe83   : > { %v5062_v55 = vadd.f32 %v5053_v52, %v5046_v62  ;;  %v5047_v3 = vadd.f32 %v5041_v1, %v9890_v29  ;;  %v5065_v6 = vmax.f32 %v5061_v53, 0.0  ;;  %v5978_v29 = vsel %vm5963_vm5, %v5956_v38, %v5958_v39 }
 0xe84   : > { %v5966_v38 = vsel %vm5963_vm5, %v5908_v25, %v5910_v15 }
 0xe85   : > { %v5066_v17 = vmax.f32 %v5062_v55, 0.0  ;;  %v5063_v5 = vadd.f32 %v5057_v26, %v5047_v3  ;;  %v5936_v23 = vpop.permute.xlu1 %5935  ;;  %v6265_v53 = vpop.permute.xlu0 %6264 }
 0xe86   : > { %v5973_v39 = vsel %vm5963_vm5, %v5936_v23, %v5938_v57 }
 0xe87   : > { %v10006_v7 = vpack.c.bf16 %v5066_v17, %v5064_v4  ;;  %v5067_v18 = vmax.f32 %v5063_v5, 0.0 }
 0xe89   : > { %v10008_v8 = vpack.c.bf16 %v5067_v18, %v5065_v6  ;;  %v5904_v63 = vpop.permute.xlu1 %5903  ;;  %v6263_v3 = vpop.permute.xlu0 %6262 }
 0xe8a   : > { %v5965_v51 = vsel %vm5963_vm5, %v5904_v63, %v5906_v12 }
 0xe8b   : > { %5230 = vmatprep.mubr.bf16.mxu1 %v10008_v8  ;;  %5532 = vmatprep.mubr.bf16.mxu0 %v10008_v8 }
 0xe8c   : > { %5231 = vmatmul.mubr.bf16.vlgmr.msra.gmra.mxu1 %v10006_v7  ;;  %5533 = vmatmul.mubr.bf16.vlgmr.msra.gmra.mxu0 %v10006_v7 }
 0xe8d   : > { %7898 = vmatpush3.bf16.msra.mxu0 %v5971_v47  ;;  %6028 = vmatprep.mubr.bf16.mxu0 %v10008_v8  ;;  %v5932_v0 = vpop.permute.xlu1 %5931  ;;  %v6261_v17 = vpop.permute.xlu0 %6260 }
 0xe8e   : > { %7899 = vmatprep.subr.bf16.mxu0 %v5978_v29  ;;  %v5972_v42 = vsel %vm5963_vm5, %v5932_v0, %v5934_v16 }
 0xe91   : > { %7900 = vmatpush3.bf16.msra.mxu0 %v5970_v19  ;;  %v5900_v40 = vpop.permute.xlu1 %5899  ;;  %v6259_v6 = vpop.permute.xlu0 %6258 }
 0xe92   : > { %7901 = vmatprep.subr.bf16.mxu0 %v5977_v21  ;;  %v5964_v44 = vsel %vm5963_vm5, %v5900_v40, %v5902_v41 }
 0xe95   : > { %7902 = vmatpush3.bf16.msra.mxu0 %v5969_v27  ;;  %v5546_v49 = vpop.permute.xlu1 %5545 }
 0xe96   : > { %7903 = vmatprep.subr.bf16.mxu0 %v5976_v2  ;;  %8335 = vmatprep.mubr.msk.f32.mxu1 %vm805_vm1, %v5546_v49 }
 0xe99   : > { %7904 = vmatpush3.bf16.msra.mxu0 %v5968_v30  ;;  %v5550_v36 = vpop.permute.xlu1 %5549 }
 0xe9a   : > { %7905 = vmatprep.subr.bf16.mxu0 %v5975_v31 }
 0xe9d   : > { %7906 = vmatpush3.bf16.msra.mxu0 %v5967_v14  ;;  %v6038_v48 = vpop.permute.xlu1 %6037 }
 0xe9e   : > { %7907 = vmatprep.subr.bf16.mxu0 %v5974_v35 }
 0xea1   : > { %7908 = vmatpush3.bf16.msra.mxu0 %v5966_v38  ;;  %v6040_v37 = vpop.permute.xlu1 %6039 }
 0xea2   : > { %7909 = vmatprep.subr.bf16.mxu0 %v5973_v39 }
 0xea5   : > { %7910 = vmatpush3.bf16.msra.mxu0 %v5965_v51  ;;  %v6283_v26 = vpop.permute.xlu1 %6282 }
 0xea6   : > { %7911 = vmatprep.subr.bf16.mxu0 %v5972_v42 }
 0xea9   : > { %7912 = vmatpush3.bf16.msra.mxu0 %v5964_v44  ;;  %v6281_v1 = vpop.permute.xlu1 %6280 }
 0xeac   : > { %6029 = vmatmul.mubr.bf16.vlgmr.msra.gmra.mxu0 %v10006_v7 }
 0xead   : > { %v6279_v55 = vpop.permute.xlu1 %6278 }
 0xeb1   : > { %v6277_v4 = vpop.permute.xlu1 %6276 }
 0xeb5   : > { %v6275_v5 = vpop.permute.xlu1 %6274 }
 0xeb9   : > { %v6273_v18 = vpop.permute.xlu1 %6272 }
 0xf4c   : > { %v7857_v50 = vpop.f32.mrf.mxu1  ;;  %v7879_v28 = vpop.f32.mrf.mxu0 }
 0xf4e   : > { %v7858_v60 = vpop.f32.mrf.mxu1  ;;  %v7880_v32 = vpop.f32.mrf.mxu0 }
 0xf4f   : > { %v7881_v59 = vadd.f32 %v7880_v32, %v7879_v28  ;;  %v7859_v62 = vadd.f32 %v7858_v60, %v7857_v50  ;;  %v6752_v60 = vld [vmem:[#allocation14 + $0xb0] sm:$0xff]  ;;  %v6751_v32 = vld [vmem:[#allocation14 + $0xa0] sm:$0xff] }
 0xf50   : > { %v7860_v34 = vpop.f32.mrf.mxu1  ;;  %v7882_v52 = vpop.f32.mrf.mxu0  ;;  %6787 = vrot.lane.b32.xlu1 %v6752_v60, %s9211_s26  ;;  %6785 = vrot.lane.b32.xlu0 %v6751_v32, %s9211_s26 }
 0xf52   : > { %v7883_v54 = vpop.f32.mrf.mxu0  ;;  %v7861_v58 = vpop.f32.mrf.mxu1 }
 0xf53   : > { %v7884_v56 = vadd.f32 %v7883_v54, %v7882_v52  ;;  %v7862_v20 = vadd.f32 %v7861_v58, %v7860_v34  ;;  %v6749_v34 = vld [vmem:[#allocation14 + $0x80] sm:$0xff]  ;;  %v6748_v52 = vld [vmem:[#allocation14 + $0x70] sm:$0xff] }
 0xf54   : > { %6781 = vrot.lane.b32.xlu0 %v6749_v34, %s9211_s26  ;;  %v6747_v54 = vld [vmem:[#allocation14 + $0x60] sm:$0xff]  ;;  %v6744_v58 = vld [vmem:[#allocation14 + $0x30] sm:$0xff] }
 0xf55   : > { %8331 = vmatprep.subr.mxu1 %v7884_v56 }
 0xf56   : > { %8332 = vmatpush3.msra.mxu1 %v7884_v56  ;;  %v6746_v56 = vld [vmem:[#allocation14 + $0x50] sm:$0xff] }
 0xf57   : > { %8333 = vmatprep.subr.mxu1 %v7881_v59 }
 0xf58   : > { %8334 = vmatpush3.msra.mxu1 %v7881_v59  ;;  %6777 = vrot.lane.b32.xlu0 %v6747_v54, %s9211_s26  ;;  %v6743_v59 = vld [vmem:[#allocation14 + $0x20] sm:$0xff] }
 0xf59   : > { %8341 = vmatprep.subr.mxu1 %v7862_v20  ;;  %8336 = vmatmul.mubr.msk.f32.vlgmr.msra.gmra.mxu1 %vm805_vm1, %v5548_v45 }
 0xf5a   : > { %8342 = vmatpush3.msra.mxu1 %v7862_v20  ;;  %8338 = vmatprep.mubr.msk.f32.mxu1 %vm805_vm1, %v5550_v36  ;;  %v6741_v20 = vld [vmem:[#allocation14] sm:$0xff] }
 0xf5b   : > { %8343 = vmatprep.subr.mxu1 %v7859_v62 }
 0xf5c   : > { %8344 = vmatpush3.msra.mxu1 %v7859_v62 }
 0xf5d   : > { %8339 = vmatmul.mubr.msk.f32.gmra.mxu1 %vm805_vm1, %v5552_v46 }
 0xf5e   : > { %8345 = vmatprep.mubr.msk.f32.mxu1 %vm805_vm1, %v9947_v9 }
 0xf61   : > { %8346 = vmatmul.mubr.msk.f32.vlgmr.msra.gmra.mxu1 %vm805_vm1, %v9952_v10  ;;  %v6257_v10 = vpop.permute.xlu0 %6256 }
 0xf62   : > { %8348 = vmatprep.mubr.msk.f32.mxu1 %vm805_vm1, %v9961_v11  ;;  %v6042_v11 = vpop.permute.xlu1 %6041 }
 0xf65   : > { %8349 = vmatmul.mubr.msk.f32.gmra.mxu1 %vm805_vm1, %v9966_v13  ;;  %v6044_v13 = vpop.permute.xlu0 %6043 }
 0xf66   : > { %8355 = vmatprep.mubr.msk.f32.mxu1 %vm805_vm1, %v6038_v48  ;;  %v6271_v29 = vpop.permute.xlu1 %6270 }
 0xf69   : > { %v6255_v19 = vpop.permute.xlu0 %6254 }
 0xf6a   : > { %v6344_v21 = vpop.permute.xlu1 %6343 }
 0xf6b   : > { %8365 = vmatprep.mubr.msk.f32.mxu0 %vm805_vm1, %v6344_v21  ;;  %v6458_v21 = vld [vmem:[%s10261_s20 + $0x30] sm:$0xff] }
 0xf6c   : > { %v7913_v22 = vpop.f32.mrf.mxu0 }
 0xf6d   : > { %v6346_v48 = vpop.permute.xlu0 %6345 }
 0xf6e   : > { %v7914_v24 = vpop.f32.mrf.mxu0  ;;  %v6348_v50 = vpop.permute.xlu1 %6347 }
 0xf6f   : > { %v7915_v47 = vadd.f32 %v7914_v24, %v7913_v22 }
 0xf70   : > { %v7916_v9 = vpop.f32.mrf.mxu0 }
 0xf71   : > { %v6350_v28 = vpop.permute.xlu0 %6349 }
 0xf72   : > { %v7917_v25 = vpop.f32.mrf.mxu0 }
 0xf73   : > { %v7918_v15 = vadd.f32 %v7917_v25, %v7916_v9  ;;  %v6454_v25 = vld [vmem:[%s10261_s20 + $0x10] sm:$0xff] }
 0xf75   : > { %8351 = vmatprep.subr.mxu1 %v7918_v15 }
 0xf76   : > { %8352 = vmatpush3.msra.mxu1 %v7918_v15 }
 0xf77   : > { %8353 = vmatprep.subr.mxu1 %v7915_v47 }
 0xf78   : > { %8354 = vmatpush3.msra.mxu1 %v7915_v47  ;;  %v6455_v47 = vld [vmem:[%s10261_s20 + $0x18] sm:$0xff] }
 0xf79   : > { %8356 = vmatmul.mubr.msk.f32.vlgmr.msra.gmra.mxu1 %vm805_vm1, %v6040_v37  ;;  %7925 = vmatprep.subr.bf16.mxu1 %v6285_v43  ;;  %v6452_v37 = vld [vmem:[%s10261_s20] sm:$0xff] }
 0xf7a   : > { %7926 = vmatpush3.bf16.msra.mxu1 %v6269_v33  ;;  %8358 = vmatprep.mubr.msk.f32.mxu1 %vm805_vm1, %v6042_v11  ;;  %v6750_v33 = vld [vmem:[#allocation14 + $0x90] sm:$0xff]  ;;  %v6456_v11 = vld [vmem:[%s10261_s20 + $0x20] sm:$0xff] }
 0xf7b   : > { %7927 = vmatprep.subr.bf16.mxu1 %v6283_v26  ;;  %6783 = vrot.lane.b32.xlu1 %v6750_v33, %s9211_s26  ;;  %v6745_v26 = vld [vmem:[#allocation14 + $0x40] sm:$0xff] }
 0xf7c   : > { %6773 = vrot.lane.b32.xlu0 %v6745_v26, %s9211_s26 }
 0xf7d   : > { %8359 = vmatmul.mubr.msk.f32.gmra.mxu1 %vm805_vm1, %v6044_v13 }
 0xf7e   : > { %7928 = vmatpush3.bf16.msra.mxu1 %v6267_v61  ;;  %6334 = vmatprep.mubr.bf16.mxu1 %v10008_v8  ;;  %v6742_v61 = vld [vmem:[#allocation14 + $0x10] sm:$0xff] }
 0xf7f   : > { %7929 = vmatprep.subr.bf16.mxu1 %v6281_v1  ;;  %6779 = vrot.lane.b32.xlu1 %v6748_v52, %s9211_s26 }
 0xf80   : > { %6769 = vrot.lane.b32.xlu0 %v6743_v59, %s9211_s26 }
 0xf82   : > { %7930 = vmatpush3.bf16.msra.mxu1 %v6265_v53 }
 0xf83   : > { %7931 = vmatprep.subr.bf16.mxu1 %v6279_v55  ;;  %6775 = vrot.lane.b32.xlu1 %v6746_v56, %s9211_s26 }
 0xf84   : > { %6765 = vrot.lane.b32.xlu0 %v6741_v20, %s9211_s26 }
 0xf86   : > { %7932 = vmatpush3.bf16.msra.mxu1 %v6263_v3 }
 0xf87   : > { %7933 = vmatprep.subr.bf16.mxu1 %v6277_v4  ;;  %6771 = vrot.lane.b32.xlu1 %v6744_v58, %s9211_s26 }
 0xf8a   : > { %7934 = vmatpush3.bf16.msra.mxu1 %v6261_v17 }
 0xf8b   : > { %7935 = vmatprep.subr.bf16.mxu1 %v6275_v5  ;;  %6767 = vrot.lane.b32.xlu1 %v6742_v61, %s9211_s26  ;;  %s8499_s26 = smul.u32 192, %s787_s29 }
 0xf8d   : > { %s10140_s1 = scalar_lea.vmem [#allocation16], %s8499_s26 }
 0xf8e   : > { %7936 = vmatpush3.bf16.msra.mxu1 %v6259_v6  ;;  %s7055_s22 = sshll.u32 %s10140_s1, 4  ;;  %s10193_s22 = int_to_ptr.vmem [resolvable:$true] %s7055_s22 }
 0xf8f   : > { %7937 = vmatprep.subr.bf16.mxu1 %v6273_v18  ;;  %v6453_v18 = vld [vmem:[%s10261_s20 + $0x8] sm:$0xff]  ;;  %s9106_s0 = scalar_lea.vmem %s10193_s22, 3072  ;;  %p9113_p7 = scmp.lt.s32.totalorder %s10193_s22, %s9111_s12 }
 0xf90   : > { %p9107_p4 = scmp.ne.s32.totalorder %s10193_s22, %s9106_s0  ;;  %p9114_p8 = scmp.lt.s32.totalorder %s9112_s23, %s9106_s0 }
 0xf92   : > { %7938 = vmatpush3.bf16.msra.mxu1 %v6257_v10  ;;  %p9108_p13 = pnand %p9107_p4, %p9370_p5  ;;  %p9115_p0 = por %p9114_p8, %p9113_p7 }
 0xf93   : > { %7939 = vmatprep.subr.bf16.mxu1 %v6271_v29 }
 0xf94   : > { %p9109_p2 = pneg %p9108_p13 }
 0xf96   : > { %7940 = vmatpush3.bf16.msra.mxu1 %v6255_v19  ;;  %v6457_v19 = vld [vmem:[%s10261_s20 + $0x28] sm:$0xff]  ;;  %p9116_p12 = pnand %p9115_p0, %p9109_p2 }
 0xf97   : > { %8391 = vmatprep.subr.mxu1 %v6752_v60 }
 0xf99   : > { %6335 = vmatmul.mubr.bf16.vlgmr.msra.gmra.mxu1 %v10006_v7 }
 0xf9a   : > { %8392 = vmatpush3.msra.mxu1 %v6752_v60 }
 0xf9b   : > { %8393 = vmatprep.subr.mxu1 %v6751_v32 }
 0xf9c   : > { %8394 = vmatpush3.msra.mxu1 %v6751_v32 }
 0xf9d   : > { %8395 = vmatprep.subr.mxu1 %v6750_v33 }
 0xf9e   : > { %8396 = vmatpush3.msra.mxu1 %v6750_v33 }
 0xf9f   : > { %8397 = vmatprep.subr.mxu1 %v6749_v34 }
 0xfa0   : > { %8398 = vmatpush3.msra.mxu1 %v6749_v34 }
 0xfa1   : > { %8399 = vmatprep.subr.mxu1 %v6748_v52 }
 0xfa2   : > { %8400 = vmatpush3.msra.mxu1 %v6748_v52 }
 0xfa3   : > { %8401 = vmatprep.subr.mxu1 %v6747_v54 }
 0xfa4   : > { %8402 = vmatpush3.msra.mxu1 %v6747_v54 }
 0xfa5   : > { %8403 = vmatprep.subr.mxu1 %v6746_v56 }
 0xfa6   : > { %8404 = vmatpush3.msra.mxu1 %v6746_v56 }
 0xfa7   : > { %8405 = vmatprep.subr.mxu1 %v6745_v26 }
 0xfa8   : > { %8406 = vmatpush3.msra.mxu1 %v6745_v26 }
 0xfa9   : > { %8407 = vmatprep.subr.mxu1 %v6744_v58 }
 0xfaa   : > { %8408 = vmatpush3.msra.mxu1 %v6744_v58 }
 0xfab   : > { %8409 = vmatprep.subr.mxu1 %v6743_v59 }
 0xfac   : > { %8410 = vmatpush3.msra.mxu1 %v6743_v59 }
 0xfad   : > { %8411 = vmatprep.subr.mxu1 %v6742_v61 }
 0xfae   : > { %8412 = vmatpush3.msra.mxu1 %v6742_v61 }
 0xfaf   : > { %8413 = vmatprep.subr.mxu1 %v6741_v20 }
 0xfb0   : > { %8414 = vmatpush3.msra.mxu1 %v6741_v20 }
 0xfc2   : > { %v6788_v15 = vpop.permute.xlu1 %6787  ;;  %v6786_v10 = vpop.permute.xlu0 %6785 }
 0xfc6   : > { %v6782_v29 = vpop.permute.xlu0 %6781 }
 0xfed   : > { %v6784_v13 = vpop.permute.xlu1 %6783 }
0x1019   : > { %v8337_v8 = vpop.f32.mrf.mxu1 }
0x101b   : > { %v5627_v23 = vpop.f32.mrf.mxu1 }
0x101d   : > { %v8340_v57 = vpop.f32.mrf.mxu1 }
0x101f   : > { %v5637_v27 = vpop.f32.mrf.mxu1 }
0x1021   : > { %v8347_v2 = vpop.f32.mrf.mxu1 }
0x1022   : > { %v5726_v63 = vadd.f32 %v8347_v2, %v8337_v8  ;;  %v6780_v8 = vpop.permute.xlu1 %6779 }
0x1023   : > { %v5720_v12 = vpop.f32.mrf.mxu1 }
0x1024   : > { %v5721_v30 = vadd.f32 %v5720_v12, %v5627_v23  ;;  %v6778_v23 = vpop.permute.xlu0 %6777 }
0x1025   : > { %v8350_v31 = vpop.f32.mrf.mxu1 }
0x1026   : > { %v5736_v14 = vadd.f32 %v8350_v31, %v8340_v57  ;;  %v6459_v57 = vld [vmem:[%s10261_s20 + $0x38] sm:$0xff] }
0x1027   : > { %v5730_v35 = vpop.f32.mrf.mxu1 }
0x1028   : > { %v5731_v0 = vadd.f32 %v5730_v35, %v5637_v27  ;;  %v6776_v27 = vpop.permute.xlu1 %6775  ;;  %v6774_v2 = vpop.permute.xlu0 %6773 }
0x102c   : > { %v6770_v12 = vpop.permute.xlu0 %6769 }
0x1030   : > { %v6766_v31 = vpop.permute.xlu0 %6765 }
0x1039   : > { %v8357_v16 = vpop.f32.mrf.mxu1 }
0x103a   : > { %v10054_v38 = vadd.f32 %v8357_v16, %v5726_v63  ;;  %v6772_v63 = vpop.permute.xlu1 %6771  ;;  %v6925_v16 = vld [vmem:[#allocation14 + $0xa8] sm:$0xff] }
0x103b   : > { %v6119_v39 = vpop.f32.mrf.mxu1 }
0x103c   : > { %v10056_v7 = vadd.f32 %v6119_v39, %v5721_v30  ;;  %v6924_v39 = vld [vmem:[#allocation14 + $0x98] sm:$0xff] }
0x103d   : > { %v8360_v40 = vpop.f32.mrf.mxu1 }
0x103e   : > { %v10058_v41 = vadd.f32 %v8360_v40, %v5736_v14  ;;  %v6768_v30 = vpop.permute.xlu1 %6767  ;;  %v6926_v14 = vld [vmem:[#allocation14 + $0xb8] sm:$0xff]  ;;  %v6923_v40 = vld [vmem:[#allocation14 + $0x88] sm:$0xff] }
0x103f   : > { %v6129_v42 = vpop.f32.mrf.mxu1  ;;  %8463 = vmatprep.subr.mxu1 %v6926_v14 }
0x1040   : > { %v10060_v51 = vadd.f32 %v6129_v42, %v5731_v0  ;;  %v6922_v42 = vld [vmem:[#allocation14 + $0x78] sm:$0xff] }
0x1059   : > { %v7941_v44 = vpop.f32.mrf.mxu1 }
0x105b   : > { %v7942_v49 = vpop.f32.mrf.mxu1 }
0x105c   : > { %v7943_v43 = vadd.f32 %v7942_v49, %v7941_v44  ;;  %v6921_v44 = vld [vmem:[#allocation14 + $0x68] sm:$0xff] }
0x105d   : > { %v7944_v45 = vpop.f32.mrf.mxu1 }
0x105f   : > { %v7945_v36 = vpop.f32.mrf.mxu1 }
0x1060   : > { %v7946_v46 = vadd.f32 %v7945_v36, %v7944_v45  ;;  %v6920_v45 = vld [vmem:[#allocation14 + $0x58] sm:$0xff] }
0x1062   : > { %8361 = vmatprep.subr.mxu0 %v7946_v46 }
0x1063   : > { %8362 = vmatpush3.msra.mxu0 %v7946_v46  ;;  %v6919_v46 = vld [vmem:[#allocation14 + $0x48] sm:$0xff] }
0x1064   : > { %8363 = vmatprep.subr.mxu0 %v7943_v43 }
0x1065   : > { %8364 = vmatpush3.msra.mxu0 %v7943_v43  ;;  %v6917_v43 = vld [vmem:[#allocation14 + $0x28] sm:$0xff] }
0x1066   : > { %8366 = vmatmul.mubr.msk.f32.vlgmr.msra.gmra.mxu0 %vm805_vm1, %v6346_v48  ;;  %v6918_v48 = vld [vmem:[#allocation14 + $0x38] sm:$0xff] }
0x1067   : > { %8368 = vmatprep.mubr.msk.f32.mxu0 %vm805_vm1, %v6348_v50  ;;  %v6916_v50 = vld [vmem:[#allocation14 + $0x18] sm:$0xff] }
0x106a   : > { %8369 = vmatmul.mubr.msk.f32.gmra.mxu0 %vm805_vm1, %v6350_v28  ;;  %v6915_v28 = vld [vmem:[#allocation14 + $0x8] sm:$0xff] }
0x106b   : > { %8379 = vmatprep.mubr.msk.f32.mxu0 %vm5467_vm4, %v6452_v37 }
0x1126   : > { %v8367_v62 = vpop.f32.mrf.mxu0 }
0x1127   : > { %v6445_v4 = vadd.f32 %v8367_v62, %v10054_v38 }
0x1128   : > { %v6425_v1 = vpop.f32.mrf.mxu0 }
0x1129   : > { %v6444_v5 = vadd.f32 %v6425_v1, %v10056_v7 }
0x112a   : > { %v8370_v53 = vpop.f32.mrf.mxu0 }
0x112b   : > { %v6447_v55 = vadd.f32 %v8370_v53, %v10058_v41 }
0x112c   : > { %v6435_v3 = vpop.f32.mrf.mxu0 }
0x112d   : > { %8890 = vtanh.f32 %v6447_v55  ;;  %v6446_v17 = vadd.f32 %v6435_v3, %v10060_v51 }
0x112f   : > { %8892 = vtanh.f32 %v6446_v17 }
0x1130   : > { %8894 = vtanh.f32 %v6445_v4 }
0x1131   : > { %8896 = vtanh.f32 %v6444_v5 }
0x113a   : > { %v8891_v22 = vpop.eup %8890 }
0x113b   : > { %8371 = vmatprep.subr.mxu0 %v8891_v22 }
0x113c   : > { %v8893_v24 = vpop.eup %8892  ;;  %8372 = vmatpush3.msra.mxu0 %v8891_v22 }
0x113d   : > { %8373 = vmatprep.subr.mxu0 %v8893_v24  ;;  %v8895_v6 = vpop.eup %8894 }
0x113e   : > { %8374 = vmatpush3.msra.mxu0 %v8893_v24  ;;  %v8897_v9 = vpop.eup %8896 }
0x113f   : > { %8375 = vmatprep.subr.mxu0 %v8895_v6 }
0x1140   : > { %8376 = vmatpush3.msra.mxu0 %v8895_v6 }
0x1141   : > { %8377 = vmatprep.subr.mxu0 %v8897_v9 }
0x1142   : > { %8378 = vmatpush3.msra.mxu0 %v8897_v9 }
0x1143   : > { %8380 = vmatmul.mubr.msk.f32.vlgmr.msra.gmra.mxu0 %vm5467_vm4, %v6453_v18  ;;  %8427 = vmatprep.subr.mxu0 %v6788_v15 }
0x1144   : > { %8382 = vmatprep.mubr.msk.f32.mxu0 %vm5467_vm4, %v6454_v25  ;;  %8428 = vmatpush3.msra.mxu0 %v6788_v15 }
0x1145   : > { %8429 = vmatprep.subr.mxu0 %v6786_v10 }
0x1146   : > { %8430 = vmatpush3.msra.mxu0 %v6786_v10 }
0x1147   : > { %8383 = vmatmul.mubr.msk.f32.gmra.mxu0 %vm5467_vm4, %v6455_v47  ;;  %8431 = vmatprep.subr.mxu0 %v6784_v13 }
0x1148   : > { %8385 = vmatprep.mubr.msk.f32.mxu0 %vm5467_vm4, %v6456_v11  ;;  %8432 = vmatpush3.msra.mxu0 %v6784_v13 }
0x1149   : > { %8433 = vmatprep.subr.mxu0 %v6782_v29 }
0x114a   : > { %8434 = vmatpush3.msra.mxu0 %v6782_v29 }
0x114b   : > { %8386 = vmatmul.mubr.msk.f32.gmra.mxu0 %vm5467_vm4, %v6457_v19  ;;  %8435 = vmatprep.subr.mxu0 %v6780_v8 }
0x114c   : > { %8388 = vmatprep.mubr.msk.f32.mxu0 %vm5467_vm4, %v6458_v21  ;;  %8436 = vmatpush3.msra.mxu0 %v6780_v8 }
0x114d   : > { %8437 = vmatprep.subr.mxu0 %v6778_v23 }
0x114e   : > { %8438 = vmatpush3.msra.mxu0 %v6778_v23 }
0x114f   : > { %8389 = vmatmul.mubr.msk.f32.gmra.mxu0 %vm5467_vm4, %v6459_v57  ;;  %8439 = vmatprep.subr.mxu0 %v6776_v27 }
0x1150   : > { %8440 = vmatpush3.msra.mxu0 %v6776_v27 }
0x1151   : > { %8441 = vmatprep.subr.mxu0 %v6774_v2 }
0x1152   : > { %8442 = vmatpush3.msra.mxu0 %v6774_v2 }
0x1153   : > { %8443 = vmatprep.subr.mxu0 %v6772_v63 }
0x1154   : > { %8444 = vmatpush3.msra.mxu0 %v6772_v63 }
0x1155   : > { %8445 = vmatprep.subr.mxu0 %v6770_v12 }
0x1156   : > { %8446 = vmatpush3.msra.mxu0 %v6770_v12 }
0x1157   : > { %8447 = vmatprep.subr.mxu0 %v6768_v30 }
0x1158   : > { %8448 = vmatpush3.msra.mxu0 %v6768_v30 }
0x1159   : > { %8449 = vmatprep.subr.mxu0 %v6766_v31 }
0x115a   : > { %8450 = vmatpush3.msra.mxu0 %v6766_v31 }
0x1203   : > { %v8381_v35 = vpop.f32.mrf.mxu0 }
0x1205   : > { %v6551_v0 = vpop.f32.mrf.mxu0 }
0x1206   : > { %8415 = vmatprep.mubr.msk.f32.mxu1 %vm6602_vm6, %v6551_v0  ;;  %8451 = vmatprep.mubr.msk.f32.mxu0 %vm6602_vm6, %v6551_v0 }
0x1207   : > { %v8384_v38 = vpop.f32.mrf.mxu0  ;;  %8416 = vmatmul.mubr.msk.f32.vlgmr.msra.gmra.mxu1 %vm6602_vm6, %v8381_v35  ;;  %8452 = vmatmul.mubr.msk.f32.vlgmr.msra.gmra.mxu0 %vm6602_vm6, %v8381_v35 }
0x1208   : > { %8464 = vmatpush3.msra.mxu1 %v6926_v14 }
0x1209   : > { %8465 = vmatprep.subr.mxu1 %v6925_v16  ;;  %v6561_v7 = vpop.f32.mrf.mxu0 }
0x120a   : > { %8466 = vmatpush3.msra.mxu1 %v6925_v16  ;;  %8418 = vmatprep.mubr.msk.f32.mxu1 %vm6602_vm6, %v6561_v7 }
0x120b   : > { %8467 = vmatprep.subr.mxu1 %v6924_v39  ;;  %v8387_v41 = vpop.f32.mrf.mxu0  ;;  %8419 = vmatmul.mubr.msk.f32.gmra.mxu1 %vm6602_vm6, %v8384_v38 }
0x120c   : > { %8468 = vmatpush3.msra.mxu1 %v6924_v39  ;;  %8454 = vmatprep.mubr.msk.f32.mxu0 %vm6602_vm6, %v6561_v7 }
0x120d   : > { %8469 = vmatprep.subr.mxu1 %v6923_v40  ;;  %v6571_v51 = vpop.f32.mrf.mxu0  ;;  %8455 = vmatmul.mubr.msk.f32.gmra.mxu0 %vm6602_vm6, %v8384_v38 }
0x120e   : > { %8470 = vmatpush3.msra.mxu1 %v6923_v40  ;;  %8421 = vmatprep.mubr.msk.f32.mxu1 %vm6602_vm6, %v6571_v51 }
0x120f   : > { %8471 = vmatprep.subr.mxu1 %v6922_v42  ;;  %v8390_v49 = vpop.f32.mrf.mxu0  ;;  %8422 = vmatmul.mubr.msk.f32.gmra.mxu1 %vm6602_vm6, %v8387_v41 }
0x1210   : > { %8472 = vmatpush3.msra.mxu1 %v6922_v42  ;;  %8457 = vmatprep.mubr.msk.f32.mxu0 %vm6602_vm6, %v6571_v51 }
0x1211   : > { %8473 = vmatprep.subr.mxu1 %v6921_v44  ;;  %v6581_v36 = vpop.f32.mrf.mxu0  ;;  %8458 = vmatmul.mubr.msk.f32.gmra.mxu0 %vm6602_vm6, %v8387_v41 }
0x1212   : > { %8474 = vmatpush3.msra.mxu1 %v6921_v44  ;;  %8424 = vmatprep.mubr.msk.f32.mxu1 %vm6602_vm6, %v6581_v36 }
0x1213   : > { %8475 = vmatprep.subr.mxu1 %v6920_v45  ;;  %8425 = vmatmul.mubr.msk.f32.gmra.mxu1 %vm6602_vm6, %v8390_v49 }
0x1214   : > { %8476 = vmatpush3.msra.mxu1 %v6920_v45  ;;  %8487 = vmatprep.mubr.msk.f32.mxu1 %vm6602_vm6, %v6551_v0 }
0x1215   : > { %8477 = vmatprep.subr.mxu1 %v6919_v46  ;;  %8460 = vmatprep.mubr.msk.f32.mxu0 %vm6602_vm6, %v6581_v36 }
0x1216   : > { %8478 = vmatpush3.msra.mxu1 %v6919_v46  ;;  %8461 = vmatmul.mubr.msk.f32.gmra.mxu0 %vm6602_vm6, %v8390_v49 }
0x1217   : > { %8479 = vmatprep.subr.mxu1 %v6918_v48 }
0x1218   : > { %8480 = vmatpush3.msra.mxu1 %v6918_v48 }
0x1219   : > { %8481 = vmatprep.subr.mxu1 %v6917_v43 }
0x121a   : > { %8482 = vmatpush3.msra.mxu1 %v6917_v43 }
0x121b   : > { %8483 = vmatprep.subr.mxu1 %v6916_v50 }
0x121c   : > { %8484 = vmatpush3.msra.mxu1 %v6916_v50 }
0x121d   : > { %8485 = vmatprep.subr.mxu1 %v6915_v28 }
0x121e   : > { %8486 = vmatpush3.msra.mxu1 %v6915_v28 }
0x121f   : > { %8488 = vmatmul.mubr.msk.f32.vlgmr.msra.gmra.mxu1 %vm6602_vm6, %v8381_v35 }
0x1220   : > { %8490 = vmatprep.mubr.msk.f32.mxu1 %vm6602_vm6, %v6561_v7 }
0x1223   : > { %8491 = vmatmul.mubr.msk.f32.gmra.mxu1 %vm6602_vm6, %v8384_v38 }
0x1224   : > { %8493 = vmatprep.mubr.msk.f32.mxu1 %vm6602_vm6, %v6571_v51 }
0x1227   : > { %8494 = vmatmul.mubr.msk.f32.gmra.mxu1 %vm6602_vm6, %v8387_v41 }
0x1228   : > { %8496 = vmatprep.mubr.msk.f32.mxu1 %vm6602_vm6, %v6581_v36 }
0x122b   : > { %8497 = vmatmul.mubr.msk.f32.gmra.mxu1 %vm6602_vm6, %v8390_v49 }
0x12c7   : > { %v8417_v37 = vpop.f32.mrf.mxu1  ;;  %v8453_v60 = vpop.f32.mrf.mxu0 }
0x12c8   : > { %6734 = vst.msk [vmem:[%s10140_s1 + $0x8] sm:$0xff] %vm5963_vm5, %v8417_v37  ;;  %7681 = vst.msk [vmem:[%s10140_s1 + $0x48] sm:$0xff] %vm5963_vm5, %v8453_v60 }
0x12c9   : > { %v6693_v32 = vpop.f32.mrf.mxu1  ;;  %v6867_v33 = vpop.f32.mrf.mxu0 }
0x12ca   : > { %6733 = vst.msk [vmem:[%s10140_s1] sm:$0xff] %vm5963_vm5, %v6693_v32  ;;  %7680 = vst.msk [vmem:[%s10140_s1 + $0x40] sm:$0xff] %vm5963_vm5, %v6867_v33 }
0x12cb   : > { %v8420_v34 = vpop.f32.mrf.mxu1 }
0x12cc   : > { %6736 = vst.msk [vmem:[%s10140_s1 + $0x18] sm:$0xff] %vm5963_vm5, %v8420_v34 }
0x12cd   : > { %v6703_v52 = vpop.f32.mrf.mxu1  ;;  %v8456_v54 = vpop.f32.mrf.mxu0 }
0x12ce   : > { %6735 = vst.msk [vmem:[%s10140_s1 + $0x10] sm:$0xff] %vm5963_vm5, %v6703_v52  ;;  %7683 = vst.msk [vmem:[%s10140_s1 + $0x58] sm:$0xff] %vm5963_vm5, %v8456_v54 }
0x12cf   : > { %v8423_v56 = vpop.f32.mrf.mxu1  ;;  %v6877_v26 = vpop.f32.mrf.mxu0 }
0x12d0   : > { %6738 = vst.msk [vmem:[%s10140_s1 + $0x28] sm:$0xff] %vm5963_vm5, %v8423_v56  ;;  %7682 = vst.msk [vmem:[%s10140_s1 + $0x50] sm:$0xff] %vm5963_vm5, %v6877_v26 }
0x12d1   : > { %v6713_v58 = vpop.f32.mrf.mxu1  ;;  %v8459_v59 = vpop.f32.mrf.mxu0 }
0x12d2   : > { %6737 = vst.msk [vmem:[%s10140_s1 + $0x20] sm:$0xff] %vm5963_vm5, %v6713_v58  ;;  %7685 = vst.msk [vmem:[%s10140_s1 + $0x68] sm:$0xff] %vm5963_vm5, %v8459_v59 }
0x12d3   : > { %v8426_v61 = vpop.f32.mrf.mxu1  ;;  %v6887_v20 = vpop.f32.mrf.mxu0 }
0x12d4   : > { %6740 = vst.msk [vmem:[%s10140_s1 + $0x38] sm:$0xff] %vm5963_vm5, %v8426_v61  ;;  %7684 = vst.msk [vmem:[%s10140_s1 + $0x60] sm:$0xff] %vm5963_vm5, %v6887_v20 }
0x12d5   : > { %v6723_v62 = vpop.f32.mrf.mxu1 }
0x12d6   : > { %6739 = vst.msk [vmem:[%s10140_s1 + $0x30] sm:$0xff] %vm5963_vm5, %v6723_v62  ;;  %v8462_v1 = vpop.f32.mrf.mxu0 }
0x12d7   : > { %7687 = vst.msk [vmem:[%s10140_s1 + $0x78] sm:$0xff] %vm5963_vm5, %v8462_v1 }
0x12d8   : > { %v6897_v53 = vpop.f32.mrf.mxu0 }
0x12d9   : > { %7686 = vst.msk [vmem:[%s10140_s1 + $0x70] sm:$0xff] %vm5963_vm5, %v6897_v53 }
0x12df   : > { %v8489_v55 = vpop.f32.mrf.mxu1 }
0x12e0   : > { %7697 = vst.msk [vmem:[%s10140_s1 + $0x88] sm:$0xff] %vm5963_vm5, %v8489_v55 }
0x12e1   : > { %v6993_v3 = vpop.f32.mrf.mxu1 }
0x12e2   : > { %7696 = vst.msk [vmem:[%s10140_s1 + $0x80] sm:$0xff] %vm5963_vm5, %v6993_v3 }
0x12e3   : > { %v8492_v4 = vpop.f32.mrf.mxu1 }
0x12e4   : > { %7699 = vst.msk [vmem:[%s10140_s1 + $0x98] sm:$0xff] %vm5963_vm5, %v8492_v4 }
0x12e5   : > { %v7003_v17 = vpop.f32.mrf.mxu1 }
0x12e6   : > { %7698 = vst.msk [vmem:[%s10140_s1 + $0x90] sm:$0xff] %vm5963_vm5, %v7003_v17 }
0x12e7   : > { %v8495_v5 = vpop.f32.mrf.mxu1 }
0x12e8   : > { %7701 = vst.msk [vmem:[%s10140_s1 + $0xa8] sm:$0xff] %vm5963_vm5, %v8495_v5 }
0x12e9   : > { %v7013_v22 = vpop.f32.mrf.mxu1 }
0x12ea   : > { %7700 = vst.msk [vmem:[%s10140_s1 + $0xa0] sm:$0xff] %vm5963_vm5, %v7013_v22 }
0x12eb   : > { %v8498_v24 = vpop.f32.mrf.mxu1 }
0x12ec   : > { %7703 = vst.msk [vmem:[%s10140_s1 + $0xb8] sm:$0xff] %vm5963_vm5, %v8498_v24 }
0x12ed   : > { %v7023_v6 = vpop.f32.mrf.mxu1 }
0x12ee   : > { %7702 = vst.msk [vmem:[%s10140_s1 + $0xb0] sm:$0xff] %vm5963_vm5, %v7023_v6 }
0x12ef   : > { %9119 = shalt.err (!%p9116_p12)
}
0x12f0   : > { %s9120_s5 = scalar_lea.hbm %s10191_s24, 3072  ;;  %s9124_s26 = scalar_lea.hbm %s10322_s27, 6144 }
0x12f1   : > { %p9121_p10 = scmp.ne.s32.totalorder %s10191_s24, %s9120_s5  ;;  %p9125_p3 = scmp.lt.s32.totalorder %s10191_s24, %s10322_s27 }
0x12f2   : > { %p9126_p9 = scmp.lt.s32.totalorder %s9124_s26, %s9120_s5 }
0x12f3   : > { %p9122_p11 = pnand %p9121_p10, %p9370_p5 }
0x12f4   : > { %p9127_p4 = por %p9126_p9, %p9125_p3 }
0x12f5   : > { %p9123_p1 = pneg %p9122_p11 }
0x12f7   : > { %p9128_p13 = pnand %p9127_p4, %p9123_p1 }
0x12f9   : > { %9131 = shalt.err (!%p9128_p13)
}
0x12fa   : > { %s9215_s25 = smov 128   ;;  %s9216_s9 = smov 8  }
0x12fb   : > { %8533 = dma.vmem_to_hbm [thread:$0]  (%p9370_p5), %s10193_s22, 3072, %s10191_s24, %s10201_s4, %s9215_s25, %s9215_s25, %s9216_s9  }
0x12fc PF: > { %s10323_s0 = sld [smem:[#allocation25_spill]] }
0x12fd   : > { %s10324_s2 = sld [smem:[#allocation23_spill]] }
0x1302   : > { %p8580_p2 = scmp.ge.s32.totalorder %s10323_s0, 2 }
0x1303   : > { %s7070_s23 = sand.u32 1, %s10324_s2  }
0x1304   : > { %p8561_p7 = pnand %p8580_p2, %p9374_p6  ;;  %s7071_s5 = scalar_lea.sflag [#allocation4], %s7070_s23 }
0x1306   : > { %p8562_p8 = pneg %p8561_p7 }
0x1308   : > { %9169 = dma.done.wait (%p8562_p8), %s7071_s5, 3072  }
0x1309   : > { %9171 = vsyncadd (%p8562_p8), %s7071_s5, 4294964224  ;;  %s10326_s30 = sld [smem:[#allocation26_spill]]  ;;  %s10329_s3 = smov %s9178_s28 }
0x130a   : > { %s10327_s29 = sld [smem:[#allocation24_spill]] }
0x130b   : > { %s10328_s26 = sld [smem:[#allocation27_spill]] }
0x130f   : > { %p37_p0 = scmp.ge.s32.totalorder %s10326_s30, 4  }
0x1310   : > { %s10330_s28 = smov %s10327_s29 }
0x1311   : > { %s10331_s29 = smov %s10328_s26  ;;  %39 = sbr.rel (!%p37_p0) target bundleno = 19 (0x13), region = 178 }
0x1316   :  { %7076 = vsyncpa [#allocation3], 1 }
0x1317   :  { %7078 = vsyncpa [#allocation3 + $0x1], 1 }
0x1318   :  { %7079 = vsyncpa [#allocation6], 1 }
0x1319   :  { %7080 = vsyncpa [#allocation9], 1 }
0x131a   :  { %7081 = vsyncpa [#allocation12], 1 }
0x131b   :  { %7082 = vsyncpa [#allocation15], 1 }
0x131c   :  { %7083 = vsyncpa [#allocation4], 1 }
0x131d   :  { %7085 = vsyncpa [#allocation4 + $0x1], 1 }

</bundles_post_ra>
